<compile_context>
chip_gen: v5e
topology: v5e:2x2
jax: 0.10.0
libtpu: 0.0.40
codegen_flags: <defaults>
</compile_context>

<pallas_src>
import jax
import jax.numpy as jnp
from jax.experimental import pallas as pl
from jax.experimental.pallas import tpu as pltpu

# ----- model config (small, consistent with the module) -----
NUM_LAYERS = 2
NUM_HEADS = 4
VOCAB_SIZE = 32
EMBED_DIM = 32
NUM_CLASSES = 16
MAX_SEQ_LEN = 16
BATCH = 2
SEQ_IN = 8                      # tokens fed in; forward prepends a BOS -> seq = 9
SEQ = SEQ_IN + 1
SEQ_PAD = 16                    # padded seq so all row offsets are multiples of 8
WIDEN = 4
HEAD_DIM = EMBED_DIM // NUM_HEADS
HIDDEN = WIDEN * EMBED_DIM      # 128 -> lane-aligned split point for the fused FF weight

EPS = float(jnp.finfo(jnp.float32).eps)   # matches torch.nn.RMSNorm default eps
NEG_INF = -1e30


# --------------------------------------------------------------------------
# Fused Pallas kernel: embeddings -> L transformer blocks -> last-token head
# --------------------------------------------------------------------------
def _rmsnorm(x, gamma):
    # x: (R, E), gamma: (1, E)
    ms = jnp.mean(x * x, axis=-1, keepdims=True)
    return x * jax.lax.rsqrt(ms + EPS) * gamma


def chessnet_kernel(toks_ref, pos_slab_ref, mask_ref, tok_emb_ref,
                    g1_ref, wqkv_ref, wo_ref, g2_ref,
                    w12_ref, wf_ref, wfin_ref, bfin_ref,
                    o_ref, attn_sc):
    B, S, SP, E, H, D = BATCH, SEQ, SEQ_PAD, EMBED_DIM, NUM_HEADS, HEAD_DIM
    BSP = B * SP
    f32 = jnp.float32

    # ---- data-dependent token embedding as ONE one-hot MXU matmul; constant
    #      positional slab was precomputed in the wrapper ----
    tok_oh = (toks_ref[...] ==
              jax.lax.broadcasted_iota(jnp.int32, (BSP, VOCAB_SIZE), 1)).astype(f32)
    h = jnp.dot(tok_oh, tok_emb_ref[...], preferred_element_type=f32) + pos_slab_ref[...]

    contract_last = (((1,), (1,)), ((), ()))      # q @ k^T without an explicit transpose

    for li in range(NUM_LAYERS):                  # static unroll over layers
        # ---- attention sub-block (batch folded into matmul rows) ----
        x = h                                                            # (BSP, E)
        x_ln = _rmsnorm(x, g1_ref[li])
        qkv = jnp.dot(x_ln, wqkv_ref[li], preferred_element_type=f32)    # (BSP, 3E)
        q = qkv[:, 0:E]                 # 1/sqrt(D) already folded into the q weights
        k = qkv[:, E:2 * E]
        v = qkv[:, 2 * E:3 * E]

        # all B*H (SP,SP) score tiles, stacked along the sublane axis -> (B*H*SP, SP)
        tiles = []
        for b in range(B):
            r0 = b * SP
            for hh in range(H):
                c0 = hh * D
                tiles.append(jax.lax.dot_general(
                    q[r0:r0 + SP, c0:c0 + D], k[r0:r0 + SP, c0:c0 + D],
                    contract_last, preferred_element_type=f32))
        s_all = jnp.concatenate(tiles, axis=0) + mask_ref[...]

        # ONE batched softmax for every batch/head tile of this layer
        m = jnp.max(s_all, axis=-1, keepdims=True)
        p_all = jnp.exp(s_all - m)
        l = jnp.sum(p_all, axis=-1, keepdims=True)
        # exact reciprocal (approx=True would use the cheap EUP vrcp but risks the 1e-4 check)
        p_all = p_all * pl.reciprocal(l, approx=False)

        # per-head PV matmuls, slice-stored into sublane-aligned VMEM scratch
        for b in range(B):
            r0 = b * SP
            for hh in range(H):
                c0 = hh * D
                t0 = (b * H + hh) * SP
                attn_sc[pl.ds(r0, SP), pl.ds(c0, D)] = jnp.dot(
                    p_all[t0:t0 + SP, :], v[r0:r0 + SP, c0:c0 + D],
                    preferred_element_type=f32)

        x = x + jnp.dot(attn_sc[...], wo_ref[li], preferred_element_type=f32)  # resid 1

        # ---- SwiGLU feed-forward, fused w1|w2 up-projection ----
        x_ln2 = _rmsnorm(x, g2_ref[li])
        x12 = jnp.dot(x_ln2, w12_ref[li], preferred_element_type=f32)    # (BSP, 2*HIDDEN)
        x1 = x12[:, :HIDDEN]                                             # lane-128 split
        x2 = x12[:, HIDDEN:]
        ff = jnp.dot((x1 * jax.nn.sigmoid(x1)) * x2, wf_ref[li],
                     preferred_element_type=f32)                         # (BSP, E)
        h = x + ff                                                       # residual 2

    # ---- head only on the aligned last-token tail rows (starts 8 and 24) ----
    tails = jnp.concatenate(
        [h[b * SP + S - 1:b * SP + S - 1 + 8, :] for b in range(B)], axis=0)  # (8B, E)
    logits = jnp.dot(tails, wfin_ref[...], preferred_element_type=f32) + bfin_ref[...]
    for b in range(B):
        o_ref[b:b + 1, :] = logits[8 * b:8 * b + 1, :]


# --------------------------------------------------------------------------
# Wrapper: single pallas_call, whole arrays resident in VMEM (no grid)
# --------------------------------------------------------------------------
def _vmem_spec():
    return pl.BlockSpec(memory_space=pltpu.MemorySpace.VMEM)


@jax.jit
def chessnet_forward(tokens, params):
    B, L = tokens.shape
    S = L + 1
    SP = SEQ_PAD
    BSP = B * SP

    # token ids: prepend BOS(=0), pad each row to SP with 0, flatten to (B*SP, 1)
    bos = jnp.zeros((B, 1), dtype=jnp.int32)
    toks = jnp.concatenate([bos, tokens.astype(jnp.int32)], axis=1)      # (B, S)
    toks = jnp.zeros((B, SP), jnp.int32).at[:, :S].set(toks)             # (B, SP)
    toks_col = toks.reshape(BSP, 1)

    # constant positional slab (padded rows get positions >= S; harmless, row-independent)
    pos_slab = jnp.tile(params["pos_emb"][:SP], (B, 1))                  # (BSP, E)

    # additive causal bias, tiled over the B*H stacked score tiles
    rr = jnp.arange(SP)[:, None]
    cc = jnp.arange(SP)[None, :]
    bias = jnp.where(rr >= cc, 0.0, NEG_INF).astype(jnp.float32)
    mask_bias = jnp.tile(bias, (B * NUM_HEADS, 1))                       # (B*H*SP, SP)

    return pl.pallas_call(
        chessnet_kernel,
        out_shape=jax.ShapeDtypeStruct((B, NUM_CLASSES), jnp.float32),
        in_specs=[_vmem_spec() for _ in range(12)],
        out_specs=_vmem_spec(),
        scratch_shapes=[pltpu.VMEM((BSP, EMBED_DIM), jnp.float32)],
    )(toks_col, pos_slab, mask_bias,
      params["tok_emb"],
      params["g1"], params["wqkv_scaled_t"], params["wo_t"], params["g2"],
      params["w12_t"], params["wf_t"],
      params["w_final_t"], params["b_final"].reshape(1, NUM_CLASSES))


# --------------------------------------------------------------------------
# Pure-JAX reference (mirrors the PyTorch forward) for self-check
# --------------------------------------------------------------------------
def reference_forward(tokens, params):
    B, L = tokens.shape
    S = L + 1
    bos = jnp.zeros((B, 1), dtype=jnp.int32)
    toks = jnp.concatenate([bos, tokens.astype(jnp.int32)], axis=1)
    h = params["tok_emb"][toks] + params["pos_emb"][jnp.arange(S)][None, :, :]

    def rmsnorm(x, g):
        ms = jnp.mean(x * x, axis=-1, keepdims=True)
        return x * jax.lax.rsqrt(ms + EPS) * g

    E, H, D = EMBED_DIM, NUM_HEADS, HEAD_DIM
    for li in range(NUM_LAYERS):
        x = h
        x_ln = rmsnorm(x, params["g1"][li])
        qkv = x_ln @ params["wqkv_t"][li]
        q, k, v = qkv[..., :E], qkv[..., E:2 * E], qkv[..., 2 * E:]

        def split(t):
            return t.reshape(B, S, H, D).transpose(0, 2, 1, 3)

        q, k, v = split(q), split(k), split(v)
        s = jnp.einsum("bhqd,bhkd->bhqk", q, k) / (D ** 0.5)
        mask = jnp.tril(jnp.ones((S, S), dtype=bool))
        s = jnp.where(mask, s, NEG_INF)
        p_attn = jax.nn.softmax(s, axis=-1)
        o = jnp.einsum("bhqk,bhkd->bhqd", p_attn, v)
        o = o.transpose(0, 2, 1, 3).reshape(B, S, E)
        x = x + o @ params["wo_t"][li]
        x_ln = rmsnorm(x, params["g2"][li])
        x1 = x_ln @ params["w1_t"][li]
        x2 = x_ln @ params["w2_t"][li]
        ff = (x1 * jax.nn.sigmoid(x1) * x2) @ params["wf_t"][li]
        h = x + ff
    logits = h @ params["w_final_t"] + params["b_final"]
    return logits[:, -1, :]


# --------------------------------------------------------------------------
# Deterministic parameter init (weights pre-transposed, stacked over layers).
# Kernel-only derived weights (scale folded into q columns, fused w1|w2) are
# built once here on the host -> zero runtime cost.
# --------------------------------------------------------------------------
def init_params(key):
    E, C, Lyr = EMBED_DIM, NUM_CLASSES, NUM_LAYERS
    keys = jax.random.split(key, 9)

    def nrm(k, shape, scale=0.02):
        return jax.random.normal(k, shape, jnp.float32) * scale

    wqkv_t = nrm(keys[4], (Lyr, E, 3 * E))
    w1_t = nrm(keys[6], (Lyr, E, HIDDEN))
    w2_t = nrm(keys[7], (Lyr, E, HIDDEN))

    params = {
        "tok_emb": nrm(keys[0], (VOCAB_SIZE, E)),
        "pos_emb": nrm(keys[1], (MAX_SEQ_LEN, E)),
        "w_final_t": nrm(keys[2], (E, C)),
        "b_final": nrm(keys[3], (C,)),
        "g1": jnp.ones((Lyr, 1, E), jnp.float32),        # RMSNorm weight init = 1
        "g2": jnp.ones((Lyr, 1, E), jnp.float32),
        "wqkv_t": wqkv_t,
        "wo_t": nrm(keys[5], (Lyr, E, E)),
        "w1_t": w1_t,
        "w2_t": w2_t,
        "wf_t": nrm(keys[8], (Lyr, HIDDEN, E)),
    }
    # kernel-side derived weights
    attn_scale = 1.0 / (HEAD_DIM ** 0.5)
    params["wqkv_scaled_t"] = wqkv_t.at[:, :, :E].multiply(attn_scale)
    params["w12_t"] = jnp.concatenate([w1_t, w2_t], axis=-1)             # (Lyr, E, 2*HIDDEN)
    return params


# --------------------------------------------------------------------------
if __name__ == "__main__":
    key = jax.random.PRNGKey(0)
    pk, tk = jax.random.split(key)
    params = init_params(pk)
    tokens = jax.random.randint(tk, (BATCH, SEQ_IN), 1, VOCAB_SIZE, dtype=jnp.int32)

    logits = jax.block_until_ready(chessnet_forward(tokens, params))
    assert logits.shape == (BATCH, NUM_CLASSES)

    ref = jax.block_until_ready(reference_forward(tokens, params))
    assert jnp.allclose(logits, ref, atol=1e-4, rtol=1e-4), (
        f"max abs err {jnp.max(jnp.abs(logits - ref))}")

    print("KERNEL_OK")
</pallas_src>

<mosaic_0001>
module attributes {stable_mosaic.version = 11 : i64} {
  func.func @chessnet_kernel(%arg0: memref<32x1xi32, #tpu.memory_space<vmem>>, %arg1: memref<32x32xf32, #tpu.memory_space<vmem>>, %arg2: memref<128x16xf32, #tpu.memory_space<vmem>>, %arg3: memref<32x32xf32, #tpu.memory_space<vmem>>, %arg4: memref<2x1x32xf32, #tpu.memory_space<vmem>>, %arg5: memref<2x32x96xf32, #tpu.memory_space<vmem>>, %arg6: memref<2x32x32xf32, #tpu.memory_space<vmem>>, %arg7: memref<2x1x32xf32, #tpu.memory_space<vmem>>, %arg8: memref<2x32x256xf32, #tpu.memory_space<vmem>>, %arg9: memref<2x128x32xf32, #tpu.memory_space<vmem>>, %arg10: memref<32x16xf32, #tpu.memory_space<vmem>>, %arg11: memref<1x16xf32, #tpu.memory_space<vmem>>, %arg12: memref<2x16xf32, #tpu.memory_space<vmem>>, %arg13: memref<32x32xf32, #tpu.memory_space<vmem>>) attributes {dimension_semantics = [], scalar_prefetch = 0 : i64, scratch_operands = 1 : i64, tpu.core_type = #tpu.core_type<tc>} {
    %c0 = arith.constant 0 : index
    %c0_0 = arith.constant 0 : index
    %0 = vector.load %arg0[%c0, %c0_0] : memref<32x1xi32, #tpu.memory_space<vmem>>, vector<32x1xi32>
    %1 = tpu.iota {dimensions = array<i32: 1>} : vector<32x32xi32>
    %2 = vector.broadcast %0 : vector<32x1xi32> to vector<32x32xi32>
    %3 = arith.cmpi eq, %2, %1 : vector<32x32xi32>
    %4 = arith.extui %3 : vector<32x32xi1> to vector<32x32xi32>
    %5 = arith.sitofp %4 : vector<32x32xi32> to vector<32x32xf32>
    %c0_1 = arith.constant 0 : index
    %c0_2 = arith.constant 0 : index
    %6 = vector.load %arg3[%c0_1, %c0_2] : memref<32x32xf32, #tpu.memory_space<vmem>>, vector<32x32xf32>
    %cst = arith.constant dense<0.000000e+00> : vector<32x32xf32>
    %7 = tpu.matmul %5, %6, %cst {dimension_numbers = #tpu.dot_dimension_numbers<[1], [0], [0], [1], [0, 0, 1, 1], [], []>} : vector<32x32xf32>, vector<32x32xf32>, vector<32x32xf32> -> vector<32x32xf32>
    %c0_3 = arith.constant 0 : index
    %c0_4 = arith.constant 0 : index
    %8 = vector.load %arg1[%c0_3, %c0_4] : memref<32x32xf32, #tpu.memory_space<vmem>>, vector<32x32xf32>
    %9 = arith.addf %7, %8 : vector<32x32xf32>
    %c0_5 = arith.constant 0 : index
    %c0_6 = arith.constant 0 : index
    %c0_7 = arith.constant 0 : index
    %10 = vector.load %arg4[%c0_5, %c0_6, %c0_7] : memref<2x1x32xf32, #tpu.memory_space<vmem>>, vector<1x1x32xf32>
    %11 = vector.shape_cast %10 : vector<1x1x32xf32> to vector<1x32xf32>
    %12 = arith.mulf %9, %9 : vector<32x32xf32>
    %cst_8 = arith.constant dense<0.000000e+00> : vector<32xf32>
    %13 = vector.multi_reduction <add>, %12, %cst_8 [1] : vector<32x32xf32> to vector<32xf32>
    %14 = vector.shape_cast %13 : vector<32xf32> to vector<32x1xf32>
    %cst_9 = arith.constant 3.200000e+01 : f32
    %15 = vector.broadcast %cst_9 : f32 to vector<32x1xf32>
    %16 = arith.divf %14, %15 : vector<32x1xf32>
    %cst_10 = arith.constant 1.1920929E-7 : f32
    %17 = vector.broadcast %cst_10 : f32 to vector<32x1xf32>
    %18 = arith.addf %16, %17 : vector<32x1xf32>
    %19 = math.rsqrt %18 : vector<32x1xf32>
    %20 = vector.broadcast %19 : vector<32x1xf32> to vector<32x32xf32>
    %21 = arith.mulf %9, %20 : vector<32x32xf32>
    %22 = vector.broadcast %11 : vector<1x32xf32> to vector<32x32xf32>
    %23 = arith.mulf %21, %22 : vector<32x32xf32>
    %c0_11 = arith.constant 0 : index
    %c0_12 = arith.constant 0 : index
    %c0_13 = arith.constant 0 : index
    %24 = vector.load %arg5[%c0_11, %c0_12, %c0_13] : memref<2x32x96xf32, #tpu.memory_space<vmem>>, vector<1x32x96xf32>
    %25 = vector.shape_cast %24 : vector<1x32x96xf32> to vector<32x96xf32>
    %cst_14 = arith.constant dense<0.000000e+00> : vector<32x96xf32>
    %26 = tpu.matmul %23, %25, %cst_14 {dimension_numbers = #tpu.dot_dimension_numbers<[1], [0], [0], [1], [0, 0, 1, 1], [], []>} : vector<32x32xf32>, vector<32x96xf32>, vector<32x96xf32> -> vector<32x96xf32>
    %27 = vector.extract_strided_slice %26 {offsets = [0, 0], sizes = [32, 32], strides = [1, 1]} : vector<32x96xf32> to vector<32x32xf32>
    %28 = vector.extract_strided_slice %26 {offsets = [0, 32], sizes = [32, 32], strides = [1, 1]} : vector<32x96xf32> to vector<32x32xf32>
    %29 = vector.extract_strided_slice %26 {offsets = [0, 64], sizes = [32, 32], strides = [1, 1]} : vector<32x96xf32> to vector<32x32xf32>
    %30 = vector.extract_strided_slice %27 {offsets = [0, 0], sizes = [16, 8], strides = [1, 1]} : vector<32x32xf32> to vector<16x8xf32>
    %31 = vector.extract_strided_slice %28 {offsets = [0, 0], sizes = [16, 8], strides = [1, 1]} : vector<32x32xf32> to vector<16x8xf32>
    %cst_15 = arith.constant dense<0.000000e+00> : vector<16x16xf32>
    %32 = tpu.matmul %30, %31, %cst_15 {dimension_numbers = #tpu.dot_dimension_numbers<[1], [1], [0], [0], [0, 0, 1, 0], [], []>} : vector<16x8xf32>, vector<16x8xf32>, vector<16x16xf32> -> vector<16x16xf32>
    %33 = vector.extract_strided_slice %27 {offsets = [0, 8], sizes = [16, 8], strides = [1, 1]} : vector<32x32xf32> to vector<16x8xf32>
    %34 = vector.extract_strided_slice %28 {offsets = [0, 8], sizes = [16, 8], strides = [1, 1]} : vector<32x32xf32> to vector<16x8xf32>
    %cst_16 = arith.constant dense<0.000000e+00> : vector<16x16xf32>
    %35 = tpu.matmul %33, %34, %cst_16 {dimension_numbers = #tpu.dot_dimension_numbers<[1], [1], [0], [0], [0, 0, 1, 0], [], []>} : vector<16x8xf32>, vector<16x8xf32>, vector<16x16xf32> -> vector<16x16xf32>
    %36 = vector.extract_strided_slice %27 {offsets = [0, 16], sizes = [16, 8], strides = [1, 1]} : vector<32x32xf32> to vector<16x8xf32>
    %37 = vector.extract_strided_slice %28 {offsets = [0, 16], sizes = [16, 8], strides = [1, 1]} : vector<32x32xf32> to vector<16x8xf32>
    %cst_17 = arith.constant dense<0.000000e+00> : vector<16x16xf32>
    %38 = tpu.matmul %36, %37, %cst_17 {dimension_numbers = #tpu.dot_dimension_numbers<[1], [1], [0], [0], [0, 0, 1, 0], [], []>} : vector<16x8xf32>, vector<16x8xf32>, vector<16x16xf32> -> vector<16x16xf32>
    %39 = vector.extract_strided_slice %27 {offsets = [0, 24], sizes = [16, 8], strides = [1, 1]} : vector<32x32xf32> to vector<16x8xf32>
    %40 = vector.extract_strided_slice %28 {offsets = [0, 24], sizes = [16, 8], strides = [1, 1]} : vector<32x32xf32> to vector<16x8xf32>
    %cst_18 = arith.constant dense<0.000000e+00> : vector<16x16xf32>
    %41 = tpu.matmul %39, %40, %cst_18 {dimension_numbers = #tpu.dot_dimension_numbers<[1], [1], [0], [0], [0, 0, 1, 0], [], []>} : vector<16x8xf32>, vector<16x8xf32>, vector<16x16xf32> -> vector<16x16xf32>
    %42 = vector.extract_strided_slice %27 {offsets = [16, 0], sizes = [16, 8], strides = [1, 1]} : vector<32x32xf32> to vector<16x8xf32>
    %43 = vector.extract_strided_slice %28 {offsets = [16, 0], sizes = [16, 8], strides = [1, 1]} : vector<32x32xf32> to vector<16x8xf32>
    %cst_19 = arith.constant dense<0.000000e+00> : vector<16x16xf32>
    %44 = tpu.matmul %42, %43, %cst_19 {dimension_numbers = #tpu.dot_dimension_numbers<[1], [1], [0], [0], [0, 0, 1, 0], [], []>} : vector<16x8xf32>, vector<16x8xf32>, vector<16x16xf32> -> vector<16x16xf32>
    %45 = vector.extract_strided_slice %27 {offsets = [16, 8], sizes = [16, 8], strides = [1, 1]} : vector<32x32xf32> to vector<16x8xf32>
    %46 = vector.extract_strided_slice %28 {offsets = [16, 8], sizes = [16, 8], strides = [1, 1]} : vector<32x32xf32> to vector<16x8xf32>
    %cst_20 = arith.constant dense<0.000000e+00> : vector<16x16xf32>
    %47 = tpu.matmul %45, %46, %cst_20 {dimension_numbers = #tpu.dot_dimension_numbers<[1], [1], [0], [0], [0, 0, 1, 0], [], []>} : vector<16x8xf32>, vector<16x8xf32>, vector<16x16xf32> -> vector<16x16xf32>
    %48 = vector.extract_strided_slice %27 {offsets = [16, 16], sizes = [16, 8], strides = [1, 1]} : vector<32x32xf32> to vector<16x8xf32>
    %49 = vector.extract_strided_slice %28 {offsets = [16, 16], sizes = [16, 8], strides = [1, 1]} : vector<32x32xf32> to vector<16x8xf32>
    %cst_21 = arith.constant dense<0.000000e+00> : vector<16x16xf32>
    %50 = tpu.matmul %48, %49, %cst_21 {dimension_numbers = #tpu.dot_dimension_numbers<[1], [1], [0], [0], [0, 0, 1, 0], [], []>} : vector<16x8xf32>, vector<16x8xf32>, vector<16x16xf32> -> vector<16x16xf32>
    %51 = vector.extract_strided_slice %27 {offsets = [16, 24], sizes = [16, 8], strides = [1, 1]} : vector<32x32xf32> to vector<16x8xf32>
    %52 = vector.extract_strided_slice %28 {offsets = [16, 24], sizes = [16, 8], strides = [1, 1]} : vector<32x32xf32> to vector<16x8xf32>
    %cst_22 = arith.constant dense<0.000000e+00> : vector<16x16xf32>
    %53 = tpu.matmul %51, %52, %cst_22 {dimension_numbers = #tpu.dot_dimension_numbers<[1], [1], [0], [0], [0, 0, 1, 0], [], []>} : vector<16x8xf32>, vector<16x8xf32>, vector<16x16xf32> -> vector<16x16xf32>
    %54 = tpu.concatenate %32, %35, %38, %41, %44, %47, %50, %53 in 0 : vector<16x16xf32>, vector<16x16xf32>, vector<16x16xf32>, vector<16x16xf32>, vector<16x16xf32>, vector<16x16xf32>, vector<16x16xf32>, vector<16x16xf32> -> vector<128x16xf32>
    %c0_23 = arith.constant 0 : index
    %c0_24 = arith.constant 0 : index
    %55 = vector.load %arg2[%c0_23, %c0_24] : memref<128x16xf32, #tpu.memory_space<vmem>>, vector<128x16xf32>
    %56 = arith.addf %54, %55 : vector<128x16xf32>
    %cst_25 = arith.constant dense<0xFF800000> : vector<128xf32>
    %57 = vector.multi_reduction <maximumf>, %56, %cst_25 [1] : vector<128x16xf32> to vector<128xf32>
    %58 = vector.shape_cast %57 : vector<128xf32> to vector<128x1xf32>
    %59 = vector.broadcast %58 : vector<128x1xf32> to vector<128x16xf32>
    %60 = arith.subf %56, %59 : vector<128x16xf32>
    %61 = math.exp %60 : vector<128x16xf32>
    %cst_26 = arith.constant dense<0.000000e+00> : vector<128xf32>
    %62 = vector.multi_reduction <add>, %61, %cst_26 [1] : vector<128x16xf32> to vector<128xf32>
    %63 = vector.shape_cast %62 : vector<128xf32> to vector<128x1xf32>
    %64 = tpu.reciprocal %63 : vector<128x1xf32> -> vector<128x1xf32>
    %65 = vector.broadcast %64 : vector<128x1xf32> to vector<128x16xf32>
    %66 = arith.mulf %61, %65 : vector<128x16xf32>
    %67 = vector.extract_strided_slice %66 {offsets = [0, 0], sizes = [16, 16], strides = [1, 1]} : vector<128x16xf32> to vector<16x16xf32>
    %68 = vector.extract_strided_slice %29 {offsets = [0, 0], sizes = [16, 8], strides = [1, 1]} : vector<32x32xf32> to vector<16x8xf32>
    %cst_27 = arith.constant dense<0.000000e+00> : vector<16x8xf32>
    %69 = tpu.matmul %67, %68, %cst_27 {dimension_numbers = #tpu.dot_dimension_numbers<[1], [0], [0], [1], [0, 0, 1, 1], [], []>} : vector<16x16xf32>, vector<16x8xf32>, vector<16x8xf32> -> vector<16x8xf32>
    %c0_28 = arith.constant 0 : index
    %c0_29 = arith.constant 0 : index
    %70 = vector.load %arg13[%c0_28, %c0_29] : memref<32x32xf32, #tpu.memory_space<vmem>>, vector<16x8xf32>
    tpu.vector_store %arg13[%c0_28, %c0_29], %69 {strides = array<i32>} : memref<32x32xf32, #tpu.memory_space<vmem>>, vector<16x8xf32>,
    %71 = vector.extract_strided_slice %66 {offsets = [16, 0], sizes = [16, 16], strides = [1, 1]} : vector<128x16xf32> to vector<16x16xf32>
    %72 = vector.extract_strided_slice %29 {offsets = [0, 8], sizes = [16, 8], strides = [1, 1]} : vector<32x32xf32> to vector<16x8xf32>
    %cst_30 = arith.constant dense<0.000000e+00> : vector<16x8xf32>
    %73 = tpu.matmul %71, %72, %cst_30 {dimension_numbers = #tpu.dot_dimension_numbers<[1], [0], [0], [1], [0, 0, 1, 1], [], []>} : vector<16x16xf32>, vector<16x8xf32>, vector<16x8xf32> -> vector<16x8xf32>
    %c0_31 = arith.constant 0 : index
    %c8 = arith.constant 8 : index
    %74 = vector.load %arg13[%c0_31, %c8] : memref<32x32xf32, #tpu.memory_space<vmem>>, vector<16x8xf32>
    tpu.vector_store %arg13[%c0_31, %c8], %73 {strides = array<i32>} : memref<32x32xf32, #tpu.memory_space<vmem>>, vector<16x8xf32>,
    %75 = vector.extract_strided_slice %66 {offsets = [32, 0], sizes = [16, 16], strides = [1, 1]} : vector<128x16xf32> to vector<16x16xf32>
    %76 = vector.extract_strided_slice %29 {offsets = [0, 16], sizes = [16, 8], strides = [1, 1]} : vector<32x32xf32> to vector<16x8xf32>
    %cst_32 = arith.constant dense<0.000000e+00> : vector<16x8xf32>
    %77 = tpu.matmul %75, %76, %cst_32 {dimension_numbers = #tpu.dot_dimension_numbers<[1], [0], [0], [1], [0, 0, 1, 1], [], []>} : vector<16x16xf32>, vector<16x8xf32>, vector<16x8xf32> -> vector<16x8xf32>
    %c0_33 = arith.constant 0 : index
    %c16 = arith.constant 16 : index
    %78 = vector.load %arg13[%c0_33, %c16] : memref<32x32xf32, #tpu.memory_space<vmem>>, vector<16x8xf32>
    tpu.vector_store %arg13[%c0_33, %c16], %77 {strides = array<i32>} : memref<32x32xf32, #tpu.memory_space<vmem>>, vector<16x8xf32>,
    %79 = vector.extract_strided_slice %66 {offsets = [48, 0], sizes = [16, 16], strides = [1, 1]} : vector<128x16xf32> to vector<16x16xf32>
    %80 = vector.extract_strided_slice %29 {offsets = [0, 24], sizes = [16, 8], strides = [1, 1]} : vector<32x32xf32> to vector<16x8xf32>
    %cst_34 = arith.constant dense<0.000000e+00> : vector<16x8xf32>
    %81 = tpu.matmul %79, %80, %cst_34 {dimension_numbers = #tpu.dot_dimension_numbers<[1], [0], [0], [1], [0, 0, 1, 1], [], []>} : vector<16x16xf32>, vector<16x8xf32>, vector<16x8xf32> -> vector<16x8xf32>
    %c0_35 = arith.constant 0 : index
    %c24 = arith.constant 24 : index
    %82 = vector.load %arg13[%c0_35, %c24] : memref<32x32xf32, #tpu.memory_space<vmem>>, vector<16x8xf32>
    tpu.vector_store %arg13[%c0_35, %c24], %81 {strides = array<i32>} : memref<32x32xf32, #tpu.memory_space<vmem>>, vector<16x8xf32>,
    %83 = vector.extract_strided_slice %66 {offsets = [64, 0], sizes = [16, 16], strides = [1, 1]} : vector<128x16xf32> to vector<16x16xf32>
    %84 = vector.extract_strided_slice %29 {offsets = [16, 0], sizes = [16, 8], strides = [1, 1]} : vector<32x32xf32> to vector<16x8xf32>
    %cst_36 = arith.constant dense<0.000000e+00> : vector<16x8xf32>
    %85 = tpu.matmul %83, %84, %cst_36 {dimension_numbers = #tpu.dot_dimension_numbers<[1], [0], [0], [1], [0, 0, 1, 1], [], []>} : vector<16x16xf32>, vector<16x8xf32>, vector<16x8xf32> -> vector<16x8xf32>
    %c16_37 = arith.constant 16 : index
    %c0_38 = arith.constant 0 : index
    %86 = vector.load %arg13[%c16_37, %c0_38] : memref<32x32xf32, #tpu.memory_space<vmem>>, vector<16x8xf32>
    tpu.vector_store %arg13[%c16_37, %c0_38], %85 {strides = array<i32>} : memref<32x32xf32, #tpu.memory_space<vmem>>, vector<16x8xf32>,
    %87 = vector.extract_strided_slice %66 {offsets = [80, 0], sizes = [16, 16], strides = [1, 1]} : vector<128x16xf32> to vector<16x16xf32>
    %88 = vector.extract_strided_slice %29 {offsets = [16, 8], sizes = [16, 8], strides = [1, 1]} : vector<32x32xf32> to vector<16x8xf32>
    %cst_39 = arith.constant dense<0.000000e+00> : vector<16x8xf32>
    %89 = tpu.matmul %87, %88, %cst_39 {dimension_numbers = #tpu.dot_dimension_numbers<[1], [0], [0], [1], [0, 0, 1, 1], [], []>} : vector<16x16xf32>, vector<16x8xf32>, vector<16x8xf32> -> vector<16x8xf32>
    %c16_40 = arith.constant 16 : index
    %c8_41 = arith.constant 8 : index
    %90 = vector.load %arg13[%c16_40, %c8_41] : memref<32x32xf32, #tpu.memory_space<vmem>>, vector<16x8xf32>
    tpu.vector_store %arg13[%c16_40, %c8_41], %89 {strides = array<i32>} : memref<32x32xf32, #tpu.memory_space<vmem>>, vector<16x8xf32>,
    %91 = vector.extract_strided_slice %66 {offsets = [96, 0], sizes = [16, 16], strides = [1, 1]} : vector<128x16xf32> to vector<16x16xf32>
    %92 = vector.extract_strided_slice %29 {offsets = [16, 16], sizes = [16, 8], strides = [1, 1]} : vector<32x32xf32> to vector<16x8xf32>
    %cst_42 = arith.constant dense<0.000000e+00> : vector<16x8xf32>
    %93 = tpu.matmul %91, %92, %cst_42 {dimension_numbers = #tpu.dot_dimension_numbers<[1], [0], [0], [1], [0, 0, 1, 1], [], []>} : vector<16x16xf32>, vector<16x8xf32>, vector<16x8xf32> -> vector<16x8xf32>
    %c16_43 = arith.constant 16 : index
    %c16_44 = arith.constant 16 : index
    %94 = vector.load %arg13[%c16_43, %c16_44] : memref<32x32xf32, #tpu.memory_space<vmem>>, vector<16x8xf32>
    tpu.vector_store %arg13[%c16_43, %c16_44], %93 {strides = array<i32>} : memref<32x32xf32, #tpu.memory_space<vmem>>, vector<16x8xf32>,
    %95 = vector.extract_strided_slice %66 {offsets = [112, 0], sizes = [16, 16], strides = [1, 1]} : vector<128x16xf32> to vector<16x16xf32>
    %96 = vector.extract_strided_slice %29 {offsets = [16, 24], sizes = [16, 8], strides = [1, 1]} : vector<32x32xf32> to vector<16x8xf32>
    %cst_45 = arith.constant dense<0.000000e+00> : vector<16x8xf32>
    %97 = tpu.matmul %95, %96, %cst_45 {dimension_numbers = #tpu.dot_dimension_numbers<[1], [0], [0], [1], [0, 0, 1, 1], [], []>} : vector<16x16xf32>, vector<16x8xf32>, vector<16x8xf32> -> vector<16x8xf32>
    %c16_46 = arith.constant 16 : index
    %c24_47 = arith.constant 24 : index
    %98 = vector.load %arg13[%c16_46, %c24_47] : memref<32x32xf32, #tpu.memory_space<vmem>>, vector<16x8xf32>
    tpu.vector_store %arg13[%c16_46, %c24_47], %97 {strides = array<i32>} : memref<32x32xf32, #tpu.memory_space<vmem>>, vector<16x8xf32>,
    %c0_48 = arith.constant 0 : index
    %c0_49 = arith.constant 0 : index
    %99 = vector.load %arg13[%c0_48, %c0_49] : memref<32x32xf32, #tpu.memory_space<vmem>>, vector<32x32xf32>
    %c0_50 = arith.constant 0 : index
    %c0_51 = arith.constant 0 : index
    %c0_52 = arith.constant 0 : index
    %100 = vector.load %arg6[%c0_50, %c0_51, %c0_52] : memref<2x32x32xf32, #tpu.memory_space<vmem>>, vector<1x32x32xf32>
    %101 = vector.shape_cast %100 : vector<1x32x32xf32> to vector<32x32xf32>
    %cst_53 = arith.constant dense<0.000000e+00> : vector<32x32xf32>
    %102 = tpu.matmul %99, %101, %cst_53 {dimension_numbers = #tpu.dot_dimension_numbers<[1], [0], [0], [1], [0, 0, 1, 1], [], []>} : vector<32x32xf32>, vector<32x32xf32>, vector<32x32xf32> -> vector<32x32xf32>
    %103 = arith.addf %9, %102 : vector<32x32xf32>
    %c0_54 = arith.constant 0 : index
    %c0_55 = arith.constant 0 : index
    %c0_56 = arith.constant 0 : index
    %104 = vector.load %arg7[%c0_54, %c0_55, %c0_56] : memref<2x1x32xf32, #tpu.memory_space<vmem>>, vector<1x1x32xf32>
    %105 = vector.shape_cast %104 : vector<1x1x32xf32> to vector<1x32xf32>
    %106 = arith.mulf %103, %103 : vector<32x32xf32>
    %cst_57 = arith.constant dense<0.000000e+00> : vector<32xf32>
    %107 = vector.multi_reduction <add>, %106, %cst_57 [1] : vector<32x32xf32> to vector<32xf32>
    %108 = vector.shape_cast %107 : vector<32xf32> to vector<32x1xf32>
    %cst_58 = arith.constant 3.200000e+01 : f32
    %109 = vector.broadcast %cst_58 : f32 to vector<32x1xf32>
    %110 = arith.divf %108, %109 : vector<32x1xf32>
    %cst_59 = arith.constant 1.1920929E-7 : f32
    %111 = vector.broadcast %cst_59 : f32 to vector<32x1xf32>
    %112 = arith.addf %110, %111 : vector<32x1xf32>
    %113 = math.rsqrt %112 : vector<32x1xf32>
    %114 = vector.broadcast %113 : vector<32x1xf32> to vector<32x32xf32>
    %115 = arith.mulf %103, %114 : vector<32x32xf32>
    %116 = vector.broadcast %105 : vector<1x32xf32> to vector<32x32xf32>
    %117 = arith.mulf %115, %116 : vector<32x32xf32>
    %c0_60 = arith.constant 0 : index
    %c0_61 = arith.constant 0 : index
    %c0_62 = arith.constant 0 : index
    %118 = vector.load %arg8[%c0_60, %c0_61, %c0_62] : memref<2x32x256xf32, #tpu.memory_space<vmem>>, vector<1x32x256xf32>
    %119 = vector.shape_cast %118 : vector<1x32x256xf32> to vector<32x256xf32>
    %cst_63 = arith.constant dense<0.000000e+00> : vector<32x256xf32>
    %120 = tpu.matmul %117, %119, %cst_63 {dimension_numbers = #tpu.dot_dimension_numbers<[1], [0], [0], [1], [0, 0, 1, 1], [], []>} : vector<32x32xf32>, vector<32x256xf32>, vector<32x256xf32> -> vector<32x256xf32>
    %121 = vector.extract_strided_slice %120 {offsets = [0, 0], sizes = [32, 128], strides = [1, 1]} : vector<32x256xf32> to vector<32x128xf32>
    %122 = vector.extract_strided_slice %120 {offsets = [0, 128], sizes = [32, 128], strides = [1, 1]} : vector<32x256xf32> to vector<32x128xf32>
    %123 = arith.negf %121 : vector<32x128xf32>
    %124 = math.exp %123 : vector<32x128xf32>
    %cst_64 = arith.constant 1.000000e+00 : f32
    %125 = vector.broadcast %cst_64 : f32 to vector<32x128xf32>
    %126 = arith.addf %125, %124 : vector<32x128xf32>
    %127 = arith.divf %125, %126 : vector<32x128xf32>
    %128 = arith.mulf %121, %127 : vector<32x128xf32>
    %129 = arith.mulf %128, %122 : vector<32x128xf32>
    %c0_65 = arith.constant 0 : index
    %c0_66 = arith.constant 0 : index
    %c0_67 = arith.constant 0 : index
    %130 = vector.load %arg9[%c0_65, %c0_66, %c0_67] : memref<2x128x32xf32, #tpu.memory_space<vmem>>, vector<1x128x32xf32>
    %131 = vector.shape_cast %130 : vector<1x128x32xf32> to vector<128x32xf32>
    %cst_68 = arith.constant dense<0.000000e+00> : vector<32x32xf32>
    %132 = tpu.matmul %129, %131, %cst_68 {dimension_numbers = #tpu.dot_dimension_numbers<[1], [0], [0], [1], [0, 0, 1, 1], [], []>} : vector<32x128xf32>, vector<128x32xf32>, vector<32x32xf32> -> vector<32x32xf32>
    %133 = arith.addf %103, %132 : vector<32x32xf32>
    %c1 = arith.constant 1 : index
    %c0_69 = arith.constant 0 : index
    %c0_70 = arith.constant 0 : index
    %134 = vector.load %arg4[%c1, %c0_69, %c0_70] : memref<2x1x32xf32, #tpu.memory_space<vmem>>, vector<1x1x32xf32>
    %135 = vector.shape_cast %134 : vector<1x1x32xf32> to vector<1x32xf32>
    %136 = arith.mulf %133, %133 : vector<32x32xf32>
    %cst_71 = arith.constant dense<0.000000e+00> : vector<32xf32>
    %137 = vector.multi_reduction <add>, %136, %cst_71 [1] : vector<32x32xf32> to vector<32xf32>
    %138 = vector.shape_cast %137 : vector<32xf32> to vector<32x1xf32>
    %cst_72 = arith.constant 3.200000e+01 : f32
    %139 = vector.broadcast %cst_72 : f32 to vector<32x1xf32>
    %140 = arith.divf %138, %139 : vector<32x1xf32>
    %cst_73 = arith.constant 1.1920929E-7 : f32
    %141 = vector.broadcast %cst_73 : f32 to vector<32x1xf32>
    %142 = arith.addf %140, %141 : vector<32x1xf32>
    %143 = math.rsqrt %142 : vector<32x1xf32>
    %144 = vector.broadcast %143 : vector<32x1xf32> to vector<32x32xf32>
    %145 = arith.mulf %133, %144 : vector<32x32xf32>
    %146 = vector.broadcast %135 : vector<1x32xf32> to vector<32x32xf32>
    %147 = arith.mulf %145, %146 : vector<32x32xf32>
    %c1_74 = arith.constant 1 : index
    %c0_75 = arith.constant 0 : index
    %c0_76 = arith.constant 0 : index
    %148 = vector.load %arg5[%c1_74, %c0_75, %c0_76] : memref<2x32x96xf32, #tpu.memory_space<vmem>>, vector<1x32x96xf32>
    %149 = vector.shape_cast %148 : vector<1x32x96xf32> to vector<32x96xf32>
    %cst_77 = arith.constant dense<0.000000e+00> : vector<32x96xf32>
    %150 = tpu.matmul %147, %149, %cst_77 {dimension_numbers = #tpu.dot_dimension_numbers<[1], [0], [0], [1], [0, 0, 1, 1], [], []>} : vector<32x32xf32>, vector<32x96xf32>, vector<32x96xf32> -> vector<32x96xf32>
    %151 = vector.extract_strided_slice %150 {offsets = [0, 0], sizes = [32, 32], strides = [1, 1]} : vector<32x96xf32> to vector<32x32xf32>
    %152 = vector.extract_strided_slice %150 {offsets = [0, 32], sizes = [32, 32], strides = [1, 1]} : vector<32x96xf32> to vector<32x32xf32>
    %153 = vector.extract_strided_slice %150 {offsets = [0, 64], sizes = [32, 32], strides = [1, 1]} : vector<32x96xf32> to vector<32x32xf32>
    %154 = vector.extract_strided_slice %151 {offsets = [0, 0], sizes = [16, 8], strides = [1, 1]} : vector<32x32xf32> to vector<16x8xf32>
    %155 = vector.extract_strided_slice %152 {offsets = [0, 0], sizes = [16, 8], strides = [1, 1]} : vector<32x32xf32> to vector<16x8xf32>
    %cst_78 = arith.constant dense<0.000000e+00> : vector<16x16xf32>
    %156 = tpu.matmul %154, %155, %cst_78 {dimension_numbers = #tpu.dot_dimension_numbers<[1], [1], [0], [0], [0, 0, 1, 0], [], []>} : vector<16x8xf32>, vector<16x8xf32>, vector<16x16xf32> -> vector<16x16xf32>
    %157 = vector.extract_strided_slice %151 {offsets = [0, 8], sizes = [16, 8], strides = [1, 1]} : vector<32x32xf32> to vector<16x8xf32>
    %158 = vector.extract_strided_slice %152 {offsets = [0, 8], sizes = [16, 8], strides = [1, 1]} : vector<32x32xf32> to vector<16x8xf32>
    %cst_79 = arith.constant dense<0.000000e+00> : vector<16x16xf32>
    %159 = tpu.matmul %157, %158, %cst_79 {dimension_numbers = #tpu.dot_dimension_numbers<[1], [1], [0], [0], [0, 0, 1, 0], [], []>} : vector<16x8xf32>, vector<16x8xf32>, vector<16x16xf32> -> vector<16x16xf32>
    %160 = vector.extract_strided_slice %151 {offsets = [0, 16], sizes = [16, 8], strides = [1, 1]} : vector<32x32xf32> to vector<16x8xf32>
    %161 = vector.extract_strided_slice %152 {offsets = [0, 16], sizes = [16, 8], strides = [1, 1]} : vector<32x32xf32> to vector<16x8xf32>
    %cst_80 = arith.constant dense<0.000000e+00> : vector<16x16xf32>
    %162 = tpu.matmul %160, %161, %cst_80 {dimension_numbers = #tpu.dot_dimension_numbers<[1], [1], [0], [0], [0, 0, 1, 0], [], []>} : vector<16x8xf32>, vector<16x8xf32>, vector<16x16xf32> -> vector<16x16xf32>
    %163 = vector.extract_strided_slice %151 {offsets = [0, 24], sizes = [16, 8], strides = [1, 1]} : vector<32x32xf32> to vector<16x8xf32>
    %164 = vector.extract_strided_slice %152 {offsets = [0, 24], sizes = [16, 8], strides = [1, 1]} : vector<32x32xf32> to vector<16x8xf32>
    %cst_81 = arith.constant dense<0.000000e+00> : vector<16x16xf32>
    %165 = tpu.matmul %163, %164, %cst_81 {dimension_numbers = #tpu.dot_dimension_numbers<[1], [1], [0], [0], [0, 0, 1, 0], [], []>} : vector<16x8xf32>, vector<16x8xf32>, vector<16x16xf32> -> vector<16x16xf32>
    %166 = vector.extract_strided_slice %151 {offsets = [16, 0], sizes = [16, 8], strides = [1, 1]} : vector<32x32xf32> to vector<16x8xf32>
    %167 = vector.extract_strided_slice %152 {offsets = [16, 0], sizes = [16, 8], strides = [1, 1]} : vector<32x32xf32> to vector<16x8xf32>
    %cst_82 = arith.constant dense<0.000000e+00> : vector<16x16xf32>
    %168 = tpu.matmul %166, %167, %cst_82 {dimension_numbers = #tpu.dot_dimension_numbers<[1], [1], [0], [0], [0, 0, 1, 0], [], []>} : vector<16x8xf32>, vector<16x8xf32>, vector<16x16xf32> -> vector<16x16xf32>
    %169 = vector.extract_strided_slice %151 {offsets = [16, 8], sizes = [16, 8], strides = [1, 1]} : vector<32x32xf32> to vector<16x8xf32>
    %170 = vector.extract_strided_slice %152 {offsets = [16, 8], sizes = [16, 8], strides = [1, 1]} : vector<32x32xf32> to vector<16x8xf32>
    %cst_83 = arith.constant dense<0.000000e+00> : vector<16x16xf32>
    %171 = tpu.matmul %169, %170, %cst_83 {dimension_numbers = #tpu.dot_dimension_numbers<[1], [1], [0], [0], [0, 0, 1, 0], [], []>} : vector<16x8xf32>, vector<16x8xf32>, vector<16x16xf32> -> vector<16x16xf32>
    %172 = vector.extract_strided_slice %151 {offsets = [16, 16], sizes = [16, 8], strides = [1, 1]} : vector<32x32xf32> to vector<16x8xf32>
    %173 = vector.extract_strided_slice %152 {offsets = [16, 16], sizes = [16, 8], strides = [1, 1]} : vector<32x32xf32> to vector<16x8xf32>
    %cst_84 = arith.constant dense<0.000000e+00> : vector<16x16xf32>
    %174 = tpu.matmul %172, %173, %cst_84 {dimension_numbers = #tpu.dot_dimension_numbers<[1], [1], [0], [0], [0, 0, 1, 0], [], []>} : vector<16x8xf32>, vector<16x8xf32>, vector<16x16xf32> -> vector<16x16xf32>
    %175 = vector.extract_strided_slice %151 {offsets = [16, 24], sizes = [16, 8], strides = [1, 1]} : vector<32x32xf32> to vector<16x8xf32>
    %176 = vector.extract_strided_slice %152 {offsets = [16, 24], sizes = [16, 8], strides = [1, 1]} : vector<32x32xf32> to vector<16x8xf32>
    %cst_85 = arith.constant dense<0.000000e+00> : vector<16x16xf32>
    %177 = tpu.matmul %175, %176, %cst_85 {dimension_numbers = #tpu.dot_dimension_numbers<[1], [1], [0], [0], [0, 0, 1, 0], [], []>} : vector<16x8xf32>, vector<16x8xf32>, vector<16x16xf32> -> vector<16x16xf32>
    %178 = tpu.concatenate %156, %159, %162, %165, %168, %171, %174, %177 in 0 : vector<16x16xf32>, vector<16x16xf32>, vector<16x16xf32>, vector<16x16xf32>, vector<16x16xf32>, vector<16x16xf32>, vector<16x16xf32>, vector<16x16xf32> -> vector<128x16xf32>
    %c0_86 = arith.constant 0 : index
    %c0_87 = arith.constant 0 : index
    %179 = vector.load %arg2[%c0_86, %c0_87] : memref<128x16xf32, #tpu.memory_space<vmem>>, vector<128x16xf32>
    %180 = arith.addf %178, %179 : vector<128x16xf32>
    %cst_88 = arith.constant dense<0xFF800000> : vector<128xf32>
    %181 = vector.multi_reduction <maximumf>, %180, %cst_88 [1] : vector<128x16xf32> to vector<128xf32>
    %182 = vector.shape_cast %181 : vector<128xf32> to vector<128x1xf32>
    %183 = vector.broadcast %182 : vector<128x1xf32> to vector<128x16xf32>
    %184 = arith.subf %180, %183 : vector<128x16xf32>
    %185 = math.exp %184 : vector<128x16xf32>
    %cst_89 = arith.constant dense<0.000000e+00> : vector<128xf32>
    %186 = vector.multi_reduction <add>, %185, %cst_89 [1] : vector<128x16xf32> to vector<128xf32>
    %187 = vector.shape_cast %186 : vector<128xf32> to vector<128x1xf32>
    %188 = tpu.reciprocal %187 : vector<128x1xf32> -> vector<128x1xf32>
    %189 = vector.broadcast %188 : vector<128x1xf32> to vector<128x16xf32>
    %190 = arith.mulf %185, %189 : vector<128x16xf32>
    %191 = vector.extract_strided_slice %190 {offsets = [0, 0], sizes = [16, 16], strides = [1, 1]} : vector<128x16xf32> to vector<16x16xf32>
    %192 = vector.extract_strided_slice %153 {offsets = [0, 0], sizes = [16, 8], strides = [1, 1]} : vector<32x32xf32> to vector<16x8xf32>
    %cst_90 = arith.constant dense<0.000000e+00> : vector<16x8xf32>
    %193 = tpu.matmul %191, %192, %cst_90 {dimension_numbers = #tpu.dot_dimension_numbers<[1], [0], [0], [1], [0, 0, 1, 1], [], []>} : vector<16x16xf32>, vector<16x8xf32>, vector<16x8xf32> -> vector<16x8xf32>
    %c0_91 = arith.constant 0 : index
    %c0_92 = arith.constant 0 : index
    %194 = vector.load %arg13[%c0_91, %c0_92] : memref<32x32xf32, #tpu.memory_space<vmem>>, vector<16x8xf32>
    tpu.vector_store %arg13[%c0_91, %c0_92], %193 {strides = array<i32>} : memref<32x32xf32, #tpu.memory_space<vmem>>, vector<16x8xf32>,
    %195 = vector.extract_strided_slice %190 {offsets = [16, 0], sizes = [16, 16], strides = [1, 1]} : vector<128x16xf32> to vector<16x16xf32>
    %196 = vector.extract_strided_slice %153 {offsets = [0, 8], sizes = [16, 8], strides = [1, 1]} : vector<32x32xf32> to vector<16x8xf32>
    %cst_93 = arith.constant dense<0.000000e+00> : vector<16x8xf32>
    %197 = tpu.matmul %195, %196, %cst_93 {dimension_numbers = #tpu.dot_dimension_numbers<[1], [0], [0], [1], [0, 0, 1, 1], [], []>} : vector<16x16xf32>, vector<16x8xf32>, vector<16x8xf32> -> vector<16x8xf32>
    %c0_94 = arith.constant 0 : index
    %c8_95 = arith.constant 8 : index
    %198 = vector.load %arg13[%c0_94, %c8_95] : memref<32x32xf32, #tpu.memory_space<vmem>>, vector<16x8xf32>
    tpu.vector_store %arg13[%c0_94, %c8_95], %197 {strides = array<i32>} : memref<32x32xf32, #tpu.memory_space<vmem>>, vector<16x8xf32>,
    %199 = vector.extract_strided_slice %190 {offsets = [32, 0], sizes = [16, 16], strides = [1, 1]} : vector<128x16xf32> to vector<16x16xf32>
    %200 = vector.extract_strided_slice %153 {offsets = [0, 16], sizes = [16, 8], strides = [1, 1]} : vector<32x32xf32> to vector<16x8xf32>
    %cst_96 = arith.constant dense<0.000000e+00> : vector<16x8xf32>
    %201 = tpu.matmul %199, %200, %cst_96 {dimension_numbers = #tpu.dot_dimension_numbers<[1], [0], [0], [1], [0, 0, 1, 1], [], []>} : vector<16x16xf32>, vector<16x8xf32>, vector<16x8xf32> -> vector<16x8xf32>
    %c0_97 = arith.constant 0 : index
    %c16_98 = arith.constant 16 : index
    %202 = vector.load %arg13[%c0_97, %c16_98] : memref<32x32xf32, #tpu.memory_space<vmem>>, vector<16x8xf32>
    tpu.vector_store %arg13[%c0_97, %c16_98], %201 {strides = array<i32>} : memref<32x32xf32, #tpu.memory_space<vmem>>, vector<16x8xf32>,
    %203 = vector.extract_strided_slice %190 {offsets = [48, 0], sizes = [16, 16], strides = [1, 1]} : vector<128x16xf32> to vector<16x16xf32>
    %204 = vector.extract_strided_slice %153 {offsets = [0, 24], sizes = [16, 8], strides = [1, 1]} : vector<32x32xf32> to vector<16x8xf32>
    %cst_99 = arith.constant dense<0.000000e+00> : vector<16x8xf32>
    %205 = tpu.matmul %203, %204, %cst_99 {dimension_numbers = #tpu.dot_dimension_numbers<[1], [0], [0], [1], [0, 0, 1, 1], [], []>} : vector<16x16xf32>, vector<16x8xf32>, vector<16x8xf32> -> vector<16x8xf32>
    %c0_100 = arith.constant 0 : index
    %c24_101 = arith.constant 24 : index
    %206 = vector.load %arg13[%c0_100, %c24_101] : memref<32x32xf32, #tpu.memory_space<vmem>>, vector<16x8xf32>
    tpu.vector_store %arg13[%c0_100, %c24_101], %205 {strides = array<i32>} : memref<32x32xf32, #tpu.memory_space<vmem>>, vector<16x8xf32>,
    %207 = vector.extract_strided_slice %190 {offsets = [64, 0], sizes = [16, 16], strides = [1, 1]} : vector<128x16xf32> to vector<16x16xf32>
    %208 = vector.extract_strided_slice %153 {offsets = [16, 0], sizes = [16, 8], strides = [1, 1]} : vector<32x32xf32> to vector<16x8xf32>
    %cst_102 = arith.constant dense<0.000000e+00> : vector<16x8xf32>
    %209 = tpu.matmul %207, %208, %cst_102 {dimension_numbers = #tpu.dot_dimension_numbers<[1], [0], [0], [1], [0, 0, 1, 1], [], []>} : vector<16x16xf32>, vector<16x8xf32>, vector<16x8xf32> -> vector<16x8xf32>
    %c16_103 = arith.constant 16 : index
    %c0_104 = arith.constant 0 : index
    %210 = vector.load %arg13[%c16_103, %c0_104] : memref<32x32xf32, #tpu.memory_space<vmem>>, vector<16x8xf32>
    tpu.vector_store %arg13[%c16_103, %c0_104], %209 {strides = array<i32>} : memref<32x32xf32, #tpu.memory_space<vmem>>, vector<16x8xf32>,
    %211 = vector.extract_strided_slice %190 {offsets = [80, 0], sizes = [16, 16], strides = [1, 1]} : vector<128x16xf32> to vector<16x16xf32>
    %212 = vector.extract_strided_slice %153 {offsets = [16, 8], sizes = [16, 8], strides = [1, 1]} : vector<32x32xf32> to vector<16x8xf32>
    %cst_105 = arith.constant dense<0.000000e+00> : vector<16x8xf32>
    %213 = tpu.matmul %211, %212, %cst_105 {dimension_numbers = #tpu.dot_dimension_numbers<[1], [0], [0], [1], [0, 0, 1, 1], [], []>} : vector<16x16xf32>, vector<16x8xf32>, vector<16x8xf32> -> vector<16x8xf32>
    %c16_106 = arith.constant 16 : index
    %c8_107 = arith.constant 8 : index
    %214 = vector.load %arg13[%c16_106, %c8_107] : memref<32x32xf32, #tpu.memory_space<vmem>>, vector<16x8xf32>
    tpu.vector_store %arg13[%c16_106, %c8_107], %213 {strides = array<i32>} : memref<32x32xf32, #tpu.memory_space<vmem>>, vector<16x8xf32>,
    %215 = vector.extract_strided_slice %190 {offsets = [96, 0], sizes = [16, 16], strides = [1, 1]} : vector<128x16xf32> to vector<16x16xf32>
    %216 = vector.extract_strided_slice %153 {offsets = [16, 16], sizes = [16, 8], strides = [1, 1]} : vector<32x32xf32> to vector<16x8xf32>
    %cst_108 = arith.constant dense<0.000000e+00> : vector<16x8xf32>
    %217 = tpu.matmul %215, %216, %cst_108 {dimension_numbers = #tpu.dot_dimension_numbers<[1], [0], [0], [1], [0, 0, 1, 1], [], []>} : vector<16x16xf32>, vector<16x8xf32>, vector<16x8xf32> -> vector<16x8xf32>
    %c16_109 = arith.constant 16 : index
    %c16_110 = arith.constant 16 : index
    %218 = vector.load %arg13[%c16_109, %c16_110] : memref<32x32xf32, #tpu.memory_space<vmem>>, vector<16x8xf32>
    tpu.vector_store %arg13[%c16_109, %c16_110], %217 {strides = array<i32>} : memref<32x32xf32, #tpu.memory_space<vmem>>, vector<16x8xf32>,
    %219 = vector.extract_strided_slice %190 {offsets = [112, 0], sizes = [16, 16], strides = [1, 1]} : vector<128x16xf32> to vector<16x16xf32>
    %220 = vector.extract_strided_slice %153 {offsets = [16, 24], sizes = [16, 8], strides = [1, 1]} : vector<32x32xf32> to vector<16x8xf32>
    %cst_111 = arith.constant dense<0.000000e+00> : vector<16x8xf32>
    %221 = tpu.matmul %219, %220, %cst_111 {dimension_numbers = #tpu.dot_dimension_numbers<[1], [0], [0], [1], [0, 0, 1, 1], [], []>} : vector<16x16xf32>, vector<16x8xf32>, vector<16x8xf32> -> vector<16x8xf32>
    %c16_112 = arith.constant 16 : index
    %c24_113 = arith.constant 24 : index
    %222 = vector.load %arg13[%c16_112, %c24_113] : memref<32x32xf32, #tpu.memory_space<vmem>>, vector<16x8xf32>
    tpu.vector_store %arg13[%c16_112, %c24_113], %221 {strides = array<i32>} : memref<32x32xf32, #tpu.memory_space<vmem>>, vector<16x8xf32>,
    %c0_114 = arith.constant 0 : index
    %c0_115 = arith.constant 0 : index
    %223 = vector.load %arg13[%c0_114, %c0_115] : memref<32x32xf32, #tpu.memory_space<vmem>>, vector<32x32xf32>
    %c1_116 = arith.constant 1 : index
    %c0_117 = arith.constant 0 : index
    %c0_118 = arith.constant 0 : index
    %224 = vector.load %arg6[%c1_116, %c0_117, %c0_118] : memref<2x32x32xf32, #tpu.memory_space<vmem>>, vector<1x32x32xf32>
    %225 = vector.shape_cast %224 : vector<1x32x32xf32> to vector<32x32xf32>
    %cst_119 = arith.constant dense<0.000000e+00> : vector<32x32xf32>
    %226 = tpu.matmul %223, %225, %cst_119 {dimension_numbers = #tpu.dot_dimension_numbers<[1], [0], [0], [1], [0, 0, 1, 1], [], []>} : vector<32x32xf32>, vector<32x32xf32>, vector<32x32xf32> -> vector<32x32xf32>
    %227 = arith.addf %133, %226 : vector<32x32xf32>
    %c1_120 = arith.constant 1 : index
    %c0_121 = arith.constant 0 : index
    %c0_122 = arith.constant 0 : index
    %228 = vector.load %arg7[%c1_120, %c0_121, %c0_122] : memref<2x1x32xf32, #tpu.memory_space<vmem>>, vector<1x1x32xf32>
    %229 = vector.shape_cast %228 : vector<1x1x32xf32> to vector<1x32xf32>
    %230 = arith.mulf %227, %227 : vector<32x32xf32>
    %cst_123 = arith.constant dense<0.000000e+00> : vector<32xf32>
    %231 = vector.multi_reduction <add>, %230, %cst_123 [1] : vector<32x32xf32> to vector<32xf32>
    %232 = vector.shape_cast %231 : vector<32xf32> to vector<32x1xf32>
    %cst_124 = arith.constant 3.200000e+01 : f32
    %233 = vector.broadcast %cst_124 : f32 to vector<32x1xf32>
    %234 = arith.divf %232, %233 : vector<32x1xf32>
    %cst_125 = arith.constant 1.1920929E-7 : f32
    %235 = vector.broadcast %cst_125 : f32 to vector<32x1xf32>
    %236 = arith.addf %234, %235 : vector<32x1xf32>
    %237 = math.rsqrt %236 : vector<32x1xf32>
    %238 = vector.broadcast %237 : vector<32x1xf32> to vector<32x32xf32>
    %239 = arith.mulf %227, %238 : vector<32x32xf32>
    %240 = vector.broadcast %229 : vector<1x32xf32> to vector<32x32xf32>
    %241 = arith.mulf %239, %240 : vector<32x32xf32>
    %c1_126 = arith.constant 1 : index
    %c0_127 = arith.constant 0 : index
    %c0_128 = arith.constant 0 : index
    %242 = vector.load %arg8[%c1_126, %c0_127, %c0_128] : memref<2x32x256xf32, #tpu.memory_space<vmem>>, vector<1x32x256xf32>
    %243 = vector.shape_cast %242 : vector<1x32x256xf32> to vector<32x256xf32>
    %cst_129 = arith.constant dense<0.000000e+00> : vector<32x256xf32>
    %244 = tpu.matmul %241, %243, %cst_129 {dimension_numbers = #tpu.dot_dimension_numbers<[1], [0], [0], [1], [0, 0, 1, 1], [], []>} : vector<32x32xf32>, vector<32x256xf32>, vector<32x256xf32> -> vector<32x256xf32>
    %245 = vector.extract_strided_slice %244 {offsets = [0, 0], sizes = [32, 128], strides = [1, 1]} : vector<32x256xf32> to vector<32x128xf32>
    %246 = vector.extract_strided_slice %244 {offsets = [0, 128], sizes = [32, 128], strides = [1, 1]} : vector<32x256xf32> to vector<32x128xf32>
    %247 = arith.negf %245 : vector<32x128xf32>
    %248 = math.exp %247 : vector<32x128xf32>
    %cst_130 = arith.constant 1.000000e+00 : f32
    %249 = vector.broadcast %cst_130 : f32 to vector<32x128xf32>
    %250 = arith.addf %249, %248 : vector<32x128xf32>
    %251 = arith.divf %249, %250 : vector<32x128xf32>
    %252 = arith.mulf %245, %251 : vector<32x128xf32>
    %253 = arith.mulf %252, %246 : vector<32x128xf32>
    %c1_131 = arith.constant 1 : index
    %c0_132 = arith.constant 0 : index
    %c0_133 = arith.constant 0 : index
    %254 = vector.load %arg9[%c1_131, %c0_132, %c0_133] : memref<2x128x32xf32, #tpu.memory_space<vmem>>, vector<1x128x32xf32>
    %255 = vector.shape_cast %254 : vector<1x128x32xf32> to vector<128x32xf32>
    %cst_134 = arith.constant dense<0.000000e+00> : vector<32x32xf32>
    %256 = tpu.matmul %253, %255, %cst_134 {dimension_numbers = #tpu.dot_dimension_numbers<[1], [0], [0], [1], [0, 0, 1, 1], [], []>} : vector<32x128xf32>, vector<128x32xf32>, vector<32x32xf32> -> vector<32x32xf32>
    %257 = arith.addf %227, %256 : vector<32x32xf32>
    %258 = vector.extract_strided_slice %257 {offsets = [8, 0], sizes = [8, 32], strides = [1, 1]} : vector<32x32xf32> to vector<8x32xf32>
    %259 = vector.extract_strided_slice %257 {offsets = [24, 0], sizes = [8, 32], strides = [1, 1]} : vector<32x32xf32> to vector<8x32xf32>
    %260 = tpu.concatenate %258, %259 in 0 : vector<8x32xf32>, vector<8x32xf32> -> vector<16x32xf32>
    %c0_135 = arith.constant 0 : index
    %c0_136 = arith.constant 0 : index
    %261 = vector.load %arg10[%c0_135, %c0_136] : memref<32x16xf32, #tpu.memory_space<vmem>>, vector<32x16xf32>
    %cst_137 = arith.constant dense<0.000000e+00> : vector<16x16xf32>
    %262 = tpu.matmul %260, %261, %cst_137 {dimension_numbers = #tpu.dot_dimension_numbers<[1], [0], [0], [1], [0, 0, 1, 1], [], []>} : vector<16x32xf32>, vector<32x16xf32>, vector<16x16xf32> -> vector<16x16xf32>
    %c0_138 = arith.constant 0 : index
    %c0_139 = arith.constant 0 : index
    %263 = vector.load %arg11[%c0_138, %c0_139] : memref<1x16xf32, #tpu.memory_space<vmem>>, vector<1x16xf32>
    %264 = vector.broadcast %263 : vector<1x16xf32> to vector<16x16xf32>
    %265 = arith.addf %262, %264 : vector<16x16xf32>
    %266 = vector.extract_strided_slice %265 {offsets = [0, 0], sizes = [1, 16], strides = [1, 1]} : vector<16x16xf32> to vector<1x16xf32>
    %c0_140 = arith.constant 0 : index
    %c0_141 = arith.constant 0 : index
    %267 = vector.load %arg12[%c0_140, %c0_141] : memref<2x16xf32, #tpu.memory_space<vmem>>, vector<1x16xf32>
    tpu.vector_store %arg12[%c0_140, %c0_141], %266 {strides = array<i32>} : memref<2x16xf32, #tpu.memory_space<vmem>>, vector<1x16xf32>,
    %268 = vector.extract_strided_slice %265 {offsets = [8, 0], sizes = [1, 16], strides = [1, 1]} : vector<16x16xf32> to vector<1x16xf32>
    %c1_142 = arith.constant 1 : index
    %c0_143 = arith.constant 0 : index
    %269 = vector.load %arg12[%c1_142, %c0_143] : memref<2x16xf32, #tpu.memory_space<vmem>>, vector<1x16xf32>
    tpu.vector_store %arg12[%c1_142, %c0_143], %268 {strides = array<i32>} : memref<2x16xf32, #tpu.memory_space<vmem>>, vector<1x16xf32>,
    return
  }
}

</mosaic_0001>

<bundles_post_ra>
// kernel: chessnet_forward.1
= control target key start
LH: loop header
LB: loop body
LE: loop exit
PB: predicated region body
PF: predicated region fallthrough
CT: control target
= control target key end

     0   :  { %v3757_v2 = vmov 0   ;;  %s5191_s0 = inlined_call_operand.vmem [shape: s32[32,1], index: 0, kind: input, shape index: {}]   ;;  %s5192_s1 = inlined_call_operand.vmem [shape: f32[32,32], index: 1, kind: input, shape index: {}]   ;;  %s5193_s2 = inlined_call_operand.vmem [shape: f32[128,16], index: 2, kind: input, shape index: {}]   ;;  %s5194_s3 = inlined_call_operand.vmem [shape: f32[32,32], index: 3, kind: input, shape index: {}]   ;;  %s5195_s4 = inlined_call_operand.vmem [shape: f32[2,1,32], index: 4, kind: input, shape index: {}]   ;;  %s5196_s5 = inlined_call_operand.vmem [shape: f32[2,32,96], index: 5, kind: input, shape index: {}]   ;;  %s5197_s6 = inlined_call_operand.vmem [shape: f32[2,32,32], index: 6, kind: input, shape index: {}]   ;;  %s5198_s7 = inlined_call_operand.vmem [shape: f32[2,1,32], index: 7, kind: input, shape index: {}]   ;;  %s5199_s8 = inlined_call_operand.vmem [shape: f32[2,32,256], index: 8, kind: input, shape index: {}]   ;;  %s5200_s9 = inlined_call_operand.vmem [shape: f32[2,128,32], index: 9, kind: input, shape index: {}]   ;;  %s5201_s10 = inlined_call_operand.vmem [shape: f32[32,16], index: 10, kind: input, shape index: {}]   ;;  %s5202_s11 = inlined_call_operand.vmem [shape: f32[1,16], index: 11, kind: input, shape index: {}]   ;;  %s5203_s12 = inlined_call_operand.hbm [shape: f32[2,16], index: 12, kind: output, shape index: {}]  }
   0x1   :  { %v42_v0 = vld [vmem:[%s5191_s0] sm:$0xff]  ;;  %v44_v1 = vld [vmem:[%s5191_s0 + $0x10] sm:$0xff]  ;;  %3450 = vset.pattern.permute.xlu0 %v3757_v2  ;;  %3451 = vset.pattern.permute.xlu1 %v3757_v2  ;;  %v75_v3 = vld [vmem:[%s5194_s3 + $0x18] sm:$0xff] }
   0x2   :  { %49 = vperm.xlu0 %3450, %v42_v0   ;;  %55 = vperm.xlu1 %3451, %v44_v1   ;;  %v74_v4 = vld [vmem:[%s5194_s3 + $0x10] sm:$0xff]  ;;  %v73_v5 = vld [vmem:[%s5194_s3 + $0x8] sm:$0xff] }
   0x3   :  { %105 = vmatpush.msra.mxu0 %v75_v3 }
   0x4   :  { %17 = vsyncpa [#allocation4], 0  ;;  %v43_v6 = vld [vmem:[%s5191_s0 + $0x8] sm:$0xff]  ;;  %v45_v7 = vld [vmem:[%s5191_s0 + $0x18] sm:$0xff]  ;;  %v46_v9 = vlaneseq  ;;  %vm80_vm0 = vcmask 261120   ;;  %v3758_v12 = vmov 0.0  }
   0x5   :  { %106 = vmatpush.msra.mxu0 %v74_v4  ;;  %v72_v8 = vld [vmem:[%s5194_s3] sm:$0xff]  ;;  %v77_v25 = vld [vmem:[%s5192_s1 + $0x8] sm:$0xff]  ;;  %v78_v30 = vld [vmem:[%s5192_s1 + $0x10] sm:$0xff]  ;;  %v3759_v40 = vmov 32.0   ;;  %s3760_s16 = smov 96   ;;  %s3761_s17 = smov 88  }
   0x6   :  { %v47_v10 = vand.u32 127, %v46_v9  ;;  %v76_v20 = vld [vmem:[%s5192_s1] sm:$0xff]  ;;  %v79_v35 = vld [vmem:[%s5192_s1 + $0x18] sm:$0xff]  ;;  %3537 = vrcp.f32 %v3759_v40  ;;  %v207_v45 = vld [vmem:[%s5196_s5 + $0x10] sm:$0xff]  ;;  %s3762_s18 = smov 80   ;;  %s3763_s0 = smov 120  }
   0x7   :  { %107 = vmatpush.msra.mxu0 %v73_v5  ;;  %v208_v44 = vld [vmem:[%s5196_s5 + $0x18] sm:$0xff]  ;;  %v206_v47 = vld [vmem:[%s5196_s5 + $0x8] sm:$0xff]  ;;  %v205_v48 = vld [vmem:[%s5196_s5] sm:$0xff]  ;;  %s3764_s3 = smov 104   ;;  %s3765_s19 = smov 112  }
   0x8   :  { %233 = vmatpush.msra.mxu1 %v208_v44  ;;  %v3532_v4 = vld [vmem:[%s5195_s4] ss:$0 sm:$0xff]  ;;  %s3766_s20 = smov 72   ;;  %s3767_s21 = smov 56  }
   0x9   :  { %108 = vmatpush.msra.mxu0 %v72_v8  ;;  %s3768_s22 = smov 40   ;;  %s3769_s23 = smov 48  }
   0xa   :  { %52 = vperm.xlu0 %3450, %v43_v6   ;;  %58 = vperm.xlu1 %3451, %v45_v7   ;;  %s3770_s15 = smov 64   ;;  %s5208_s24 = smov 8  }
   0xb   :  { %234 = vmatpush.msra.mxu1 %v207_v45  ;;  %s5206_s25 = smov 16   ;;  %s5204_s26 = smov 24  }
   0xc   :  { %v3538_v41 = vpop.eup %3537 }
   0xd   :  { %v140_v42 = vmul.f32 32.0, %v3538_v41  ;;  %235 = vmatpush.msra.mxu1 %v206_v47  ;;  %vm144_vm5 = vweird.f32 %v3538_v41 }
   0xf   :  { %v141_v43 = vsub.f32 1.0, %v140_v42  ;;  %236 = vmatpush.msra.mxu1 %v205_v48 }
  0x11   :  { %v142_v46 = vmul.f32 %v3538_v41, %v141_v43 }
  0x13   :  { %v143_v49 = vadd.f32 %v3538_v41, %v142_v46 }
  0x15   :  { %v3912_v50 = vsel %vm144_vm5, %v3538_v41, %v143_v49 }
  0x74   :  { %v50_v11 = vpop.permute.xlu0 %49  ;;  %v56_v15 = vpop.permute.xlu1 %55 }
  0x75   :  { %vm60_vm1 = vcmp.eq.s32.totalorder %v50_v11, %v47_v10  ;;  %vm62_vm3 = vcmp.eq.s32.totalorder %v56_v15, %v47_v10 }
  0x76   :  { %v3250_v13 = vsel %vm60_vm1, 1.0, %v3758_v12  ;;  %v3252_v17 = vsel %vm62_vm3, 1.0, %v3758_v12  ;;  %vm256_vm3 = vcmask 64512  }
  0x77   :  { %3254 = vmatmul.msk.f32.vlgmr.msra.gmra.mxu0 %vm80_vm0, %v3250_v13 }
  0x7c   :  { %v53_v14 = vpop.permute.xlu0 %52  ;;  %v59_v18 = vpop.permute.xlu1 %58 }
  0x7d   :  { %vm61_vm2 = vcmp.eq.s32.totalorder %v53_v14, %v47_v10  ;;  %vm63_vm4 = vcmp.eq.s32.totalorder %v59_v18, %v47_v10 }
  0x7e   :  { %v3251_v16 = vsel %vm61_vm2, 1.0, %v3758_v12  ;;  %v3253_v19 = vsel %vm63_vm4, 1.0, %v3758_v12  ;;  %vm591_vm4 = vcmask 130048  }
  0x7f   :  { %3255 = vmatmul.msk.f32.gmra.mxu0 %vm80_vm0, %v3251_v16 }
  0x87   :  { %3256 = vmatmul.msk.f32.gmra.mxu0 %vm80_vm0, %v3252_v17 }
  0x8f   :  { %3257 = vmatmul.msk.f32.gmra.mxu0 %vm80_vm0, %v3253_v19 }
  0xf4   :  { %v110_v21 = vpop.f32.mrf.mxu0 }
  0xf5   :  { %v3871_v22 = vadd.f32 %v110_v21, %v76_v20 }
  0xf7   :  { %v123_v23 = vmul.f32 %v3871_v22, %v3871_v22 }
  0xf9   :  { %v127_v24 = vsel %vm80_vm0, %v123_v23, 0.0 }
  0xfa   :  { %128 = vadd.xlane.f32.xlu2 %v127_v24 }
  0xfc   :  { %v113_v26 = vpop.f32.mrf.mxu0 }
  0xfd   :  { %v3879_v27 = vadd.f32 %v113_v26, %v77_v25 }
  0xff   :  { %v124_v28 = vmul.f32 %v3879_v27, %v3879_v27 }
 0x101   :  { %v130_v29 = vsel %vm80_vm0, %v124_v28, 0.0 }
 0x102   :  { %131 = vadd.xlane.f32.xlu2 %v130_v29 }
 0x104   :  { %v116_v31 = vpop.f32.mrf.mxu0 }
 0x105   :  { %v3887_v32 = vadd.f32 %v116_v31, %v78_v30 }
 0x107   :  { %v125_v33 = vmul.f32 %v3887_v32, %v3887_v32 }
 0x109   :  { %v133_v34 = vsel %vm80_vm0, %v125_v33, 0.0 }
 0x10a   :  { %134 = vadd.xlane.f32.xlu0 %v133_v34 }
 0x10c   :  { %v119_v36 = vpop.f32.mrf.mxu0 }
 0x10d   :  { %v3895_v37 = vadd.f32 %v119_v36, %v79_v35 }
 0x10f   :  { %v126_v38 = vmul.f32 %v3895_v37, %v3895_v37 }
 0x111   :  { %v136_v39 = vsel %vm80_vm0, %v126_v38, 0.0 }
 0x112   :  { %137 = vadd.xlane.f32.xlu1 %v136_v39 }
 0x16d   :  { %v129_v51 = vpop.xlane.xlu2 %128 }
 0x16e   :  { %v146_v52 = vmul.f32 %v3912_v50, %v129_v51 }
 0x170   :  { %v150_v53 = vadd.f32 1.1920929e-07, %v146_v52 }
 0x172   :  { %3539 = vrsqrt.f32 %v150_v53  ;;  %vm160_vm7 = vweird.f32 %v150_v53 }
 0x175   :  { %v132_v54 = vpop.xlane.xlu2 %131 }
 0x176   :  { %v147_v55 = vmul.f32 %v3912_v50, %v132_v54 }
 0x178   :  { %v3540_v56 = vpop.eup %3539  ;;  %v151_v57 = vadd.f32 1.1920929e-07, %v147_v55 }
 0x179   :  { %v155_v58 = vmul.f32 %v3540_v56, %v150_v53  ;;  %vm161_vm6 = vweird.f32 %v3540_v56 }
 0x17a   :  { %3541 = vrsqrt.f32 %v151_v57  ;;  %vm162_vm8 = vmor %vm160_vm7, %vm161_vm6  ;;  %vm170_vm10 = vweird.f32 %v151_v57 }
 0x17b   :  { %v156_v59 = vmul.f32 %v3540_v56, %v155_v58 }
 0x17d   :  { %v157_v60 = vmul.f32 0.5, %v156_v59  ;;  %v135_v61 = vpop.xlane.xlu0 %134 }
 0x17e   :  { %v148_v62 = vmul.f32 %v3912_v50, %v135_v61 }
 0x17f   :  { %v158_v63 = vsub.f32 1.5, %v157_v60 }
 0x180   :  { %v3542_v0 = vpop.eup %3541  ;;  %v152_v1 = vadd.f32 1.1920929e-07, %v148_v62 }
 0x181   :  { %v165_v2 = vmul.f32 %v3542_v0, %v151_v57  ;;  %v159_v3 = vmul.f32 %v3540_v56, %v158_v63  ;;  %vm171_vm9 = vweird.f32 %v3542_v0 }
 0x182   :  { %3543 = vrsqrt.f32 %v152_v1  ;;  %vm172_vm11 = vmor %vm170_vm10, %vm171_vm9  ;;  %vm180_vm12 = vweird.f32 %v152_v1 }
 0x183   :  { %v166_v5 = vmul.f32 %v3542_v0, %v165_v2  ;;  %v163_v6 = vsel %vm162_vm8, %v3540_v56, %v159_v3 }
 0x184   :  { %v194_v7 = vmul.f32 %v163_v6, %v3871_v22 }
 0x185   :  { %v167_v8 = vmul.f32 0.5, %v166_v5  ;;  %v138_v9 = vpop.xlane.xlu1 %137 }
 0x186   :  { %v149_v10 = vmul.f32 %v3912_v50, %v138_v9  ;;  %v201_v11 = vmul.f32 %v3532_v4, %v194_v7 }
 0x187   :  { %v168_v12 = vsub.f32 1.5, %v167_v8 }
 0x188   :  { %v3544_v13 = vpop.eup %3543  ;;  %v153_v14 = vadd.f32 1.1920929e-07, %v149_v10  ;;  %3258 = vmatmul.msk.f32.vlgmr.msra.gmra.mxu1 %vm80_vm0, %v201_v11 }
 0x189   :  { %v175_v15 = vmul.f32 %v3544_v13, %v152_v1  ;;  %v169_v16 = vmul.f32 %v3542_v0, %v168_v12  ;;  %vm181_vm13 = vweird.f32 %v3544_v13 }
 0x18a   :  { %3545 = vrsqrt.f32 %v153_v14  ;;  %vm182_vm14 = vmor %vm180_vm12, %vm181_vm13  ;;  %vm190_vm15 = vweird.f32 %v153_v14 }
 0x18b   :  { %v176_v17 = vmul.f32 %v3544_v13, %v175_v15  ;;  %v173_v18 = vsel %vm172_vm11, %v3542_v0, %v169_v16 }
 0x18c   :  { %v195_v19 = vmul.f32 %v173_v18, %v3879_v27 }
 0x18d   :  { %v177_v20 = vmul.f32 0.5, %v176_v17 }
 0x18e   :  { %v202_v21 = vmul.f32 %v3532_v4, %v195_v19  ;;  %v559_v19 = vld [vmem:[%s5193_s2] sm:$0xff] }
 0x18f   :  { %v178_v23 = vsub.f32 1.5, %v177_v20 }
 0x190   :  { %v3546_v24 = vpop.eup %3545  ;;  %3259 = vmatmul.msk.f32.gmra.mxu1 %vm80_vm0, %v202_v21 }
 0x191   :  { %v185_v25 = vmul.f32 %v3546_v24, %v153_v14  ;;  %v179_v26 = vmul.f32 %v3544_v13, %v178_v23  ;;  %vm191_vm1 = vweird.f32 %v3546_v24 }
 0x192   :  { %vm192_vm2 = vmor %vm190_vm15, %vm191_vm1 }
 0x193   :  { %v186_v28 = vmul.f32 %v3546_v24, %v185_v25  ;;  %v183_v29 = vsel %vm182_vm14, %v3544_v13, %v179_v26  ;;  %v561_v25 = vld [vmem:[%s5193_s2 + $0x10] sm:$0xff]  ;;  %v560_v26 = vld [vmem:[%s5193_s2 + $0x8] sm:$0xff] }
 0x194   :  { %v196_v30 = vmul.f32 %v183_v29, %v3887_v32 }
 0x195   :  { %v187_v31 = vmul.f32 0.5, %v186_v28 }
 0x196   :  { %v203_v33 = vmul.f32 %v3532_v4, %v196_v30 }
 0x197   :  { %v188_v34 = vsub.f32 1.5, %v187_v31 }
 0x198   :  { %3260 = vmatmul.msk.f32.gmra.mxu1 %vm80_vm0, %v203_v33 }
 0x199   :  { %v189_v35 = vmul.f32 %v3546_v24, %v188_v34 }
 0x19b   :  { %v193_v36 = vsel %vm192_vm2, %v3546_v24, %v189_v35  ;;  %v562_v35 = vld [vmem:[%s5193_s2 + $0x18] sm:$0xff] }
 0x19c   :  { %v197_v38 = vmul.f32 %v193_v36, %v3895_v37  ;;  %v563_v36 = vld [vmem:[%s5193_s2 + $0x20] sm:$0xff] }
 0x19e   :  { %v204_v39 = vmul.f32 %v3532_v4, %v197_v38 }
 0x1a0   :  { %3261 = vmatmul.msk.f32.gmra.mxu1 %vm80_vm0, %v204_v39 }
 0x205   :  { %v238_v40 = vpop.f32.mrf.mxu1 }
 0x206   :  { %252 = vrot.lane.b32.xlu0 %v238_v40, %s3760_s16  ;;  %292 = vrot.lane.b32.xlu2 %v238_v40, %s3761_s17 }
 0x20d   :  { %v241_v41 = vpop.f32.mrf.mxu1 }
 0x20e   :  { %331 = vrot.lane.b32.xlu0 %v238_v40, %s3762_s18  ;;  %288 = vrot.lane.b32.xlu2 %v238_v40, %s3763_s0  ;;  %v3965_v44 = vpack.i.bf16 %v238_v40, %v241_v41 }
 0x20f   :  { %290 = vrot.lane.b32.xlu1 %v241_v41, %s3763_s0 }
 0x215   :  { %v3937_v42 = vpop.f32.mrf.mxu1 }
 0x216   :  { %366 = vrot.lane.b32.xlu0 %v238_v40, %s3764_s3  ;;  %294 = vrot.lane.b32.xlu2 %v241_v41, %s3761_s17 }
 0x217   :  { %327 = vrot.lane.b32.xlu1 %v238_v40, %s3765_s19 }
 0x21d   :  { %v3943_v43 = vpop.f32.mrf.mxu1 }
 0x21e   :  { %254 = vrot.lane.b32.xlu2 %v241_v41, %s3760_s16  ;;  %524 = vrot.lane.b32.xlu0 %v3937_v42, %s3766_s20 }
 0x21f   :  { %368 = vrot.lane.b32.xlu1 %v241_v41, %s3764_s3 }
 0x226   :  { %333 = vrot.lane.b32.xlu2 %v241_v41, %s3762_s18  ;;  %487 = vrot.lane.b32.xlu0 %v3943_v43, %s3762_s18 }
 0x227   :  { %485 = vrot.lane.b32.xlu1 %v3937_v42, %s3762_s18 }
 0x22e   :  { %372 = vrot.lane.b32.xlu2 %v241_v41, %s3766_s20  ;;  %448 = vrot.lane.b32.xlu0 %v3943_v43, %s3761_s17 }
 0x22f   :  { %520 = vrot.lane.b32.xlu1 %v3937_v42, %s3764_s3 }
 0x236   :  { %370 = vrot.lane.b32.xlu2 %v238_v40, %s3766_s20  ;;  %522 = vrot.lane.b32.xlu0 %v3943_v43, %s3764_s3 }
 0x237   :  { %483 = vrot.lane.b32.xlu1 %v3943_v43, %s3765_s19 }
 0x23e   :  { %329 = vrot.lane.b32.xlu2 %v241_v41, %s3765_s19  ;;  %409 = vrot.lane.b32.xlu0 %v3943_v43, %s3760_s16 }
 0x23f   :  { %444 = vrot.lane.b32.xlu1 %v3943_v43, %s3763_s0 }
 0x246   :  { %526 = vrot.lane.b32.xlu2 %v3943_v43, %s3766_s20  ;;  %3463 = vrot.lane.b32.xlu0 %v3965_v44, %s3767_s21 }
 0x247   :  { %3458 = vrot.lane.b32.xlu1 %v3965_v44, %s3768_s22 }
 0x24e   :  { %481 = vrot.lane.b32.xlu2 %v3937_v42, %s3765_s19 }
 0x256   :  { %446 = vrot.lane.b32.xlu2 %v3937_v42, %s3761_s17 }
 0x25e   :  { %442 = vrot.lane.b32.xlu2 %v3937_v42, %s3763_s0 }
 0x260   :  { %v293_v45 = vpop.permute.xlu2 %292 }
 0x266   :  { %407 = vrot.lane.b32.xlu2 %v3937_v42, %s3760_s16 }
 0x268   :  { %v289_v46 = vpop.permute.xlu2 %288 }
 0x26e   :  { %3453 = vrot.lane.b32.xlu2 %v3965_v44, %s3769_s23 }
 0x270   :  { %v295_v47 = vpop.permute.xlu2 %294 }
 0x271   :  { %3266 = vmatpush.xpose.msk.msra.mxu3 %vm256_vm3, %v295_v47 }
 0x275   :  { %3267 = vmatpush.xpose.msk.msra.mxu3 %vm256_vm3, %v293_v45 }
 0x278   :  { %v253_v48 = vpop.permute.xlu0 %252  ;;  %3268 = vmatmul.msk.f32.vlgmr.msra.gmra.mxu3 %vm256_vm3, %v289_v46  ;;  %v255_v49 = vpop.permute.xlu2 %254  ;;  %v565_v46 = vld [vmem:[%s5193_s2 + $0x30] sm:$0xff] }
 0x279   :  { %3262 = vmatpush.xpose.msk.msrb.mxu0 %vm256_vm3, %v255_v49  ;;  %3430 = vmatpush.xpose.msk.msra.mxu2 %vm256_vm3, %v255_v49 }
 0x27d   :  { %3263 = vmatpush.xpose.msk.msrb.mxu0 %vm256_vm3, %v253_v48  ;;  %3431 = vmatpush.xpose.msk.msra.mxu2 %vm256_vm3, %v253_v48 }
 0x280   :  { %v332_v51 = vpop.permute.xlu0 %331  ;;  %3264 = vmatmul.msk.f32.vlgmr.msrb.gmra.mxu0 %vm256_vm3, %v238_v40  ;;  %3265 = vmatmul.msk.f32.vlgmr.msra.gmra.mxu2 %vm256_vm3, %v241_v41  ;;  %v334_v52 = vpop.permute.xlu2 %333 }
 0x281   :  { %v291_v53 = vpop.permute.xlu1 %290  ;;  %3270 = vmatpush.xpose.msk.msrb.mxu2 %vm256_vm3, %v334_v52 }
 0x282   :  { %3269 = vmatmul.msk.f32.gmra.mxu3 %vm256_vm3, %v291_v53 }
 0x285   :  { %3271 = vmatpush.xpose.msk.msrb.mxu2 %vm256_vm3, %v332_v51  ;;  %v564_v51 = vld [vmem:[%s5193_s2 + $0x28] sm:$0xff] }
 0x288   :  { %v367_v54 = vpop.permute.xlu0 %366  ;;  %v373_v55 = vpop.permute.xlu2 %372 }
 0x289   :  { %v328_v56 = vpop.permute.xlu1 %327  ;;  %3274 = vmatpush.xpose.msk.msrb.mxu3 %vm256_vm3, %v373_v55 }
 0x28a   :  { %3272 = vmatmul.msk.f32.vlgmr.msrb.gmra.mxu2 %vm256_vm3, %v328_v56 }
 0x290   :  { %v525_v57 = vpop.permute.xlu0 %524  ;;  %v371_v58 = vpop.permute.xlu2 %370 }
 0x291   :  { %v369_v59 = vpop.permute.xlu1 %368  ;;  %3275 = vmatpush.xpose.msk.msrb.mxu3 %vm256_vm3, %v371_v58 }
 0x294   :  { %3276 = vmatmul.msk.f32.vlgmr.msrb.gmra.mxu3 %vm256_vm3, %v367_v54  ;;  %v566_v54 = vld [vmem:[%s5193_s2 + $0x38] sm:$0xff] }
 0x298   :  { %v488_v60 = vpop.permute.xlu0 %487  ;;  %v330_v61 = vpop.permute.xlu2 %329 }
 0x299   :  { %v486_v62 = vpop.permute.xlu1 %485  ;;  %3273 = vmatmul.msk.f32.gmra.mxu2 %vm256_vm3, %v330_v61 }
 0x29a   :  { %3286 = vmatpush.xpose.msk.msra.mxu2 %vm256_vm3, %v488_v60 }
 0x29c   :  { %3277 = vmatmul.msk.f32.gmra.mxu3 %vm256_vm3, %v369_v59  ;;  %v569_v59 = vld [vmem:[%s5193_s2 + $0x50] sm:$0xff] }
 0x29e   :  { %3287 = vmatpush.xpose.msk.msra.mxu2 %vm256_vm3, %v486_v62 }
 0x2a0   :  { %v449_v63 = vpop.permute.xlu0 %448  ;;  %v527_v0 = vpop.permute.xlu2 %526 }
 0x2a1   :  { %v521_v1 = vpop.permute.xlu1 %520  ;;  %3282 = vmatpush.xpose.msk.msrb.mxu1 %vm256_vm3, %v449_v63  ;;  %3290 = vmatpush.xpose.msk.msra.mxu3 %vm256_vm3, %v527_v0  ;;  %v570_v63 = vld [vmem:[%s5193_s2 + $0x58] sm:$0xff] }
 0x2a5   :  { %3291 = vmatpush.xpose.msk.msra.mxu3 %vm256_vm3, %v525_v57 }
 0x2a8   :  { %v523_v2 = vpop.permute.xlu0 %522  ;;  %3292 = vmatmul.msk.f32.vlgmr.msra.gmra.mxu3 %vm256_vm3, %v521_v1  ;;  %v482_v3 = vpop.permute.xlu2 %481 }
 0x2a9   :  { %v484_v4 = vpop.permute.xlu1 %483  ;;  %3288 = vmatmul.msk.f32.vlgmr.msra.gmra.mxu2 %vm256_vm3, %v482_v3 }
 0x2b0   :  { %v410_v5 = vpop.permute.xlu0 %409  ;;  %3293 = vmatmul.msk.f32.gmra.mxu3 %vm256_vm3, %v523_v2  ;;  %v447_v6 = vpop.permute.xlu2 %446  ;;  %v567_v2 = vld [vmem:[%s5193_s2 + $0x40] sm:$0xff] }
 0x2b1   :  { %v445_v7 = vpop.permute.xlu1 %444  ;;  %3278 = vmatpush.xpose.msk.msra.mxu0 %vm256_vm3, %v410_v5  ;;  %3283 = vmatpush.xpose.msk.msrb.mxu1 %vm256_vm3, %v447_v6  ;;  %v571_v6 = vld [vmem:[%s5193_s2 + $0x60] sm:$0xff] }
 0x2b2   :  { %3289 = vmatmul.msk.f32.gmra.mxu2 %vm256_vm3, %v484_v4 }
 0x2b8   :  { %v3464_v8 = vpop.permute.xlu0 %3463  ;;  %v443_v9 = vpop.permute.xlu2 %442 }
 0x2b9   :  { %v3459_v10 = vpop.permute.xlu1 %3458  ;;  %v3465_v11 = vunpack.i.l.bf16 %v3464_v8  ;;  %3284 = vmatmul.msk.f32.vlgmr.msrb.gmra.mxu1 %vm256_vm3, %v443_v9  ;;  %v3466_v13 = vunpack.i.h.bf16 %v3464_v8 }
 0x2ba   :  { %v3460_v12 = vunpack.i.l.bf16 %v3459_v10  ;;  %v3461_v14 = vunpack.i.h.bf16 %v3459_v10  ;;  %v568_v10 = vld [vmem:[%s5193_s2 + $0x48] sm:$0xff] }
 0x2bb   :  { %1039 = vmatpush.msra.mxu1 %v3465_v11 }
 0x2bc   :  { %1131 = vmatpush.msrb.mxu3 %v3460_v12 }
 0x2bd   :  { %1040 = vmatpush.msra.mxu1 %v3466_v13 }
 0x2be   :  { %1132 = vmatpush.msrb.mxu3 %v3461_v14  ;;  %v572_v14 = vld [vmem:[%s5193_s2 + $0x68] sm:$0xff] }
 0x2c0   :  { %v408_v15 = vpop.permute.xlu2 %407 }
 0x2c1   :  { %3279 = vmatpush.xpose.msk.msra.mxu0 %vm256_vm3, %v408_v15  ;;  %3285 = vmatmul.msk.f32.gmra.mxu1 %vm256_vm3, %v445_v7 }
 0x2c4   :  { %3280 = vmatmul.msk.f32.vlgmr.msra.gmra.mxu0 %vm256_vm3, %v3937_v42 }
 0x2c8   :  { %v3454_v16 = vpop.permute.xlu2 %3453 }
 0x2c9   :  { %v3455_v17 = vunpack.i.l.bf16 %v3454_v16  ;;  %v3456_v18 = vunpack.i.h.bf16 %v3454_v16 }
 0x2cb   :  { %1085 = vmatpush.msrb.mxu2 %v3455_v17 }
 0x2cc   :  { %3281 = vmatmul.msk.f32.gmra.mxu0 %vm256_vm3, %v3943_v43 }
 0x2cd   :  { %1086 = vmatpush.msrb.mxu2 %v3456_v18  ;;  %v573_v18 = vld [vmem:[%s5193_s2 + $0x70] sm:$0xff] }
 0x2fb   :  { %v321_v23 = vpop.f32.mrf.mxu3 }
 0x2fc   :  { %v4032_v29 = vadd.f32 %v561_v25, %v321_v23 }
 0x2fd   :  { %v282_v20 = vpop.f32.mrf.mxu0 }
 0x2fe   :  { %v4022_v21 = vadd.f32 %v559_v19, %v282_v20  ;;  %v598_v33 = vsel %vm591_vm4, %v4032_v29, -inf }
 0x300   :  { %v592_v24 = vsel %vm591_vm4, %v4022_v21, -inf }
 0x301   :  { %593 = vmax.xlane.f32.xlu2 %v592_v24 }
 0x303   :  { %v285_v28 = vpop.f32.mrf.mxu2 }
 0x304   :  { %v4034_v30 = vadd.f32 %v560_v26, %v285_v28  ;;  %v574_v26 = vld [vmem:[%s5193_s2 + $0x78] sm:$0xff] }
 0x305   :  { %v324_v34 = vpop.f32.mrf.mxu3 }
 0x306   :  { %v595_v31 = vsel %vm591_vm4, %v4034_v30, -inf  ;;  %v4046_v38 = vadd.f32 %v562_v35, %v324_v34 }
 0x307   :  { %596 = vmax.xlane.f32.xlu0 %v595_v31 }
 0x308   :  { %v601_v45 = vsel %vm591_vm4, %v4046_v38, -inf }
 0x309   :  { %599 = vmax.xlane.f32.xlu2 %v598_v33 }
 0x30d   :  { %v360_v39 = vpop.f32.mrf.mxu2 }
 0x30e   :  { %v4048_v40 = vadd.f32 %v563_v36, %v360_v39 }
 0x310   :  { %v604_v41 = vsel %vm591_vm4, %v4048_v40, -inf }
 0x311   :  { %605 = vmax.xlane.f32.xlu1 %v604_v41  ;;  %602 = vmax.xlane.f32.xlu2 %v601_v45 }
 0x317   :  { %v399_v47 = vpop.f32.mrf.mxu3 }
 0x318   :  { %v4057_v48 = vadd.f32 %v565_v46, %v399_v47 }
 0x31a   :  { %v610_v49 = vsel %vm591_vm4, %v4057_v48, -inf }
 0x31b   :  { %611 = vmax.xlane.f32.xlu0 %v610_v49 }
 0x31c   :  { %v363_v52 = vpop.f32.mrf.mxu2 }
 0x31d   :  { %v4064_v53 = vadd.f32 %v564_v51, %v363_v52 }
 0x31f   :  { %v402_v55 = vpop.f32.mrf.mxu3  ;;  %v607_v56 = vsel %vm591_vm4, %v4064_v53, -inf }
 0x320   :  { %v4071_v57 = vadd.f32 %v566_v54, %v402_v55  ;;  %608 = vmax.xlane.f32.xlu1 %v607_v56 }
 0x322   :  { %v613_v58 = vsel %vm591_vm4, %v4071_v57, -inf }
 0x323   :  { %614 = vmax.xlane.f32.xlu0 %v613_v58 }
 0x32b   :  { %v553_v16 = vpop.f32.mrf.mxu3 }
 0x32c   :  { %v514_v3 = vpop.f32.mrf.mxu2  ;;  %v4118_v20 = vadd.f32 %v573_v18, %v553_v16 }
 0x32d   :  { %v4099_v9 = vadd.f32 %v571_v6, %v514_v3 }
 0x32e   :  { %v634_v24 = vsel %vm591_vm4, %v4118_v20, -inf }
 0x32f   :  { %v628_v12 = vsel %vm591_vm4, %v4099_v9, -inf }
 0x333   :  { %v556_v25 = vpop.f32.mrf.mxu3 }
 0x334   :  { %v4127_v28 = vadd.f32 %v574_v26, %v556_v25 }
 0x335   :  { %v517_v13 = vpop.f32.mrf.mxu2 }
 0x336   :  { %v475_v60 = vpop.f32.mrf.mxu1  ;;  %v4116_v19 = vadd.f32 %v572_v14, %v517_v13  ;;  %v637_v31 = vsel %vm591_vm4, %v4127_v28, -inf }
 0x337   :  { %v4078_v61 = vadd.f32 %v569_v59, %v475_v60 }
 0x338   :  { %v631_v23 = vsel %vm591_vm4, %v4116_v19, -inf }
 0x339   :  { %v622_v62 = vsel %vm591_vm4, %v4078_v61, -inf }
 0x33a   :  { %623 = vmax.xlane.f32.xlu2 %v622_v62 }
 0x33e   :  { %v478_v0 = vpop.f32.mrf.mxu1 }
 0x33f   :  { %v4085_v1 = vadd.f32 %v570_v63, %v478_v0 }
 0x341   :  { %v436_v4 = vpop.f32.mrf.mxu0  ;;  %v625_v5 = vsel %vm591_vm4, %v4085_v1, -inf }
 0x342   :  { %v4095_v7 = vadd.f32 %v567_v2, %v436_v4  ;;  %626 = vmax.xlane.f32.xlu1 %v625_v5 }
 0x344   :  { %v616_v8 = vsel %vm591_vm4, %v4095_v7, -inf }
 0x345   :  { %617 = vmax.xlane.f32.xlu2 %v616_v8 }
 0x349   :  { %v439_v11 = vpop.f32.mrf.mxu0 }
 0x34a   :  { %v4109_v15 = vadd.f32 %v568_v10, %v439_v11  ;;  %629 = vmax.xlane.f32.xlu1 %v628_v12 }
 0x34c   :  { %v619_v17 = vsel %vm591_vm4, %v4109_v15, -inf }
 0x34d   :  { %620 = vmax.xlane.f32.xlu0 %v619_v17 }
 0x352   :  { %632 = vmax.xlane.f32.xlu1 %v631_v23 }
 0x355   :  { %635 = vmax.xlane.f32.xlu0 %v634_v24 }
 0x35d   :  { %638 = vmax.xlane.f32.xlu0 %v637_v31 }
 0x374   :  { %v594_v33 = vpop.xlane.xlu2 %593 }
 0x375   :  { %v640_v34 = vsub.f32 %v4022_v21, %v594_v33 }
 0x377   :  { %v656_v35 = vmul.f32 1.442695, %v640_v34 }
 0x379   :  { %3547 = vpow2.f32 %v656_v35 }
 0x37a   :  { %v4139_v21 = vpop.xlane.xlu0 %596 }
 0x37c   :  { %v600_v36 = vpop.xlane.xlu2 %599 }
 0x37d   :  { %v642_v39 = vsub.f32 %v4032_v29, %v600_v36 }
 0x37f   :  { %v4133_v41 = vpop.eup %3547  ;;  %v660_v45 = vmul.f32 1.442695, %v642_v39 }
 0x380   :  { %v688_v46 = vsel %vm591_vm4, %v4133_v41, 0.0 }
 0x381   :  { %3549 = vpow2.f32 %v660_v45  ;;  %689 = vadd.xlane.f32.xlu0 %v688_v46  ;;  %v3472_v46 = vpack.i.bf16 %v3937_v42, %v3943_v43 }
 0x384   :  { %v606_v47 = vpop.xlane.xlu1 %605  ;;  %v603_v49 = vpop.xlane.xlu2 %602 }
 0x385   :  { %v644_v51 = vsub.f32 %v4048_v40, %v606_v47  ;;  %v643_v52 = vsub.f32 %v4046_v38, %v603_v49 }
 0x387   :  { %v4141_v54 = vpop.eup %3549  ;;  %v664_v55 = vmul.f32 1.442695, %v644_v51  ;;  %v662_v29 = vmul.f32 1.442695, %v643_v52 }
 0x388   :  { %v694_v56 = vsel %vm591_vm4, %v4141_v54, 0.0 }
 0x389   :  { %3551 = vpow2.f32 %v664_v55  ;;  %695 = vadd.xlane.f32.xlu0 %v694_v56 }
 0x38a   :  { %3553 = vpow2.f32 %v662_v29 }
 0x38e   :  { %v612_v58 = vpop.xlane.xlu0 %611 }
 0x38f   :  { %v4145_v59 = vpop.eup %3551  ;;  %v646_v60 = vsub.f32 %v4057_v48, %v612_v58 }
 0x390   :  { %v4148_v40 = vpop.eup %3553  ;;  %v700_v38 = vsel %vm591_vm4, %v4145_v59, 0.0 }
 0x391   :  { %v668_v62 = vmul.f32 1.442695, %v646_v60  ;;  %701 = vadd.xlane.f32.xlu2 %v700_v38  ;;  %v697_v63 = vsel %vm591_vm4, %v4148_v40, 0.0 }
 0x392   :  { %698 = vadd.xlane.f32.xlu0 %v697_v63 }
 0x393   :  { %3555 = vpow2.f32 %v668_v62  ;;  %v609_v0 = vpop.xlane.xlu1 %608 }
 0x394   :  { %v645_v2 = vsub.f32 %v4064_v53, %v609_v0 }
 0x396   :  { %v666_v3 = vmul.f32 1.442695, %v645_v2  ;;  %v615_v53 = vpop.xlane.xlu0 %614 }
 0x397   :  { %v647_v16 = vsub.f32 %v4071_v57, %v615_v53 }
 0x398   :  { %3557 = vpow2.f32 %v666_v3 }
 0x399   :  { %v4155_v4 = vpop.eup %3555  ;;  %v670_v23 = vmul.f32 1.442695, %v647_v16 }
 0x39a   :  { %v706_v48 = vsel %vm591_vm4, %v4155_v4, 0.0 }
 0x39b   :  { %707 = vadd.xlane.f32.xlu1 %v706_v48 }
 0x39e   :  { %v4159_v5 = vpop.eup %3557 }
 0x39f   :  { %v703_v6 = vsel %vm591_vm4, %v4159_v5, 0.0 }
 0x3a0   :  { %704 = vadd.xlane.f32.xlu2 %v703_v6 }
 0x3ad   :  { %v624_v8 = vpop.xlane.xlu2 %623 }
 0x3ae   :  { %v650_v10 = vsub.f32 %v4078_v61, %v624_v8 }
 0x3b0   :  { %v676_v11 = vmul.f32 1.442695, %v650_v10 }
 0x3b2   :  { %3559 = vpow2.f32 %v676_v11 }
 0x3b5   :  { %v627_v12 = vpop.xlane.xlu1 %626 }
 0x3b6   :  { %v651_v13 = vsub.f32 %v4085_v1, %v627_v12 }
 0x3b8   :  { %v4165_v14 = vpop.eup %3559  ;;  %v678_v17 = vmul.f32 1.442695, %v651_v13  ;;  %v618_v63 = vpop.xlane.xlu2 %617 }
 0x3b9   :  { %v718_v18 = vsel %vm591_vm4, %v4165_v14, 0.0  ;;  %v648_v16 = vsub.f32 %v4095_v7, %v618_v63 }
 0x3ba   :  { %3561 = vpow2.f32 %v678_v17  ;;  %719 = vadd.xlane.f32.xlu0 %v718_v18 }
 0x3bb   :  { %3563 = vpow2.f32 %v670_v23 }
 0x3bd   :  { %v630_v24 = vpop.xlane.xlu1 %629 }
 0x3be   :  { %v652_v61 = vsub.f32 %v4099_v9, %v630_v24 }
 0x3c0   :  { %v4170_v25 = vpop.eup %3561  ;;  %v621_v26 = vpop.xlane.xlu0 %620  ;;  %v680_v31 = vmul.f32 1.442695, %v652_v61 }
 0x3c1   :  { %v721_v1 = vsel %vm591_vm4, %v4170_v25, 0.0  ;;  %v4175_v33 = vpop.eup %3563  ;;  %v649_v60 = vsub.f32 %v4109_v15, %v621_v26 }
 0x3c2   :  { %722 = vadd.xlane.f32.xlu1 %v721_v1  ;;  %3565 = vpow2.f32 %v680_v31  ;;  %v709_v39 = vsel %vm591_vm4, %v4175_v33, 0.0 }
 0x3c5   :  { %v633_v57 = vpop.xlane.xlu1 %632 }
 0x3c6   :  { %v653_v34 = vsub.f32 %v4116_v19, %v633_v57  ;;  %v641_v19 = vsub.f32 %v4034_v30, %v4139_v21 }
 0x3c8   :  { %v636_v35 = vpop.xlane.xlu0 %635  ;;  %v682_v45 = vmul.f32 1.442695, %v653_v34  ;;  %v4183_v47 = vpop.eup %3565  ;;  %v658_v42 = vmul.f32 1.442695, %v641_v19  ;;  %v672_v34 = vmul.f32 1.442695, %v648_v16 }
 0x3c9   :  { %v654_v36 = vsub.f32 %v4118_v20, %v636_v35  ;;  %v724_v51 = vsel %vm591_vm4, %v4183_v47, 0.0 }
 0x3ca   :  { %710 = vadd.xlane.f32.xlu1 %v709_v39 }
 0x3cb   :  { %v684_v9 = vmul.f32 1.442695, %v654_v36 }
 0x3cd   :  { %3567 = vpow2.f32 %v684_v9 }
 0x3ce   :  { %3473 = vrot.lane.b32.xlu0 %v3472_v46, %s3768_s22  ;;  %3569 = vpow2.f32 %v682_v45 }
 0x3d0   :  { %v639_v49 = vpop.xlane.xlu0 %638 }
 0x3d1   :  { %v655_v20 = vsub.f32 %v4127_v28, %v639_v49 }
 0x3d2   :  { %725 = vadd.xlane.f32.xlu1 %v724_v51 }
 0x3d3   :  { %v4191_v52 = vpop.eup %3567  ;;  %v686_v55 = vmul.f32 1.442695, %v655_v20 }
 0x3d4   :  { %v730_v43 = vsel %vm591_vm4, %v4191_v52, 0.0  ;;  %v4195_v29 = vpop.eup %3569 }
 0x3d5   :  { %3571 = vpow2.f32 %v686_v55  ;;  %731 = vadd.xlane.f32.xlu2 %v730_v43  ;;  %v727_v30 = vsel %vm591_vm4, %v4195_v29, 0.0 }
 0x3d6   :  { %3483 = vrot.lane.b32.xlu0 %v3965_v44, %s3770_s15  ;;  %3573 = vpow2.f32 %v658_v42  ;;  %v674_v44 = vmul.f32 1.442695, %v649_v60 }
 0x3d8   :  { %3575 = vpow2.f32 %v674_v44 }
 0x3da   :  { %728 = vadd.xlane.f32.xlu1 %v727_v30 }
 0x3db   :  { %v4201_v28 = vpop.eup %3571 }
 0x3dc   :  { %v733_v21 = vsel %vm591_vm4, %v4201_v28, 0.0  ;;  %v4205_v56 = vpop.eup %3573 }
 0x3dd   :  { %734 = vadd.xlane.f32.xlu2 %v733_v21  ;;  %v691_v58 = vsel %vm591_vm4, %v4205_v56, 0.0 }
 0x3de   :  { %v4214_v62 = vpop.eup %3575 }
 0x3df   :  { %v715_v2 = vsel %vm591_vm4, %v4214_v62, 0.0 }
 0x3e2   :  { %692 = vadd.xlane.f32.xlu1 %v691_v58 }
 0x3f4   :  { %v4210_v38 = vpop.xlane.xlu0 %689 }
 0x3f5   :  { %3468 = vrot.lane.b32.xlu2 %v3472_v46, %s3769_s23 }
 0x3fb   :  { %3478 = vrot.lane.b32.xlu1 %v3472_v46, %s3767_s21 }
 0x3fc   :  { %v696_v0 = vpop.xlane.xlu0 %695 }
 0x3fd   :  { %3577 = vrcp.f32 %v696_v0  ;;  %v775_v10 = vand.u32 2147483648, %v696_v0  ;;  %v773_v53 = vand.u32 2147483647, %v696_v0  ;;  %vm769_vm6 = vweird.f32 %v696_v0 }
 0x3ff   :  { %v776_v17 = vor.u32 1.1754944e-38, %v775_v10  ;;  %vm774_vm8 = vcmp.eq.f32.partialorder %v773_v53, 8.507059e+37 }
 0x400   :  { %716 = vadd.xlane.f32.xlu0 %v715_v2 }
 0x403   :  { %v3578_v3 = vpop.eup %3577  ;;  %3488 = vrot.lane.b32.xlu1 %v3472_v46, %s3770_s15 }
 0x404   :  { %v765_v15 = vmul.f32 %v3578_v3, %v696_v0  ;;  %v702_v48 = vpop.xlane.xlu2 %701  ;;  %vm770_vm5 = vweird.f32 %v3578_v3 }
 0x405   :  { %3579 = vrcp.f32 %v702_v48  ;;  %v699_v6 = vpop.xlane.xlu0 %698  ;;  %vm771_vm7 = vmor %vm769_vm6, %vm770_vm5  ;;  %v803_v35 = vand.u32 2147483648, %v702_v48  ;;  %v801_v9 = vand.u32 2147483647, %v702_v48  ;;  %vm797_vm11 = vweird.f32 %v702_v48 }
 0x406   :  { %v766_v8 = vsub.f32 1.0, %v765_v15  ;;  %3581 = vrcp.f32 %v699_v6  ;;  %v789_v45 = vand.u32 2147483648, %v699_v6  ;;  %v787_v19 = vand.u32 2147483647, %v699_v6 }
 0x407   :  { %v804_v49 = vor.u32 1.1754944e-38, %v803_v35  ;;  %vm783_vm13 = vweird.f32 %v699_v6  ;;  %vm802_vm14 = vcmp.eq.f32.partialorder %v801_v9, 8.507059e+37 }
 0x408   :  { %v767_v11 = vmul.f32 %v3578_v3, %v766_v8  ;;  %v790_v43 = vor.u32 1.1754944e-38, %v789_v45  ;;  %vm788_vm1 = vcmp.eq.f32.partialorder %v787_v19, 8.507059e+37  ;;  %v745_v45 = vand.u32 2147483647, %v4210_v38 }
 0x40a   :  { %v768_v12 = vadd.f32 %v3578_v3, %v767_v11 }
 0x40b   :  { %v3580_v13 = vpop.eup %3579 }
 0x40c   :  { %v3582_v18 = vpop.eup %3581  ;;  %v772_v23 = vsel %vm771_vm7, %v3578_v3, %v768_v12  ;;  %v793_v24 = vmul.f32 %v3580_v13, %v702_v48  ;;  %vm798_vm9 = vweird.f32 %v3580_v13 }
 0x40d   :  { %v777_v61 = vsel %vm774_vm8, %v776_v17, %v772_v23  ;;  %v779_v26 = vmul.f32 %v3582_v18, %v699_v6  ;;  %vm784_vm10 = vweird.f32 %v3582_v18  ;;  %vm799_vm12 = vmor %vm797_vm11, %vm798_vm9 }
 0x40e   :  { %v794_v1 = vsub.f32 1.0, %v793_v24  ;;  %v708_v31 = vpop.xlane.xlu1 %707  ;;  %v962_v57 = vmul.f32 %v4141_v54, %v777_v61  ;;  %vm785_vm15 = vmor %vm783_vm13, %vm784_vm10  ;;  %vm741_vm13 = vweird.f32 %v4210_v38 }
 0x40f   :  { %v780_v36 = vsub.f32 1.0, %v779_v26  ;;  %3583 = vrcp.f32 %v708_v31  ;;  %v831_v2 = vand.u32 2147483648, %v708_v31  ;;  %v829_v48 = vand.u32 2147483647, %v708_v31 }
 0x410   :  { %v795_v39 = vmul.f32 %v3580_v13, %v794_v1  ;;  %3296 = vmatmul.msk.f32.vlgmr.msra.gmra.mxu1 %vm591_vm4, %v962_v57  ;;  %3585 = vpow2.f32 %v672_v34  ;;  %vm825_vm5 = vweird.f32 %v708_v31 }
 0x411   :  { %v781_v7 = vmul.f32 %v3582_v18, %v780_v36  ;;  %vm830_vm7 = vcmp.eq.f32.partialorder %v829_v48, 8.507059e+37 }
 0x412   :  { %v796_v46 = vadd.f32 %v3580_v13, %v795_v39 }
 0x413   :  { %v705_v54 = vpop.xlane.xlu2 %704  ;;  %v782_v20 = vadd.f32 %v3582_v18, %v781_v7 }
 0x414   :  { %v800_v51 = vsel %vm799_vm12, %v3580_v13, %v796_v46  ;;  %3587 = vrcp.f32 %v705_v54  ;;  %v815_v16 = vand.u32 2147483647, %v705_v54  ;;  %vm811_vm9 = vweird.f32 %v705_v54 }
 0x415   :  { %v3584_v55 = vpop.eup %3583  ;;  %v805_v42 = vsel %vm802_vm14, %v804_v49, %v800_v51  ;;  %v786_v30 = vsel %vm785_vm15, %v3582_v18, %v782_v20  ;;  %3589 = vrcp.f32 %v4210_v38  ;;  %vm746_vm15 = vcmp.eq.f32.partialorder %v745_v45, 8.507059e+37 }
 0x416   :  { %v821_v21 = vmul.f32 %v3584_v55, %v708_v31  ;;  %v964_v58 = vmul.f32 %v4145_v59, %v805_v42  ;;  %v791_v60 = vsel %vm788_vm1, %v790_v43, %v786_v30  ;;  %v4225_v0 = vpop.eup %3585  ;;  %vm826_vm2 = vweird.f32 %v3584_v55 }
 0x417   :  { %v963_v63 = vmul.f32 %v4148_v40, %v791_v60  ;;  %vm827_vm6 = vmor %vm825_vm5, %vm826_vm2  ;;  %v832_v59 = vor.u32 1.1754944e-38, %v831_v2  ;;  %v712_v11 = vsel %vm591_vm4, %v4225_v0, 0.0  ;;  %v817_v40 = vand.u32 2147483648, %v705_v54 }
 0x418   :  { %v822_v44 = vsub.f32 1.0, %v821_v21  ;;  %3298 = vmatmul.msk.f32.vlgmr.msrb.gmra.mxu2 %vm591_vm4, %v964_v58  ;;  %vm816_vm11 = vcmp.eq.f32.partialorder %v815_v16, 8.507059e+37 }
 0x419   :  { %3297 = vmatmul.msk.f32.gmra.mxu1 %vm591_vm4, %v963_v63  ;;  %v818_v23 = vor.u32 1.1754944e-38, %v817_v40 }
 0x41a   :  { %v3588_v3 = vpop.eup %3587  ;;  %v823_v15 = vmul.f32 %v3584_v55, %v822_v44 }
 0x41b   :  { %v807_v6 = vmul.f32 %v3588_v3, %v705_v54  ;;  %vm812_vm8 = vweird.f32 %v3588_v3  ;;  %v3590_v1 = vpop.eup %3589 }
 0x41c   :  { %v824_v8 = vadd.f32 %v3584_v55, %v823_v15  ;;  %vm813_vm10 = vmor %vm811_vm9, %vm812_vm8  ;;  %v737_v31 = vmul.f32 %v3590_v1, %v4210_v38  ;;  %vm742_vm12 = vweird.f32 %v3590_v1 }
 0x41d   :  { %v808_v10 = vsub.f32 1.0, %v807_v6  ;;  %vm743_vm14 = vmor %vm741_vm13, %vm742_vm12 }
 0x41e   :  { %v828_v53 = vsel %vm827_vm6, %v3584_v55, %v824_v8  ;;  %713 = vadd.xlane.f32.xlu2 %v712_v11  ;;  %v738_v34 = vsub.f32 1.0, %v737_v31 }
 0x41f   :  { %v833_v12 = vsel %vm830_vm7, %v832_v59, %v828_v53  ;;  %v809_v13 = vmul.f32 %v3588_v3, %v808_v10 }
 0x420   :  { %v966_v17 = vmul.f32 %v4155_v4, %v833_v12  ;;  %v739_v35 = vmul.f32 %v3590_v1, %v738_v34 }
 0x421   :  { %v810_v18 = vadd.f32 %v3588_v3, %v809_v13 }
 0x422   :  { %3300 = vmatmul.msk.f32.vlgmr.msrb.gmra.mxu3 %vm591_vm4, %v966_v17  ;;  %v740_v9 = vadd.f32 %v3590_v1, %v739_v35 }
 0x423   :  { %v814_v24 = vsel %vm813_vm10, %v3588_v3, %v810_v18 }
 0x424   :  { %v819_v61 = vsel %vm816_vm11, %v818_v23, %v814_v24  ;;  %v744_v49 = vsel %vm743_vm14, %v3590_v1, %v740_v9 }
 0x425   :  { %v965_v26 = vmul.f32 %v4159_v5, %v819_v61  ;;  %v747_v5 = vand.u32 2147483648, %v4210_v38 }
 0x427   :  { %3299 = vmatmul.msk.f32.gmra.mxu2 %vm591_vm4, %v965_v26  ;;  %v748_v51 = vor.u32 1.1754944e-38, %v747_v5 }
 0x429   :  { %v749_v42 = vsel %vm746_vm15, %v748_v51, %v744_v49 }
 0x42a   :  { %v960_v15 = vmul.f32 %v4133_v41, %v749_v42 }
 0x42d   :  { %v4238_v4 = vpop.xlane.xlu0 %719 }
 0x435   :  { %v4236_v57 = vpop.xlane.xlu1 %722 }
 0x43d   :  { %v711_v36 = vpop.xlane.xlu1 %710 }
 0x43e   :  { %3591 = vrcp.f32 %v711_v36  ;;  %v845_v43 = vand.u32 2147483648, %v711_v36  ;;  %v843_v58 = vand.u32 2147483647, %v711_v36  ;;  %vm839_vm2 = vweird.f32 %v711_v36 }
 0x440   :  { %v3474_v39 = vpop.permute.xlu0 %3473  ;;  %v846_v3 = vor.u32 1.1754944e-38, %v845_v43  ;;  %vm844_vm6 = vcmp.eq.f32.partialorder %v843_v58, 8.507059e+37 }
 0x441   :  { %v3475_v7 = vunpack.i.l.bf16 %v3474_v39  ;;  %v3476_v46 = vunpack.i.h.bf16 %v3474_v39 }
 0x443   :  { %1304 = vmatpush.msra.mxu3 %v3475_v7 }
 0x444   :  { %v3592_v19 = vpop.eup %3591 }
 0x445   :  { %v835_v54 = vmul.f32 %v3592_v19, %v711_v36  ;;  %v4243_v20 = vpop.xlane.xlu1 %725  ;;  %1305 = vmatpush.msra.mxu3 %v3476_v46  ;;  %vm840_vm1 = vweird.f32 %v3592_v19 }
 0x446   :  { %3593 = vrcp.f32 %v4243_v20  ;;  %vm841_vm5 = vmor %vm839_vm2, %vm840_vm1  ;;  %v915_v24 = vand.u32 2147483648, %v4243_v20  ;;  %vm909_vm9 = vweird.f32 %v4243_v20  ;;  %v913_v26 = vand.u32 2147483647, %v4243_v20 }
 0x447   :  { %v836_v55 = vsub.f32 1.0, %v835_v54 }
 0x448   :  { %v3484_v30 = vpop.permute.xlu0 %3483  ;;  %v732_v21 = vpop.xlane.xlu2 %731  ;;  %v916_v45 = vor.u32 1.1754944e-38, %v915_v24  ;;  %vm914_vm14 = vcmp.eq.f32.partialorder %v913_v26, 8.507059e+37 }
 0x449   :  { %v837_v38 = vmul.f32 %v3592_v19, %v836_v55  ;;  %v3485_v60 = vunpack.i.l.bf16 %v3484_v30  ;;  %3595 = vrcp.f32 %v732_v21  ;;  %v3486_v44 = vunpack.i.h.bf16 %v3484_v30 }
 0x44a   :  { %3597 = vrcp.f32 %v4238_v4  ;;  %v943_v18 = vand.u32 2147483648, %v732_v21  ;;  %vm937_vm11 = vweird.f32 %v732_v21 }
 0x44b   :  { %1002 = vmatpush.msrb.mxu0 %v3485_v60  ;;  %v838_v63 = vadd.f32 %v3592_v19, %v837_v38 }
 0x44c   :  { %v3594_v2 = vpop.eup %3593  ;;  %v944_v7 = vor.u32 1.1754944e-38, %v943_v18 }
 0x44d   :  { %v905_v48 = vmul.f32 %v3594_v2, %v4243_v20  ;;  %v4249_v6 = vpop.xlane.xlu1 %728  ;;  %1003 = vmatpush.msrb.mxu0 %v3486_v44  ;;  %v842_v8 = vsel %vm841_vm5, %v3592_v19, %v838_v63  ;;  %vm910_vm7 = vweird.f32 %v3594_v2 }
 0x44e   :  { %3599 = vrcp.f32 %v4249_v6  ;;  %3294 = vmatmul.msk.f32.vlgmr.msrb.gmra.mxu0 %vm591_vm4, %v960_v15  ;;  %v847_v59 = vsel %vm844_vm6, %v846_v3, %v842_v8  ;;  %vm4271_vm10 = vmor %vm909_vm9, %vm910_vm7  ;;  %v929_v51 = vand.u32 2147483648, %v4249_v6  ;;  %v927_v38 = vand.u32 2147483647, %v4249_v6 }
 0x44f   :  { %v3596_v10 = vpop.eup %3595  ;;  %v906_v11 = vsub.f32 1.0, %v905_v48  ;;  %v967_v53 = vmul.f32 %v4175_v33, %v847_v59  ;;  %v941_v33 = vand.u32 2147483647, %v732_v21  ;;  %vm923_vm2 = vweird.f32 %v4249_v6 }
 0x450   :  { %v933_v41 = vmul.f32 %v3596_v10, %v732_v21  ;;  %v4254_v40 = vpop.xlane.xlu2 %734  ;;  %v4258_v16 = vpop.eup %3597  ;;  %vm938_vm8 = vweird.f32 %v3596_v10  ;;  %vm928_vm9 = vcmp.eq.f32.partialorder %v927_v38, 8.507059e+37 }
 0x451   :  { %v907_v12 = vmul.f32 %v3594_v2, %v906_v11  ;;  %3601 = vrcp.f32 %v4254_v40  ;;  %3301 = vmatmul.msk.f32.gmra.mxu3 %vm591_vm4, %v967_v53  ;;  %v877_v34 = vmul.f32 %v4258_v16, %v4238_v4  ;;  %vm939_vm12 = vmor %vm937_vm11, %vm938_vm8  ;;  %vm942_vm13 = vcmp.eq.f32.partialorder %v941_v33, 8.507059e+37 }
 0x452   :  { %v934_v13 = vsub.f32 1.0, %v933_v41  ;;  %v957_v21 = vand.u32 2147483648, %v4254_v40  ;;  %vm951_vm5 = vweird.f32 %v4254_v40 }
 0x453   :  { %v908_v17 = vadd.f32 %v3594_v2, %v907_v12  ;;  %v878_v48 = vsub.f32 1.0, %v877_v34 }
 0x454   :  { %v4260_v23 = vpop.eup %3599  ;;  %v935_v61 = vmul.f32 %v3596_v10, %v934_v13  ;;  %v958_v11 = vor.u32 1.1754944e-38, %v957_v21 }
 0x455   :  { %v919_v1 = vmul.f32 %v4260_v23, %v4249_v6  ;;  %v4267_v31 = vpop.xlane.xlu1 %692  ;;  %v912_v9 = vsel %vm4271_vm10, %v3594_v2, %v908_v17  ;;  %vm924_vm15 = vweird.f32 %v4260_v23  ;;  %v955_v2 = vand.u32 2147483647, %v4254_v40 }
 0x456   :  { %v936_v36 = vadd.f32 %v3596_v10, %v935_v61  ;;  %3603 = vrcp.f32 %v4267_v31  ;;  %v917_v55 = vsel %vm914_vm14, %v916_v45, %v912_v9  ;;  %vm4297_vm6 = vmor %vm923_vm2, %vm924_vm15  ;;  %v761_v6 = vand.u32 2147483648, %v4267_v31 }
 0x457   :  { %v3602_v39 = vpop.eup %3601  ;;  %3605 = vrcp.f32 %v4236_v57  ;;  %v920_v5 = vsub.f32 1.0, %v919_v1  ;;  %v972_v15 = vmul.f32 %v4183_v47, %v917_v55  ;;  %vm956_vm8 = vcmp.eq.f32.partialorder %v955_v2, 8.507059e+37 }
 0x458   :  { %v940_v46 = vsel %vm939_vm12, %v3596_v10, %v936_v36  ;;  %v947_v19 = vmul.f32 %v3602_v39, %v4254_v40  ;;  %v3469_v49 = vpop.permute.xlu2 %3468  ;;  %vm952_vm1 = vweird.f32 %v3602_v39  ;;  %v930_v10 = vor.u32 1.1754944e-38, %v929_v51 }
 0x459   :  { %v945_v54 = vsel %vm942_vm13, %v944_v7, %v940_v46  ;;  %v921_v20 = vmul.f32 %v4260_v23, %v920_v5  ;;  %v3470_v43 = vunpack.i.l.bf16 %v3469_v49  ;;  %v3471_v63 = vunpack.i.h.bf16 %v3469_v49  ;;  %vm953_vm7 = vmor %vm951_vm5, %vm952_vm1 }
 0x45a   :  { %v948_v42 = vsub.f32 1.0, %v947_v19  ;;  %v974_v30 = vmul.f32 %v4191_v52, %v945_v54  ;;  %v759_v13 = vand.u32 2147483647, %v4267_v31  ;;  %v879_v24 = vmul.f32 %v4258_v16, %v878_v48 }
 0x45b   :  { %v922_v58 = vadd.f32 %v4260_v23, %v921_v20  ;;  %1259 = vmatpush.msra.mxu2 %v3470_v43  ;;  %vm755_vm11 = vweird.f32 %v4267_v31  ;;  %v762_v33 = vor.u32 1.1754944e-38, %v761_v6  ;;  %vm882_vm14 = vweird.f32 %v4258_v16 }
 0x45c   :  { %v3604_v60 = vpop.eup %3603  ;;  %v949_v44 = vmul.f32 %v3602_v39, %v948_v42  ;;  %3308 = vmatmul.msk.f32.vlgmr.msra.gmra.mxu3 %vm591_vm4, %v974_v30  ;;  %vm760_vm13 = vcmp.eq.f32.partialorder %v759_v13, 8.507059e+37  ;;  %vm881_vm15 = vweird.f32 %v4238_v4  ;;  %v901_v19 = vand.u32 2147483648, %v4236_v57 }
 0x45d   :  { %v4289_v3 = vpop.eup %3605  ;;  %v751_v52 = vmul.f32 %v3604_v60, %v4267_v31  ;;  %1260 = vmatpush.msra.mxu2 %v3471_v63  ;;  %v926_v47 = vsel %vm4297_vm6, %v4260_v23, %v922_v58  ;;  %vm756_vm10 = vweird.f32 %v3604_v60  ;;  %v887_v31 = vand.u32 2147483648, %v4238_v4  ;;  %vm883_vm1 = vmor %vm881_vm15, %vm882_vm14 }
 0x45e   :  { %v950_v8 = vadd.f32 %v3602_v39, %v949_v44  ;;  %3306 = vmatmul.msk.f32.vlgmr.msra.gmra.mxu2 %vm591_vm4, %v972_v15  ;;  %v931_v18 = vsel %vm928_vm9, %v930_v10, %v926_v47  ;;  %v891_v61 = vmul.f32 %v4289_v3, %v4236_v57  ;;  %vm757_vm12 = vmor %vm755_vm11, %vm756_vm10  ;;  %vm896_vm5 = vweird.f32 %v4289_v3 }
 0x45f   :  { %v752_v53 = vsub.f32 1.0, %v751_v52  ;;  %v973_v26 = vmul.f32 %v4195_v29, %v931_v18  ;;  %v888_v7 = vor.u32 1.1754944e-38, %v887_v31  ;;  %vm895_vm6 = vweird.f32 %v4236_v57  ;;  %v1329_v31 = vld [vmem:[%s5197_s6 + $0x10] sm:$0xff] }
 0x460   :  { %v954_v41 = vsel %vm953_vm7, %v3602_v39, %v950_v8  ;;  %v892_v35 = vsub.f32 1.0, %v891_v61  ;;  %v885_v39 = vand.u32 2147483647, %v4238_v4  ;;  %vm897_vm7 = vmor %vm895_vm6, %vm896_vm5  ;;  %v902_v20 = vor.u32 1.1754944e-38, %v901_v19 }
 0x461   :  { %v753_v40 = vmul.f32 %v3604_v60, %v752_v53  ;;  %v959_v12 = vsel %vm956_vm8, %v958_v11, %v954_v41  ;;  %vm1102_vm5 = vcmask 195712   ;;  %vm1148_vm6 = vcmask 261312  }
 0x462   :  { %v975_v17 = vmul.f32 %v4201_v28, %v959_v12  ;;  %v880_v28 = vadd.f32 %v4258_v16, %v879_v24  ;;  %v893_v9 = vmul.f32 %v4289_v3, %v892_v35  ;;  %vm886_vm2 = vcmp.eq.f32.partialorder %v885_v39, 8.507059e+37  ;;  %v1328_v39 = vld [vmem:[%s5197_s6 + $0x8] sm:$0xff] }
 0x463   :  { %v754_v23 = vadd.f32 %v3604_v60, %v753_v40 }
 0x464   :  { %3309 = vmatmul.msk.f32.gmra.mxu3 %vm591_vm4, %v975_v17  ;;  %v884_v29 = vsel %vm883_vm1, %v4258_v16, %v880_v28  ;;  %v899_v16 = vand.u32 2147483647, %v4236_v57 }
 0x465   :  { %v758_v1 = vsel %vm757_vm12, %v3604_v60, %v754_v23  ;;  %v889_v45 = vsel %vm886_vm2, %v888_v7, %v884_v29  ;;  %vm1056_vm2 = vcmask 130112   ;;  %v1327_v29 = vld [vmem:[%s5197_s6] sm:$0xff] }
 0x466   :  { %v763_v34 = vsel %vm760_vm13, %v762_v33, %v758_v1  ;;  %3307 = vmatmul.msk.f32.gmra.mxu2 %vm591_vm4, %v973_v26  ;;  %v970_v4 = vmul.f32 %v4165_v14, %v889_v45  ;;  %vm900_vm8 = vcmp.eq.f32.partialorder %v899_v16, 8.507059e+37 }
 0x467   :  { %v961_v36 = vmul.f32 %v4205_v56, %v763_v34  ;;  %v894_v56 = vadd.f32 %v4289_v3, %v893_v9 }
 0x469   :  { %3295 = vmatmul.msk.f32.gmra.mxu0 %vm591_vm4, %v961_v36  ;;  %v898_v54 = vsel %vm897_vm7, %v4289_v3, %v894_v56  ;;  %v1330_v36 = vld [vmem:[%s5197_s6 + $0x18] sm:$0xff] }
 0x46a   :  { %v903_v42 = vsel %vm900_vm8, %v902_v20, %v898_v54 }
 0x46b   :  { %v971_v30 = vmul.f32 %v4170_v25, %v903_v42 }
 0x46d   :  { %v3479_v5 = vpop.permute.xlu1 %3478 }
 0x46e   :  { %v3480_v46 = vunpack.i.l.bf16 %v3479_v5  ;;  %v3481_v49 = vunpack.i.h.bf16 %v3479_v5 }
 0x470   :  { %1214 = vmatpush.msrb.mxu1 %v3480_v46 }
 0x472   :  { %1215 = vmatpush.msrb.mxu1 %v3481_v49 }
 0x473   :  { %3304 = vmatmul.msk.f32.vlgmr.msrb.gmra.mxu1 %vm591_vm4, %v970_v4  ;;  %v717_v14 = vpop.xlane.xlu0 %716 }
 0x474   :  { %3607 = vrcp.f32 %v717_v14  ;;  %v873_v47 = vand.u32 2147483648, %v717_v14  ;;  %vm867_vm14 = vweird.f32 %v717_v14  ;;  %v871_v40 = vand.u32 2147483647, %v717_v14 }
 0x475   :  { %v3489_v51 = vpop.permute.xlu1 %3488 }
 0x476   :  { %v3490_v55 = vunpack.i.l.bf16 %v3489_v51  ;;  %v3491_v43 = vunpack.i.h.bf16 %v3489_v51  ;;  %v874_v17 = vor.u32 1.1754944e-38, %v873_v47  ;;  %vm872_vm1 = vcmp.eq.f32.partialorder %v871_v40, 8.507059e+37  ;;  %v1452_v47 = vld [vmem:[%s5199_s8] sm:$0xff] }
 0x478   :  { %1177 = vmatpush.msra.mxu0 %v3490_v55 }
 0x47a   :  { %1178 = vmatpush.msra.mxu0 %v3491_v43  ;;  %v3608_v58 = vpop.eup %3607 }
 0x47b   :  { %3305 = vmatmul.msk.f32.gmra.mxu1 %vm591_vm4, %v971_v30  ;;  %v863_v38 = vmul.f32 %v3608_v58, %v717_v14  ;;  %vm868_vm13 = vweird.f32 %v3608_v58 }
 0x47c   :  { %vm869_vm15 = vmor %vm867_vm14, %vm868_vm13  ;;  %1355 = vmatpush.msrb.mxu0 %v1330_v36 }
 0x47d   :  { %v864_v63 = vsub.f32 1.0, %v863_v38 }
 0x47e   :  { %1356 = vmatpush.msrb.mxu0 %v1329_v31 }
 0x47f   :  { %v865_v15 = vmul.f32 %v3608_v58, %v864_v63 }
 0x480   :  { %1357 = vmatpush.msrb.mxu0 %v1328_v39 }
 0x481   :  { %v866_v53 = vadd.f32 %v3608_v58, %v865_v15 }
 0x482   :  { %1358 = vmatpush.msrb.mxu0 %v1327_v29 }
 0x483   :  { %v870_v13 = vsel %vm869_vm15, %v3608_v58, %v866_v53  ;;  %v1455_v53 = vld [vmem:[%s5199_s8 + $0x18] sm:$0xff] }
 0x484   :  { %v875_v18 = vsel %vm872_vm1, %v874_v17, %v870_v13 }
 0x485   :  { %v969_v24 = vmul.f32 %v4214_v62, %v875_v18 }
 0x48d   :  { %v1042_v57 = vpop.f32.mrf.mxu1 }
 0x48e   :  { %1050 = vrot.lane.b32.xlu1 %v1042_v57, %s5208_s24 }
 0x491   :  { %v714_v21 = vpop.xlane.xlu2 %713 }
 0x492   :  { %3609 = vrcp.f32 %v714_v21  ;;  %v859_v52 = vand.u32 2147483648, %v714_v21  ;;  %v857_v8 = vand.u32 2147483647, %v714_v21  ;;  %vm853_vm10 = vweird.f32 %v714_v21 }
 0x494   :  { %v860_v10 = vor.u32 1.1754944e-38, %v859_v52  ;;  %vm858_vm12 = vcmp.eq.f32.partialorder %v857_v8, 8.507059e+37 }
 0x496   :  { %v1045_v60 = vpop.f32.mrf.mxu1 }
 0x497   :  { %1052 = vrot.lane.b32.xlu2 %v1045_v60, %s5208_s24 }
 0x498   :  { %v3610_v44 = vpop.eup %3609 }
 0x499   :  { %v849_v2 = vmul.f32 %v3610_v44, %v714_v21  ;;  %vm854_vm9 = vweird.f32 %v3610_v44 }
 0x49a   :  { %vm855_vm11 = vmor %vm853_vm10, %vm854_vm9 }
 0x49b   :  { %v850_v25 = vsub.f32 1.0, %v849_v2  ;;  %v1088_v3 = vpop.f32.mrf.mxu2 }
 0x49c   :  { %1096 = vrot.lane.b32.xlu1 %v1088_v3, %s5206_s25 }
 0x49d   :  { %v851_v48 = vmul.f32 %v3610_v44, %v850_v25 }
 0x49f   :  { %v852_v59 = vadd.f32 %v3610_v44, %v851_v48 }
 0x4a1   :  { %v856_v11 = vsel %vm855_vm11, %v3610_v44, %v852_v59  ;;  %v1459_v59 = vld [vmem:[%s5199_s8 + $0x38] sm:$0xff] }
 0x4a2   :  { %v861_v6 = vsel %vm858_vm12, %v860_v10, %v856_v11  ;;  %1513 = vmatpush.msrb.mxu2 %v1459_v59  ;;  %v1457_v10 = vld [vmem:[%s5199_s8 + $0x28] sm:$0xff]  ;;  %v1454_v11 = vld [vmem:[%s5199_s8 + $0x10] sm:$0xff]  ;;  %v1626_v59 = vld [vmem:[%s5200_s9 + $0x60] sm:$0xff] }
 0x4a3   :  { %v968_v41 = vmul.f32 %v4225_v0, %v861_v6  ;;  %v1453_v6 = vld [vmem:[%s5199_s8 + $0x8] sm:$0xff] }
 0x4a4   :  { %1514 = vmatpush.msrb.mxu2 %v1457_v10  ;;  %v1624_v10 = vld [vmem:[%s5200_s9 + $0x50] sm:$0xff] }
 0x4a5   :  { %v1134_v12 = vpop.f32.mrf.mxu3  ;;  %3302 = vmatmul.msk.f32.vlgmr.msra.gmra.mxu0 %vm591_vm4, %v968_v41 }
 0x4a6   :  { %1142 = vrot.lane.b32.xlu1 %v1134_v12, %s5204_s26  ;;  %1515 = vmatpush.msrb.mxu2 %v1455_v53  ;;  %v1622_v53 = vld [vmem:[%s5200_s9 + $0x40] sm:$0xff] }
 0x4a8   :  { %1516 = vmatpush.msrb.mxu2 %v1453_v6  ;;  %v1620_v6 = vld [vmem:[%s5200_s9 + $0x30] sm:$0xff] }
 0x4aa   :  { %v1091_v61 = vpop.f32.mrf.mxu2 }
 0x4ad   :  { %3303 = vmatmul.msk.f32.gmra.mxu0 %vm591_vm4, %v969_v24 }
 0x4ae   :  { %1098 = vrot.lane.b32.xlu1 %v1091_v61, %s5206_s25 }
 0x4cb   :  { %v1005_v0 = vpop.f32.mrf.mxu0 }
 0x4cc   :  { %1011 = vst.msk [vmem:[#allocation2] sm:$0xff] %vm256_vm3, %v1005_v0 }
 0x4d4   :  { %v1137_v23 = vpop.f32.mrf.mxu3 }
 0x4d5   :  { %1144 = vrot.lane.b32.xlu0 %v1137_v23, %s5204_s26  ;;  %v3533_v23 = vld [vmem:[%s5198_s7] ss:$0 sm:$0xff] }
 0x4df   :  { %v1307_v33 = vpop.f32.mrf.mxu3 }
 0x4e0   :  { %1315 = vrot.lane.b32.xlu2 %v1307_v33, %s5204_s26 }
 0x4e1   :  { %v1262_v28 = vpop.f32.mrf.mxu2 }
 0x4e6   :  { %v1008_v26 = vpop.f32.mrf.mxu0 }
 0x4e7   :  { %1012 = vst.msk [vmem:[#allocation2 + $0x8] sm:$0xff] %vm256_vm3, %v1008_v26  ;;  %v1310_v1 = vpop.f32.mrf.mxu3 }
 0x4e8   :  { %1317 = vrot.lane.b32.xlu2 %v1310_v1, %s5204_s26 }
 0x4e9   :  { %v1265_v9 = vpop.f32.mrf.mxu2 }
 0x4f0   :  { %v1217_v62 = vpop.f32.mrf.mxu1 }
 0x4f1   :  { %1225 = vrot.lane.b32.xlu1 %v1217_v62, %s5208_s24  ;;  %v1053_v34 = vpop.permute.xlu2 %1052 }
 0x4f2   :  { %1058 = vst.msk [vmem:[#allocation2 + $0x8] sm:$0xff] %vm1056_vm2, %v1053_v34 }
 0x4f8   :  { %v1220_v35 = vpop.f32.mrf.mxu1 }
 0x4f9   :  { %1227 = vrot.lane.b32.xlu0 %v1220_v35, %s5208_s24  ;;  %1270 = vrot.lane.b32.xlu1 %v1262_v28, %s5206_s25 }
 0x500   :  { %v1051_v7 = vpop.permute.xlu1 %1050 }
 0x501   :  { %1057 = vst.msk [vmem:[#allocation2] sm:$0xff] %vm1056_vm2, %v1051_v7  ;;  %1272 = vrot.lane.b32.xlu1 %v1265_v9, %s5206_s25 }
 0x50e   :  { %v1097_v5 = vpop.permute.xlu1 %1096 }
 0x50f   :  { %1103 = vst.msk [vmem:[#allocation2] sm:$0xff] %vm1102_vm5, %v1097_v5 }
 0x518   :  { %v1143_v45 = vpop.permute.xlu1 %1142 }
 0x519   :  { %1149 = vst.msk [vmem:[#allocation2] sm:$0xff] %vm1148_vm6, %v1143_v45 }
 0x520   :  { %v1099_v46 = vpop.permute.xlu1 %1098  ;;  %v1323_v56 = vld [vmem:[#allocation2] sm:$0xff] }
 0x521   :  { %1104 = vst.msk [vmem:[#allocation2 + $0x8] sm:$0xff] %vm1102_vm5, %v1099_v46  ;;  %3310 = vmatmul.msk.f32.vlgmr.msrb.gmra.mxu0 %vm80_vm0, %v1323_v56 }
 0x522   :  { %v1180_v19 = vpop.f32.mrf.mxu0 }
 0x523   :  { %1186 = vst.msk [vmem:[#allocation2 + $0x10] sm:$0xff] %vm256_vm3, %v1180_v19 }
 0x52a   :  { %v1183_v49 = vpop.f32.mrf.mxu0 }
 0x52b   :  { %1187 = vst.msk [vmem:[#allocation2 + $0x18] sm:$0xff] %vm256_vm3, %v1183_v49 }
 0x53a   :  { %v1316_v20 = vpop.permute.xlu2 %1315 }
 0x542   :  { %v1318_v43 = vpop.permute.xlu2 %1317 }
 0x547   :  { %v1145_v4 = vpop.permute.xlu0 %1144 }
 0x548   :  { %1150 = vst.msk [vmem:[#allocation2 + $0x8] sm:$0xff] %vm1148_vm6, %v1145_v4 }
 0x54f   :  { %v1324_v16 = vld [vmem:[#allocation2 + $0x8] sm:$0xff] }
 0x550   :  { %3311 = vmatmul.msk.f32.gmra.mxu0 %vm80_vm0, %v1324_v16 }
 0x563   :  { %v1226_v54 = vpop.permute.xlu1 %1225 }
 0x564   :  { %1231 = vst.msk [vmem:[#allocation2 + $0x10] sm:$0xff] %vm1056_vm2, %v1226_v54 }
 0x56b   :  { %v1228_v51 = vpop.permute.xlu0 %1227  ;;  %v1271_v55 = vpop.permute.xlu1 %1270 }
 0x56c   :  { %1232 = vst.msk [vmem:[#allocation2 + $0x18] sm:$0xff] %vm1056_vm2, %v1228_v51 }
 0x56d   :  { %1276 = vst.msk [vmem:[#allocation2 + $0x10] sm:$0xff] %vm1102_vm5, %v1271_v55 }
 0x56e   :  { %1321 = vst.msk [vmem:[#allocation2 + $0x10] sm:$0xff] %vm1148_vm6, %v1316_v20 }
 0x573   :  { %v1273_v42 = vpop.permute.xlu1 %1272 }
 0x574   :  { %1277 = vst.msk [vmem:[#allocation2 + $0x18] sm:$0xff] %vm1102_vm5, %v1273_v42 }
 0x575   :  { %1322 = vst.msk [vmem:[#allocation2 + $0x18] sm:$0xff] %vm1148_vm6, %v1318_v43  ;;  %v1325_v30 = vld [vmem:[#allocation2 + $0x10] sm:$0xff] }
 0x576   :  { %3312 = vmatmul.msk.f32.gmra.mxu0 %vm80_vm0, %v1325_v30 }
 0x57c   :  { %v1326_v14 = vld [vmem:[#allocation2 + $0x18] sm:$0xff] }
 0x57e   :  { %3313 = vmatmul.msk.f32.gmra.mxu0 %vm80_vm0, %v1326_v14 }
 0x59e   :  { %v1360_v57 = vpop.f32.mrf.mxu0 }
 0x59f   :  { %v4384_v21 = vadd.f32 %v1360_v57, %v3871_v22 }
 0x5a1   :  { %v1377_v58 = vmul.f32 %v4384_v21, %v4384_v21 }
 0x5a3   :  { %v1381_v38 = vsel %vm80_vm0, %v1377_v58, 0.0 }
 0x5a4   :  { %1382 = vadd.xlane.f32.xlu0 %v1381_v38 }
 0x5cd   :  { %v1363_v60 = vpop.f32.mrf.mxu0 }
 0x5ce   :  { %v4390_v44 = vadd.f32 %v1363_v60, %v3879_v27 }
 0x5d0   :  { %v1378_v63 = vmul.f32 %v4390_v44, %v4390_v44 }
 0x5d2   :  { %v1384_v2 = vsel %vm80_vm0, %v1378_v63, 0.0 }
 0x5d3   :  { %1385 = vadd.xlane.f32.xlu1 %v1384_v2 }
 0x5f3   :  { %v1366_v25 = vpop.f32.mrf.mxu0 }
 0x5f4   :  { %v4396_v22 = vadd.f32 %v1366_v25, %v3887_v32  ;;  %v1458_v32 = vld [vmem:[%s5199_s8 + $0x30] sm:$0xff] }
 0x5f5   :  { %1484 = vmatpush.msra.mxu1 %v1458_v32  ;;  %v1627_v32 = vld [vmem:[%s5200_s9 + $0x68] sm:$0xff] }
 0x5f6   :  { %v1379_v3 = vmul.f32 %v4396_v22, %v4396_v22 }
 0x5f8   :  { %v1387_v52 = vsel %vm80_vm0, %v1379_v3, 0.0 }
 0x5f9   :  { %1388 = vadd.xlane.f32.xlu2 %v1387_v52 }
 0x5fb   :  { %v1369_v15 = vpop.f32.mrf.mxu0 }
 0x5fc   :  { %v4402_v27 = vadd.f32 %v1369_v15, %v3895_v37  ;;  %v1456_v37 = vld [vmem:[%s5199_s8 + $0x20] sm:$0xff] }
 0x5fd   :  { %1485 = vmatpush.msra.mxu1 %v1456_v37  ;;  %v1625_v37 = vld [vmem:[%s5200_s9 + $0x58] sm:$0xff] }
 0x5fe   :  { %v1380_v48 = vmul.f32 %v4402_v27, %v4402_v27 }
 0x5ff   :  { %1486 = vmatpush.msra.mxu1 %v1454_v11  ;;  %v1623_v11 = vld [vmem:[%s5200_s9 + $0x48] sm:$0xff] }
 0x600   :  { %v1390_v8 = vsel %vm80_vm0, %v1380_v48, 0.0  ;;  %v1629_v48 = vld [vmem:[%s5200_s9 + $0x78] sm:$0xff] }
 0x601   :  { %1391 = vadd.xlane.f32.xlu0 %v1390_v8  ;;  %1487 = vmatpush.msra.mxu1 %v1452_v47  ;;  %v1628_v8 = vld [vmem:[%s5200_s9 + $0x70] sm:$0xff]  ;;  %v1621_v47 = vld [vmem:[%s5200_s9 + $0x38] sm:$0xff] }
 0x602   :  { %1630 = vmatpush.msrb.mxu3 %v1629_v48 }
 0x604   :  { %1631 = vmatpush.msrb.mxu3 %v1628_v8 }
 0x606   :  { %1632 = vmatpush.msrb.mxu3 %v1627_v32 }
 0x608   :  { %1633 = vmatpush.msrb.mxu3 %v1626_v59 }
 0x60a   :  { %1634 = vmatpush.msrb.mxu3 %v1625_v37 }
 0x60c   :  { %1635 = vmatpush.msrb.mxu3 %v1624_v10 }
 0x60e   :  { %1636 = vmatpush.msrb.mxu3 %v1623_v11 }
 0x610   :  { %1637 = vmatpush.msrb.mxu3 %v1622_v53 }
 0x612   :  { %1638 = vmatpush.msrb.mxu3 %v1621_v47 }
 0x614   :  { %1639 = vmatpush.msrb.mxu3 %v1620_v6 }
 0x617   :  { %v1383_v41 = vpop.xlane.xlu0 %1382 }
 0x618   :  { %v1393_v40 = vmul.f32 %v1383_v41, %v3912_v50  ;;  %v1619_v41 = vld [vmem:[%s5200_s9 + $0x28] sm:$0xff] }
 0x619   :  { %1640 = vmatpush.msrb.mxu3 %v1619_v41 }
 0x61a   :  { %v1397_v12 = vadd.f32 1.1920929e-07, %v1393_v40  ;;  %v1618_v40 = vld [vmem:[%s5200_s9 + $0x20] sm:$0xff] }
 0x61b   :  { %1641 = vmatpush.msrb.mxu3 %v1618_v40 }
 0x61c   :  { %3611 = vrsqrt.f32 %v1397_v12  ;;  %vm1407_vm8 = vweird.f32 %v1397_v12 }
 0x622   :  { %v3612_v13 = vpop.eup %3611 }
 0x623   :  { %v1402_v17 = vmul.f32 %v3612_v13, %v1397_v12  ;;  %vm1408_vm7 = vweird.f32 %v3612_v13  ;;  %v1617_v12 = vld [vmem:[%s5200_s9 + $0x18] sm:$0xff] }
 0x624   :  { %vm1409_vm9 = vmor %vm1407_vm8, %vm1408_vm7  ;;  %1642 = vmatpush.msrb.mxu3 %v1617_v12 }
 0x625   :  { %v1403_v18 = vmul.f32 %v3612_v13, %v1402_v17  ;;  %v1615_v17 = vld [vmem:[%s5200_s9 + $0x8] sm:$0xff] }
 0x627   :  { %v1404_v24 = vmul.f32 0.5, %v1403_v18  ;;  %v1614_v18 = vld [vmem:[%s5200_s9] sm:$0xff] }
 0x629   :  { %v1405_v61 = vsub.f32 1.5, %v1404_v24 }
 0x62b   :  { %v1406_v0 = vmul.f32 %v3612_v13, %v1405_v61 }
 0x62d   :  { %v1410_v33 = vsel %vm1409_vm9, %v3612_v13, %v1406_v0  ;;  %v1616_v13 = vld [vmem:[%s5200_s9 + $0x10] sm:$0xff] }
 0x62e   :  { %v1441_v26 = vmul.f32 %v1410_v33, %v4384_v21  ;;  %1643 = vmatpush.msrb.mxu3 %v1616_v13 }
 0x630   :  { %v1448_v1 = vmul.f32 %v3533_v23, %v1441_v26  ;;  %1644 = vmatpush.msrb.mxu3 %v1615_v17 }
 0x632   :  { %3314 = vmatmul.msk.f32.vlgmr.msra.gmra.mxu1 %vm80_vm0, %v1448_v1  ;;  %3318 = vmatmul.msk.f32.vlgmr.msrb.gmra.mxu2 %vm80_vm0, %v1448_v1 }
 0x633   :  { %1645 = vmatpush.msrb.mxu3 %v1614_v18 }
 0x646   :  { %v1386_v62 = vpop.xlane.xlu1 %1385 }
 0x647   :  { %v1394_v34 = vmul.f32 %v1386_v62, %v3912_v50 }
 0x649   :  { %v1398_v28 = vadd.f32 1.1920929e-07, %v1394_v34 }
 0x64b   :  { %3613 = vrsqrt.f32 %v1398_v28  ;;  %vm1417_vm11 = vweird.f32 %v1398_v28 }
 0x651   :  { %v3614_v35 = vpop.eup %3613 }
 0x652   :  { %v1412_v36 = vmul.f32 %v3614_v35, %v1398_v28  ;;  %vm1418_vm10 = vweird.f32 %v3614_v35 }
 0x653   :  { %vm1419_vm12 = vmor %vm1417_vm11, %vm1418_vm10 }
 0x654   :  { %v1413_v31 = vmul.f32 %v3614_v35, %v1412_v36 }
 0x656   :  { %v1414_v39 = vmul.f32 0.5, %v1413_v31 }
 0x658   :  { %v1415_v29 = vsub.f32 1.5, %v1414_v39 }
 0x65a   :  { %v1416_v9 = vmul.f32 %v3614_v35, %v1415_v29 }
 0x65c   :  { %v1420_v7 = vsel %vm1419_vm12, %v3614_v35, %v1416_v9 }
 0x65d   :  { %v1442_v5 = vmul.f32 %v1420_v7, %v4390_v44 }
 0x65f   :  { %v1449_v45 = vmul.f32 %v3533_v23, %v1442_v5 }
 0x661   :  { %3315 = vmatmul.msk.f32.gmra.mxu1 %vm80_vm0, %v1449_v45  ;;  %3319 = vmatmul.msk.f32.gmra.mxu2 %vm80_vm0, %v1449_v45 }
 0x66c   :  { %v1389_v46 = vpop.xlane.xlu2 %1388 }
 0x66d   :  { %v1395_v56 = vmul.f32 %v1389_v46, %v3912_v50 }
 0x66f   :  { %v1399_v19 = vadd.f32 1.1920929e-07, %v1395_v56 }
 0x671   :  { %3615 = vrsqrt.f32 %v1399_v19  ;;  %vm1427_vm14 = vweird.f32 %v1399_v19 }
 0x674   :  { %v1392_v49 = vpop.xlane.xlu0 %1391 }
 0x675   :  { %v1396_v4 = vmul.f32 %v1392_v49, %v3912_v50 }
 0x677   :  { %v3616_v16 = vpop.eup %3615  ;;  %v1400_v54 = vadd.f32 1.1920929e-07, %v1396_v4 }
 0x678   :  { %v1422_v20 = vmul.f32 %v3616_v16, %v1399_v19  ;;  %vm1428_vm13 = vweird.f32 %v3616_v16 }
 0x679   :  { %3617 = vrsqrt.f32 %v1400_v54  ;;  %vm1429_vm15 = vmor %vm1427_vm14, %vm1428_vm13  ;;  %vm1437_vm7 = vweird.f32 %v1400_v54 }
 0x67a   :  { %v1423_v51 = vmul.f32 %v3616_v16, %v1422_v20 }
 0x67c   :  { %v1424_v55 = vmul.f32 0.5, %v1423_v51 }
 0x67e   :  { %v1425_v42 = vsub.f32 1.5, %v1424_v55 }
 0x67f   :  { %v3618_v43 = vpop.eup %3617 }
 0x680   :  { %v1426_v30 = vmul.f32 %v3616_v16, %v1425_v42  ;;  %v1432_v14 = vmul.f32 %v3618_v43, %v1400_v54  ;;  %vm1438_vm1 = vweird.f32 %v3618_v43 }
 0x681   :  { %vm1439_vm8 = vmor %vm1437_vm7, %vm1438_vm1 }
 0x682   :  { %v1433_v57 = vmul.f32 %v3618_v43, %v1432_v14  ;;  %v1430_v58 = vsel %vm1429_vm15, %v3616_v16, %v1426_v30 }
 0x683   :  { %v1443_v38 = vmul.f32 %v1430_v58, %v4396_v22 }
 0x684   :  { %v1434_v60 = vmul.f32 0.5, %v1433_v57 }
 0x685   :  { %v1450_v63 = vmul.f32 %v3533_v23, %v1443_v38 }
 0x686   :  { %v1435_v2 = vsub.f32 1.5, %v1434_v60 }
 0x687   :  { %3316 = vmatmul.msk.f32.gmra.mxu1 %vm80_vm0, %v1450_v63  ;;  %3320 = vmatmul.msk.f32.gmra.mxu2 %vm80_vm0, %v1450_v63 }
 0x688   :  { %v1436_v25 = vmul.f32 %v3618_v43, %v1435_v2 }
 0x68a   :  { %v1440_v3 = vsel %vm1439_vm8, %v3618_v43, %v1436_v25 }
 0x68b   :  { %v1444_v52 = vmul.f32 %v1440_v3, %v4402_v27 }
 0x68d   :  { %v1451_v15 = vmul.f32 %v3533_v23, %v1444_v52 }
 0x68f   :  { %3317 = vmatmul.msk.f32.gmra.mxu1 %vm80_vm0, %v1451_v15  ;;  %3321 = vmatmul.msk.f32.gmra.mxu2 %vm80_vm0, %v1451_v15 }
 0x6af   :  { %v1489_v24 = vpop.f32.mrf.mxu1 }
 0x6b0   :  { %v3322_v61 = vmul.f32 -1.442695, %v1489_v24 }
 0x6b2   :  { %3619 = vpow2.f32 %v3322_v61 }
 0x6b5   :  { %v1518_v9 = vpop.f32.mrf.mxu2 }
 0x6b8   :  { %v3620_v0 = vpop.eup %3619 }
 0x6b9   :  { %v1542_v23 = vadd.f32 1.0, %v3620_v0 }
 0x6bb   :  { %3621 = vrcp.f32 %v1542_v23  ;;  %v1557_v62 = vand.u32 2147483648, %v1542_v23  ;;  %v1555_v28 = vand.u32 2147483647, %v1542_v23  ;;  %vm1551_vm10 = vweird.f32 %v1542_v23 }
 0x6bd   :  { %v1558_v36 = vor.u32 1.1754944e-38, %v1557_v62  ;;  %vm1556_vm12 = vcmp.eq.f32.partialorder %v1555_v28, 8.507059e+37 }
 0x6c1   :  { %v3622_v33 = vpop.eup %3621 }
 0x6c2   :  { %v1547_v26 = vmul.f32 %v3622_v33, %v1542_v23  ;;  %vm1552_vm9 = vweird.f32 %v3622_v33 }
 0x6c3   :  { %vm1553_vm11 = vmor %vm1551_vm10, %vm1552_vm9 }
 0x6c4   :  { %v1548_v1 = vsub.f32 1.0, %v1547_v26 }
 0x6c6   :  { %v1549_v34 = vmul.f32 %v3622_v33, %v1548_v1 }
 0x6c8   :  { %v1550_v35 = vadd.f32 %v3622_v33, %v1549_v34 }
 0x6ca   :  { %v1554_v31 = vsel %vm1553_vm11, %v3622_v33, %v1550_v35 }
 0x6cb   :  { %v1559_v39 = vsel %vm1556_vm12, %v1558_v36, %v1554_v31 }
 0x6cc   :  { %v1606_v29 = vmul.f32 %v1559_v39, %v1489_v24 }
 0x6ce   :  { %v1610_v7 = vmul.f32 %v1606_v29, %v1518_v9 }
 0x6d0   :  { %1646 = vmatmul.f32.vlgmr.msrb.gmra.mxu3 %v1610_v7 }
 0x6de   :  { %v1492_v5 = vpop.f32.mrf.mxu1 }
 0x6df   :  { %v3323_v45 = vmul.f32 -1.442695, %v1492_v5 }
 0x6e1   :  { %3623 = vpow2.f32 %v3323_v45 }
 0x6e4   :  { %v1521_v14 = vpop.f32.mrf.mxu2 }
 0x6e7   :  { %v3624_v46 = vpop.eup %3623 }
 0x6e8   :  { %v1543_v56 = vadd.f32 1.0, %v3624_v46 }
 0x6ea   :  { %3625 = vrcp.f32 %v1543_v56  ;;  %v1572_v16 = vand.u32 2147483648, %v1543_v56  ;;  %v1570_v20 = vand.u32 2147483647, %v1543_v56  ;;  %vm1566_vm14 = vweird.f32 %v1543_v56 }
 0x6ec   :  { %v1573_v55 = vor.u32 1.1754944e-38, %v1572_v16  ;;  %vm1571_vm1 = vcmp.eq.f32.partialorder %v1570_v20, 8.507059e+37  ;;  %v3327_v16 = vld [vmem:[%s5196_s5 + $0x20] sm:$0xff] }
 0x6f0   :  { %v3626_v19 = vpop.eup %3625 }
 0x6f1   :  { %v1562_v49 = vmul.f32 %v3626_v19, %v1543_v56  ;;  %vm1567_vm13 = vweird.f32 %v3626_v19 }
 0x6f2   :  { %vm1568_vm15 = vmor %vm1566_vm14, %vm1567_vm13 }
 0x6f3   :  { %v1563_v4 = vsub.f32 1.0, %v1562_v49 }
 0x6f5   :  { %v1564_v54 = vmul.f32 %v3626_v19, %v1563_v4  ;;  %v3329_v4 = vld [vmem:[%s5196_s5 + $0x30] sm:$0xff] }
 0x6f7   :  { %v1565_v51 = vadd.f32 %v3626_v19, %v1564_v54 }
 0x6f9   :  { %v1569_v42 = vsel %vm1568_vm15, %v3626_v19, %v1565_v51 }
 0x6fa   :  { %v1574_v43 = vsel %vm1571_vm1, %v1573_v55, %v1569_v42 }
 0x6fb   :  { %v1607_v30 = vmul.f32 %v1574_v43, %v1492_v5 }
 0x6fd   :  { %v1611_v57 = vmul.f32 %v1607_v30, %v1521_v14 }
 0x6ff   :  { %1649 = vmatmul.f32.gmra.mxu3 %v1611_v57 }
 0x704   :  { %v1495_v58 = vpop.f32.mrf.mxu1 }
 0x705   :  { %v3324_v38 = vmul.f32 -1.442695, %v1495_v58 }
 0x707   :  { %3627 = vpow2.f32 %v3324_v38 }
 0x70a   :  { %v1524_v40 = vpop.f32.mrf.mxu2 }
 0x70c   :  { %v1498_v60 = vpop.f32.mrf.mxu1 }
 0x70d   :  { %v3628_v63 = vpop.eup %3627  ;;  %v3325_v2 = vmul.f32 -1.442695, %v1498_v60 }
 0x70e   :  { %v1544_v25 = vadd.f32 1.0, %v3628_v63 }
 0x70f   :  { %3629 = vpow2.f32 %v3325_v2 }
 0x710   :  { %3631 = vrcp.f32 %v1544_v25  ;;  %v1587_v32 = vand.u32 2147483648, %v1544_v25  ;;  %v1585_v37 = vand.u32 2147483647, %v1544_v25  ;;  %vm1581_vm8 = vweird.f32 %v1544_v25 }
 0x712   :  { %v1588_v53 = vor.u32 1.1754944e-38, %v1587_v32  ;;  %vm1586_vm10 = vcmp.eq.f32.partialorder %v1585_v37, 8.507059e+37  ;;  %v1527_v62 = vpop.f32.mrf.mxu2 }
 0x715   :  { %v3630_v3 = vpop.eup %3629 }
 0x716   :  { %v3632_v52 = vpop.eup %3631  ;;  %v1545_v15 = vadd.f32 1.0, %v3630_v3 }
 0x717   :  { %v1577_v48 = vmul.f32 %v3632_v52, %v1544_v25  ;;  %vm1582_vm7 = vweird.f32 %v3632_v52 }
 0x718   :  { %3633 = vrcp.f32 %v1545_v15  ;;  %vm1583_vm9 = vmor %vm1581_vm8, %vm1582_vm7  ;;  %v1602_v17 = vand.u32 2147483648, %v1545_v15  ;;  %v1600_v61 = vand.u32 2147483647, %v1545_v15  ;;  %vm1596_vm12 = vweird.f32 %v1545_v15 }
 0x719   :  { %v1578_v8 = vsub.f32 1.0, %v1577_v48 }
 0x71a   :  { %v1603_v23 = vor.u32 1.1754944e-38, %v1602_v17  ;;  %vm1601_vm14 = vcmp.eq.f32.partialorder %v1600_v61, 8.507059e+37 }
 0x71b   :  { %v1579_v59 = vmul.f32 %v3632_v52, %v1578_v8 }
 0x71d   :  { %v1580_v10 = vadd.f32 %v3632_v52, %v1579_v59 }
 0x71e   :  { %v3634_v11 = vpop.eup %3633 }
 0x71f   :  { %v1584_v47 = vsel %vm1583_vm9, %v3632_v52, %v1580_v10  ;;  %v1592_v6 = vmul.f32 %v3634_v11, %v1545_v15  ;;  %vm1597_vm11 = vweird.f32 %v3634_v11 }
 0x720   :  { %v1589_v41 = vsel %vm1586_vm10, %v1588_v53, %v1584_v47  ;;  %vm1598_vm13 = vmor %vm1596_vm12, %vm1597_vm11 }
 0x721   :  { %v1608_v12 = vmul.f32 %v1589_v41, %v1495_v58  ;;  %v1593_v13 = vsub.f32 1.0, %v1592_v6  ;;  %v3534_v58 = vld [vmem:[%s5195_s4 + $0x1] ss:$0 sm:$0xff] }
 0x723   :  { %v1612_v18 = vmul.f32 %v1608_v12, %v1524_v40  ;;  %v1594_v24 = vmul.f32 %v3634_v11, %v1593_v13 }
 0x725   :  { %v1595_v0 = vadd.f32 %v3634_v11, %v1594_v24  ;;  %1652 = vmatmul.f32.gmra.mxu3 %v1612_v18 }
 0x727   :  { %v1599_v33 = vsel %vm1598_vm13, %v3634_v11, %v1595_v0 }
 0x728   :  { %v1604_v26 = vsel %vm1601_vm14, %v1603_v23, %v1599_v33 }
 0x729   :  { %v1609_v1 = vmul.f32 %v1604_v26, %v1498_v60 }
 0x72b   :  { %v1613_v34 = vmul.f32 %v1609_v1, %v1527_v62 }
 0x72d   :  { %1655 = vmatmul.f32.gmra.mxu3 %v1613_v34 }
 0x753   :  { %v1647_v28 = vpop.f32.mrf.mxu3 }
 0x754   :  { %v4499_v35 = vadd.f32 %v1647_v28, %v4384_v21 }
 0x756   :  { %v1665_v36 = vmul.f32 %v4499_v35, %v4499_v35 }
 0x758   :  { %v1669_v31 = vsel %vm80_vm0, %v1665_v36, 0.0 }
 0x759   :  { %1670 = vadd.xlane.f32.xlu1 %v1669_v31 }
 0x782   :  { %v1650_v39 = vpop.f32.mrf.mxu3 }
 0x783   :  { %v4505_v29 = vadd.f32 %v1650_v39, %v4390_v44 }
 0x785   :  { %v1666_v9 = vmul.f32 %v4505_v29, %v4505_v29 }
 0x787   :  { %v1672_v7 = vsel %vm80_vm0, %v1666_v9, 0.0 }
 0x788   :  { %1673 = vadd.xlane.f32.xlu2 %v1672_v7 }
 0x7a8   :  { %v1653_v5 = vpop.f32.mrf.mxu3 }
 0x7a9   :  { %v4511_v21 = vadd.f32 %v1653_v5, %v4396_v22  ;;  %v3330_v22 = vld [vmem:[%s5196_s5 + $0x38] sm:$0xff] }
 0x7aa   :  { %1769 = vmatpush.msra.mxu0 %v3330_v22 }
 0x7ab   :  { %v1667_v45 = vmul.f32 %v4511_v21, %v4511_v21 }
 0x7ac   :  { %1770 = vmatpush.msra.mxu0 %v3329_v4 }
 0x7ad   :  { %v1675_v46 = vsel %vm80_vm0, %v1667_v45, 0.0 }
 0x7ae   :  { %1676 = vadd.xlane.f32.xlu0 %v1675_v46 }
 0x7b0   :  { %v1656_v56 = vpop.f32.mrf.mxu3 }
 0x7b1   :  { %v4517_v44 = vadd.f32 %v1656_v56, %v4402_v27  ;;  %v3328_v27 = vld [vmem:[%s5196_s5 + $0x28] sm:$0xff] }
 0x7b2   :  { %1771 = vmatpush.msra.mxu0 %v3328_v27 }
 0x7b3   :  { %v1668_v19 = vmul.f32 %v4517_v44, %v4517_v44 }
 0x7b4   :  { %1772 = vmatpush.msra.mxu0 %v3327_v16 }
 0x7b5   :  { %v1678_v49 = vsel %vm80_vm0, %v1668_v19, 0.0 }
 0x7b6   :  { %1679 = vadd.xlane.f32.xlu1 %v1678_v49 }
 0x7cc   :  { %v1671_v54 = vpop.xlane.xlu1 %1670 }
 0x7cd   :  { %v1681_v20 = vmul.f32 %v1671_v54, %v3912_v50 }
 0x7cf   :  { %v1685_v51 = vadd.f32 1.1920929e-07, %v1681_v20 }
 0x7d1   :  { %3635 = vrsqrt.f32 %v1685_v51  ;;  %vm1695_vm1 = vweird.f32 %v1685_v51 }
 0x7d7   :  { %v3636_v55 = vpop.eup %3635 }
 0x7d8   :  { %v1690_v42 = vmul.f32 %v3636_v55, %v1685_v51  ;;  %vm1696_vm15 = vweird.f32 %v3636_v55 }
 0x7d9   :  { %vm1697_vm7 = vmor %vm1695_vm1, %vm1696_vm15 }
 0x7da   :  { %v1691_v43 = vmul.f32 %v3636_v55, %v1690_v42 }
 0x7dc   :  { %v1692_v30 = vmul.f32 0.5, %v1691_v43 }
 0x7de   :  { %v1693_v14 = vsub.f32 1.5, %v1692_v30 }
 0x7e0   :  { %v1694_v57 = vmul.f32 %v3636_v55, %v1693_v14 }
 0x7e2   :  { %v1698_v38 = vsel %vm1697_vm7, %v3636_v55, %v1694_v57 }
 0x7e3   :  { %v1729_v60 = vmul.f32 %v1698_v38, %v4499_v35 }
 0x7e5   :  { %v1736_v63 = vmul.f32 %v3534_v58, %v1729_v60 }
 0x7e7   :  { %3331 = vmatmul.msk.f32.vlgmr.msra.gmra.mxu0 %vm80_vm0, %v1736_v63 }
 0x7fb   :  { %v1674_v2 = vpop.xlane.xlu2 %1673 }
 0x7fc   :  { %v1682_v25 = vmul.f32 %v1674_v2, %v3912_v50 }
 0x7fe   :  { %v1686_v3 = vadd.f32 1.1920929e-07, %v1682_v25 }
 0x800   :  { %3637 = vrsqrt.f32 %v1686_v3  ;;  %vm1705_vm9 = vweird.f32 %v1686_v3 }
 0x806   :  { %v3638_v52 = vpop.eup %3637 }
 0x807   :  { %v1700_v15 = vmul.f32 %v3638_v52, %v1686_v3  ;;  %vm1706_vm8 = vweird.f32 %v3638_v52 }
 0x808   :  { %vm1707_vm10 = vmor %vm1705_vm9, %vm1706_vm8 }
 0x809   :  { %v1701_v48 = vmul.f32 %v3638_v52, %v1700_v15 }
 0x80b   :  { %v1702_v8 = vmul.f32 0.5, %v1701_v48 }
 0x80d   :  { %v1703_v32 = vsub.f32 1.5, %v1702_v8 }
 0x80f   :  { %v1704_v59 = vmul.f32 %v3638_v52, %v1703_v32 }
 0x811   :  { %v1708_v37 = vsel %vm1707_vm10, %v3638_v52, %v1704_v59 }
 0x812   :  { %v1730_v10 = vmul.f32 %v1708_v37, %v4505_v29 }
 0x814   :  { %v1737_v11 = vmul.f32 %v3534_v58, %v1730_v10 }
 0x816   :  { %3332 = vmatmul.msk.f32.gmra.mxu0 %vm80_vm0, %v1737_v11 }
 0x821   :  { %v1677_v53 = vpop.xlane.xlu0 %1676 }
 0x822   :  { %v1683_v47 = vmul.f32 %v1677_v53, %v3912_v50 }
 0x824   :  { %v1687_v6 = vadd.f32 1.1920929e-07, %v1683_v47 }
 0x826   :  { %3639 = vrsqrt.f32 %v1687_v6  ;;  %vm1715_vm12 = vweird.f32 %v1687_v6 }
 0x829   :  { %v1680_v41 = vpop.xlane.xlu1 %1679 }
 0x82a   :  { %v1684_v40 = vmul.f32 %v1680_v41, %v3912_v50 }
 0x82c   :  { %v3640_v12 = vpop.eup %3639  ;;  %v1688_v13 = vadd.f32 1.1920929e-07, %v1684_v40 }
 0x82d   :  { %v1710_v17 = vmul.f32 %v3640_v12, %v1687_v6  ;;  %vm1716_vm11 = vweird.f32 %v3640_v12 }
 0x82e   :  { %3641 = vrsqrt.f32 %v1688_v13  ;;  %vm1717_vm13 = vmor %vm1715_vm12, %vm1716_vm11  ;;  %vm1725_vm15 = vweird.f32 %v1688_v13 }
 0x82f   :  { %v1711_v18 = vmul.f32 %v3640_v12, %v1710_v17  ;;  %v2096_v17 = vld [vmem:[%s5193_s2 + $0x10] sm:$0xff] }
 0x831   :  { %v1712_v24 = vmul.f32 0.5, %v1711_v18 }
 0x833   :  { %v1713_v61 = vsub.f32 1.5, %v1712_v24  ;;  %v2094_v24 = vld [vmem:[%s5193_s2] sm:$0xff] }
 0x834   :  { %v3642_v0 = vpop.eup %3641 }
 0x835   :  { %v1714_v23 = vmul.f32 %v3640_v12, %v1713_v61  ;;  %v1720_v33 = vmul.f32 %v3642_v0, %v1688_v13  ;;  %vm1726_vm14 = vweird.f32 %v3642_v0 }
 0x836   :  { %vm1727_vm1 = vmor %vm1725_vm15, %vm1726_vm14 }
 0x837   :  { %v1721_v26 = vmul.f32 %v3642_v0, %v1720_v33  ;;  %v1718_v1 = vsel %vm1717_vm13, %v3640_v12, %v1714_v23 }
 0x838   :  { %v1731_v62 = vmul.f32 %v1718_v1, %v4511_v21  ;;  %v2095_v1 = vld [vmem:[%s5193_s2 + $0x8] sm:$0xff] }
 0x839   :  { %v1722_v34 = vmul.f32 0.5, %v1721_v26 }
 0x83a   :  { %v1738_v28 = vmul.f32 %v3534_v58, %v1731_v62 }
 0x83b   :  { %v1723_v36 = vsub.f32 1.5, %v1722_v34 }
 0x83c   :  { %3333 = vmatmul.msk.f32.gmra.mxu0 %vm80_vm0, %v1738_v28 }
 0x83d   :  { %v1724_v31 = vmul.f32 %v3642_v0, %v1723_v36  ;;  %v2097_v36 = vld [vmem:[%s5193_s2 + $0x18] sm:$0xff] }
 0x83f   :  { %v1728_v39 = vsel %vm1727_vm1, %v3642_v0, %v1724_v31 }
 0x840   :  { %v1732_v9 = vmul.f32 %v1728_v39, %v4517_v44 }
 0x842   :  { %v1739_v7 = vmul.f32 %v3534_v58, %v1732_v9 }
 0x844   :  { %3334 = vmatmul.msk.f32.gmra.mxu0 %vm80_vm0, %v1739_v7 }
 0x864   :  { %v1774_v5 = vpop.f32.mrf.mxu0 }
 0x865   :  { %1827 = vrot.lane.b32.xlu0 %v1774_v5, %s3761_s17  ;;  %1823 = vrot.lane.b32.xlu1 %v1774_v5, %s3763_s0 }
 0x86d   :  { %1788 = vrot.lane.b32.xlu0 %v1774_v5, %s3760_s16  ;;  %1901 = vrot.lane.b32.xlu1 %v1774_v5, %s3764_s3 }
 0x875   :  { %1905 = vrot.lane.b32.xlu0 %v1774_v5, %s3766_s20 }
 0x87d   :  { %1866 = vrot.lane.b32.xlu0 %v1774_v5, %s3762_s18 }
 0x885   :  { %1862 = vrot.lane.b32.xlu0 %v1774_v5, %s3765_s19 }
 0x893   :  { %v1777_v45 = vpop.f32.mrf.mxu0 }
 0x894   :  { %1829 = vrot.lane.b32.xlu2 %v1777_v45, %s3761_s17  ;;  %1864 = vrot.lane.b32.xlu0 %v1777_v45, %s3765_s19  ;;  %v4585_v19 = vpack.i.bf16 %v1774_v5, %v1777_v45 }
 0x895   :  { %1825 = vrot.lane.b32.xlu1 %v1777_v45, %s3763_s0 }
 0x89c   :  { %1790 = vrot.lane.b32.xlu2 %v1777_v45, %s3760_s16 }
 0x89d   :  { %1903 = vrot.lane.b32.xlu1 %v1777_v45, %s3764_s3 }
 0x8a4   :  { %1907 = vrot.lane.b32.xlu2 %v1777_v45, %s3766_s20 }
 0x8ac   :  { %1868 = vrot.lane.b32.xlu2 %v1777_v45, %s3762_s18 }
 0x8b9   :  { %v4563_v46 = vpop.f32.mrf.mxu0 }
 0x8ba   :  { %1981 = vrot.lane.b32.xlu0 %v4563_v46, %s3761_s17  ;;  %2055 = vrot.lane.b32.xlu2 %v4563_v46, %s3764_s3 }
 0x8bb   :  { %2059 = vrot.lane.b32.xlu1 %v4563_v46, %s3766_s20 }
 0x8c1   :  { %v4571_v56 = vpop.f32.mrf.mxu0 }
 0x8c2   :  { %1977 = vrot.lane.b32.xlu0 %v4563_v46, %s3763_s0  ;;  %2061 = vrot.lane.b32.xlu2 %v4571_v56, %s3766_s20 }
 0x8c3   :  { %2020 = vrot.lane.b32.xlu1 %v4563_v46, %s3762_s18 }
 0x8ca   :  { %2018 = vrot.lane.b32.xlu0 %v4571_v56, %s3765_s19  ;;  %2022 = vrot.lane.b32.xlu2 %v4571_v56, %s3762_s18 }
 0x8cb   :  { %1983 = vrot.lane.b32.xlu1 %v4571_v56, %s3761_s17 }
 0x8d2   :  { %3498 = vrot.lane.b32.xlu0 %v4585_v19, %s3767_s21  ;;  %2057 = vrot.lane.b32.xlu2 %v4571_v56, %s3764_s3 }
 0x8d3   :  { %2016 = vrot.lane.b32.xlu1 %v4563_v46, %s3765_s19  ;;  %s3241_s19 = sshll.u32 %s5203_s12, 4  ;;  %s3242_s19 = int_to_ptr.hbm [resolvable:$true] %s3241_s19 }
 0x8d7   :  { %v1828_v49 = vpop.permute.xlu0 %1827  ;;  %v1824_v27 = vpop.permute.xlu1 %1823 }
 0x8da   :  { %1979 = vrot.lane.b32.xlu2 %v4571_v56, %s3763_s0 }
 0x8db   :  { %1944 = vrot.lane.b32.xlu1 %v4571_v56, %s3760_s16 }
 0x8df   :  { %v1789_v4 = vpop.permute.xlu0 %1788  ;;  %v1902_v51 = vpop.permute.xlu1 %1901 }
 0x8e2   :  { %1942 = vrot.lane.b32.xlu2 %v4563_v46, %s3760_s16 }
 0x8e3   :  { %3493 = vrot.lane.b32.xlu1 %v4585_v19, %s3768_s22 }
 0x8e7   :  { %v1906_v54 = vpop.permute.xlu0 %1905 }
 0x8ea   :  { %3503 = vrot.lane.b32.xlu2 %v4585_v19, %s3769_s23 }
 0x8ee   :  { %v1830_v22 = vpop.permute.xlu2 %1829 }
 0x8ef   :  { %3339 = vmatpush.xpose.msk.msra.mxu2 %vm256_vm3, %v1830_v22  ;;  %v1867_v55 = vpop.permute.xlu0 %1866 }
 0x8f3   :  { %3340 = vmatpush.xpose.msk.msra.mxu2 %vm256_vm3, %v1828_v49 }
 0x8f6   :  { %v1791_v16 = vpop.permute.xlu2 %1790  ;;  %3341 = vmatmul.msk.f32.vlgmr.msra.gmra.mxu2 %vm256_vm3, %v1824_v27 }
 0x8f7   :  { %3335 = vmatpush.xpose.msk.msrb.mxu1 %vm256_vm3, %v1791_v16  ;;  %v1863_v30 = vpop.permute.xlu0 %1862 }
 0x8fb   :  { %3336 = vmatpush.xpose.msk.msrb.mxu1 %vm256_vm3, %v1789_v4 }
 0x8fe   :  { %v1908_v20 = vpop.permute.xlu2 %1907  ;;  %3337 = vmatmul.msk.f32.vlgmr.msrb.gmra.mxu1 %vm256_vm3, %v1774_v5  ;;  %v2098_v5 = vld [vmem:[%s5193_s2 + $0x20] sm:$0xff] }
 0x8ff   :  { %3347 = vmatpush.xpose.msk.msrb.mxu2 %vm256_vm3, %v1908_v20 }
 0x903   :  { %3348 = vmatpush.xpose.msk.msrb.mxu2 %vm256_vm3, %v1906_v54  ;;  %v2101_v54 = vld [vmem:[%s5193_s2 + $0x38] sm:$0xff] }
 0x906   :  { %v1869_v42 = vpop.permute.xlu2 %1868  ;;  %3338 = vmatmul.msk.f32.gmra.mxu1 %vm256_vm3, %v1777_v45  ;;  %v1865_v57 = vpop.permute.xlu0 %1864  ;;  %v2100_v45 = vld [vmem:[%s5193_s2 + $0x30] sm:$0xff] }
 0x907   :  { %v1826_v43 = vpop.permute.xlu1 %1825  ;;  %3343 = vmatpush.xpose.msk.msra.mxu1 %vm256_vm3, %v1869_v42  ;;  %v2104_v42 = vld [vmem:[%s5193_s2 + $0x50] sm:$0xff] }
 0x908   :  { %3342 = vmatmul.msk.f32.gmra.mxu2 %vm256_vm3, %v1826_v43 }
 0x90b   :  { %3344 = vmatpush.xpose.msk.msra.mxu1 %vm256_vm3, %v1867_v55 }
 0x90e   :  { %3345 = vmatmul.msk.f32.vlgmr.msra.gmra.mxu1 %vm256_vm3, %v1863_v30 }
 0x90f   :  { %v1904_v58 = vpop.permute.xlu1 %1903 }
 0x910   :  { %3349 = vmatmul.msk.f32.vlgmr.msrb.gmra.mxu2 %vm256_vm3, %v1902_v51 }
 0x914   :  { %v2056_v14 = vpop.permute.xlu2 %2055 }
 0x916   :  { %3346 = vmatmul.msk.f32.gmra.mxu1 %vm256_vm3, %v1865_v57  ;;  %v2105_v57 = vld [vmem:[%s5193_s2 + $0x58] sm:$0xff] }
 0x918   :  { %3350 = vmatmul.msk.f32.gmra.mxu2 %vm256_vm3, %v1904_v58 }
 0x91c   :  { %v2062_v38 = vpop.permute.xlu2 %2061 }
 0x91d   :  { %3363 = vmatpush.xpose.msk.msra.mxu2 %vm256_vm3, %v2062_v38 }
 0x924   :  { %v2023_v60 = vpop.permute.xlu2 %2022 }
 0x925   :  { %3359 = vmatpush.xpose.msk.msrb.mxu1 %vm256_vm3, %v2023_v60 }
 0x92c   :  { %v1982_v63 = vpop.permute.xlu0 %1981  ;;  %v2058_v2 = vpop.permute.xlu2 %2057 }
 0x92d   :  { %v2060_v25 = vpop.permute.xlu1 %2059 }
 0x92e   :  { %3364 = vmatpush.xpose.msk.msra.mxu2 %vm256_vm3, %v2060_v25 }
 0x931   :  { %3365 = vmatmul.msk.f32.vlgmr.msra.gmra.mxu2 %vm256_vm3, %v2056_v14 }
 0x934   :  { %v1978_v3 = vpop.permute.xlu0 %1977  ;;  %v1980_v52 = vpop.permute.xlu2 %1979 }
 0x935   :  { %v2021_v15 = vpop.permute.xlu1 %2020 }
 0x936   :  { %3360 = vmatpush.xpose.msk.msrb.mxu1 %vm256_vm3, %v2021_v15  ;;  %v2099_v15 = vld [vmem:[%s5193_s2 + $0x28] sm:$0xff] }
 0x939   :  { %3366 = vmatmul.msk.f32.gmra.mxu2 %vm256_vm3, %v2058_v2 }
 0x93c   :  { %v2019_v48 = vpop.permute.xlu0 %2018  ;;  %v1943_v8 = vpop.permute.xlu2 %1942 }
 0x93d   :  { %v1984_v32 = vpop.permute.xlu1 %1983 }
 0x93e   :  { %3355 = vmatpush.xpose.msk.msrb.mxu0 %vm256_vm3, %v1984_v32 }
 0x942   :  { %3356 = vmatpush.xpose.msk.msrb.mxu0 %vm256_vm3, %v1982_v63  ;;  %v2102_v63 = vld [vmem:[%s5193_s2 + $0x40] sm:$0xff] }
 0x944   :  { %v3499_v59 = vpop.permute.xlu0 %3498  ;;  %v3504_v37 = vpop.permute.xlu2 %3503 }
 0x945   :  { %v3500_v10 = vunpack.i.l.bf16 %v3499_v59  ;;  %v3505_v11 = vunpack.i.l.bf16 %v3504_v37  ;;  %3357 = vmatmul.msk.f32.vlgmr.msrb.gmra.mxu0 %vm256_vm3, %v1978_v3  ;;  %v2017_v53 = vpop.permute.xlu1 %2016  ;;  %v3501_v47 = vunpack.i.h.bf16 %v3499_v59  ;;  %v3506_v6 = vunpack.i.h.bf16 %v3504_v37 }
 0x946   :  { %3361 = vmatmul.msk.f32.vlgmr.msrb.gmra.mxu1 %vm256_vm3, %v2017_v53 }
 0x947   :  { %2573 = vmatpush.msra.mxu0 %v3500_v10  ;;  %2618 = vmatpush.msra.mxu1 %v3505_v11 }
 0x949   :  { %2574 = vmatpush.msra.mxu0 %v3501_v47  ;;  %2619 = vmatpush.msra.mxu1 %v3506_v6  ;;  %v2108_v47 = vld [vmem:[%s5193_s2 + $0x70] sm:$0xff]  ;;  %v2106_v6 = vld [vmem:[%s5193_s2 + $0x60] sm:$0xff] }
 0x94d   :  { %3358 = vmatmul.msk.f32.gmra.mxu0 %vm256_vm3, %v1980_v52  ;;  %v1945_v41 = vpop.permute.xlu1 %1944 }
 0x94e   :  { %3351 = vmatpush.xpose.msk.msra.mxu3 %vm256_vm3, %v1945_v41  ;;  %3362 = vmatmul.msk.f32.gmra.mxu1 %vm256_vm3, %v2019_v48  ;;  %v2103_v48 = vld [vmem:[%s5193_s2 + $0x48] sm:$0xff] }
 0x952   :  { %3352 = vmatpush.xpose.msk.msra.mxu3 %vm256_vm3, %v1943_v8 }
 0x955   :  { %3353 = vmatmul.msk.f32.vlgmr.msra.gmra.mxu3 %vm256_vm3, %v4563_v46  ;;  %v3494_v40 = vpop.permute.xlu1 %3493 }
 0x956   :  { %v3495_v12 = vunpack.i.l.bf16 %v3494_v40  ;;  %v3496_v13 = vunpack.i.h.bf16 %v3494_v40 }
 0x958   :  { %2663 = vmatpush.msrb.mxu2 %v3495_v12 }
 0x95a   :  { %2664 = vmatpush.msrb.mxu2 %v3496_v13 }
 0x95d   :  { %3354 = vmatmul.msk.f32.gmra.mxu3 %vm256_vm3, %v4571_v56 }
 0x979   :  { %v1856_v18 = vpop.f32.mrf.mxu2 }
 0x97a   :  { %v4643_v61 = vadd.f32 %v2096_v17, %v1856_v18  ;;  %v2109_v18 = vld [vmem:[%s5193_s2 + $0x78] sm:$0xff] }
 0x97b   :  { %v1817_v0 = vpop.f32.mrf.mxu1 }
 0x97c   :  { %v4645_v23 = vadd.f32 %v2094_v24, %v1817_v0  ;;  %v2132_v33 = vsel %vm591_vm4, %v4643_v61, -inf  ;;  %v2107_v0 = vld [vmem:[%s5193_s2 + $0x68] sm:$0xff]  ;;  %s5224_s2 = smov 8  }
 0x97d   :  { %2133 = vmax.xlane.f32.xlu1 %v2132_v33 }
 0x97e   :  { %v2126_v26 = vsel %vm591_vm4, %v4645_v23, -inf }
 0x97f   :  { %2127 = vmax.xlane.f32.xlu0 %v2126_v26 }
 0x983   :  { %v1820_v62 = vpop.f32.mrf.mxu1 }
 0x984   :  { %v4654_v34 = vadd.f32 %v2095_v1, %v1820_v62 }
 0x986   :  { %v2129_v28 = vsel %vm591_vm4, %v4654_v34, -inf }
 0x987   :  { %2130 = vmax.xlane.f32.xlu2 %v2129_v28 }
 0x98b   :  { %v1859_v31 = vpop.f32.mrf.mxu2  ;;  %v1895_v7 = vpop.f32.mrf.mxu1 }
 0x98c   :  { %v4661_v39 = vadd.f32 %v2097_v36, %v1859_v31  ;;  %v4671_v49 = vadd.f32 %v2098_v5, %v1895_v7 }
 0x98e   :  { %v2135_v9 = vsel %vm591_vm4, %v4661_v39, -inf  ;;  %v2138_v16 = vsel %vm591_vm4, %v4671_v49, -inf }
 0x98f   :  { %2136 = vmax.xlane.f32.xlu2 %v2135_v9 }
 0x993   :  { %v1934_v22 = vpop.f32.mrf.mxu2  ;;  %v1898_v3 = vpop.f32.mrf.mxu1 }
 0x994   :  { %v4673_v4 = vadd.f32 %v2100_v45, %v1934_v22  ;;  %v4713_v8 = vadd.f32 %v2099_v15, %v1898_v3 }
 0x996   :  { %v2144_v27 = vsel %vm591_vm4, %v4673_v4, -inf  ;;  %v2141_v11 = vsel %vm591_vm4, %v4713_v8, -inf }
 0x997   :  { %2145 = vmax.xlane.f32.xlu0 %v2144_v27  ;;  %2139 = vmax.xlane.f32.xlu2 %v2138_v16 }
 0x99b   :  { %v1937_v20 = vpop.f32.mrf.mxu2 }
 0x99c   :  { %v4682_v51 = vadd.f32 %v2101_v54, %v1937_v20 }
 0x99e   :  { %v2147_v55 = vsel %vm591_vm4, %v4682_v51, -inf }
 0x99f   :  { %2148 = vmax.xlane.f32.xlu0 %v2147_v55 }
 0x9b4   :  { %v2088_v37 = vpop.f32.mrf.mxu2 }
 0x9b5   :  { %v4727_v41 = vadd.f32 %v2108_v47, %v2088_v37 }
 0x9b7   :  { %v2168_v13 = vsel %vm591_vm4, %v4727_v41, -inf }
 0x9bc   :  { %v2091_v17 = vpop.f32.mrf.mxu2 }
 0x9bd   :  { %v4741_v33 = vadd.f32 %v2109_v18, %v2091_v17 }
 0x9bf   :  { %v2171_v7 = vsel %vm591_vm4, %v4741_v33, -inf }
 0x9c2   :  { %v2010_v43 = vpop.f32.mrf.mxu0 }
 0x9c3   :  { %v4689_v30 = vadd.f32 %v2104_v42, %v2010_v43  ;;  %v2049_v10 = vpop.f32.mrf.mxu1 }
 0x9c4   :  { %v4729_v40 = vadd.f32 %v2106_v6, %v2049_v10 }
 0x9c5   :  { %v2156_v14 = vsel %vm591_vm4, %v4689_v30, -inf }
 0x9c6   :  { %2157 = vmax.xlane.f32.xlu2 %v2156_v14  ;;  %v2162_v12 = vsel %vm591_vm4, %v4729_v40, -inf }
 0x9ca   :  { %v2013_v58 = vpop.f32.mrf.mxu0 }
 0x9cb   :  { %v4696_v38 = vadd.f32 %v2105_v57, %v2013_v58  ;;  %v2052_v24 = vpop.f32.mrf.mxu1  ;;  %v4769_v58 = vpack.i.bf16 %v4563_v46, %v4571_v56 }
 0x9cc   :  { %v4743_v26 = vadd.f32 %v2107_v0, %v2052_v24 }
 0x9cd   :  { %v2159_v60 = vsel %vm591_vm4, %v4696_v38, -inf }
 0x9ce   :  { %2160 = vmax.xlane.f32.xlu2 %v2159_v60  ;;  %v2165_v9 = vsel %vm591_vm4, %v4743_v26, -inf }
 0x9d8   :  { %v1971_v2 = vpop.f32.mrf.mxu3 }
 0x9d9   :  { %v4703_v25 = vadd.f32 %v2102_v63, %v1971_v2 }
 0x9db   :  { %v2150_v52 = vsel %vm591_vm4, %v4703_v25, -inf }
 0x9dc   :  { %2151 = vmax.xlane.f32.xlu1 %v2150_v52 }
 0x9e0   :  { %v1974_v32 = vpop.f32.mrf.mxu3 }
 0x9e1   :  { %v4715_v59 = vadd.f32 %v2103_v48, %v1974_v32 }
 0x9e3   :  { %v2153_v53 = vsel %vm591_vm4, %v4715_v59, -inf }
 0x9e4   :  { %2142 = vmax.xlane.f32.xlu1 %v2141_v11  ;;  %2154 = vmax.xlane.f32.xlu0 %v2153_v53 }
 0x9ec   :  { %2163 = vmax.xlane.f32.xlu1 %v2162_v12  ;;  %2169 = vmax.xlane.f32.xlu0 %v2168_v13 }
 0x9f0   :  { %v2134_v1 = vpop.xlane.xlu1 %2133 }
 0x9f1   :  { %v2176_v62 = vsub.f32 %v4643_v61, %v2134_v1 }
 0x9f2   :  { %v2128_v28 = vpop.xlane.xlu0 %2127 }
 0x9f3   :  { %v2194_v36 = vmul.f32 1.442695, %v2176_v62  ;;  %v2174_v31 = vsub.f32 %v4645_v23, %v2128_v28 }
 0x9f4   :  { %2166 = vmax.xlane.f32.xlu1 %v2165_v9  ;;  %2172 = vmax.xlane.f32.xlu0 %v2171_v7 }
 0x9f5   :  { %3643 = vpow2.f32 %v2194_v36  ;;  %v2190_v5 = vmul.f32 1.442695, %v2174_v31 }
 0x9f7   :  { %3645 = vpow2.f32 %v2190_v5 }
 0x9fa   :  { %v4751_v45 = vpop.xlane.xlu2 %2130 }
 0x9fb   :  { %v4753_v22 = vpop.eup %3643 }
 0x9fc   :  { %v2228_v61 = vsel %vm591_vm4, %v4753_v22, 0.0 }
 0x9fd   :  { %v4757_v27 = vpop.eup %3645  ;;  %2229 = vadd.xlane.f32.xlu2 %v2228_v61 }
 0x9fe   :  { %v2222_v23 = vsel %vm591_vm4, %v4757_v27, 0.0 }
 0x9ff   :  { %2223 = vadd.xlane.f32.xlu0 %v2222_v23 }
 0xa02   :  { %v2137_v16 = vpop.xlane.xlu2 %2136 }
 0xa03   :  { %v2177_v54 = vsub.f32 %v4661_v39, %v2137_v16 }
 0xa05   :  { %v2196_v20 = vmul.f32 1.442695, %v2177_v54 }
 0xa07   :  { %3647 = vpow2.f32 %v2196_v20 }
 0xa0a   :  { %v2140_v55 = vpop.xlane.xlu2 %2139  ;;  %v2146_v60 = vpop.xlane.xlu0 %2145 }
 0xa0b   :  { %v2178_v42 = vsub.f32 %v4671_v49, %v2140_v55  ;;  %v2180_v15 = vsub.f32 %v4673_v4, %v2146_v60 }
 0xa0d   :  { %v4763_v43 = vpop.eup %3647  ;;  %v2198_v14 = vmul.f32 1.442695, %v2178_v42  ;;  %v2202_v37 = vmul.f32 1.442695, %v2180_v15 }
 0xa0e   :  { %v2231_v57 = vsel %vm591_vm4, %v4763_v43, 0.0 }
 0xa0f   :  { %2232 = vadd.xlane.f32.xlu1 %v2231_v57  ;;  %3649 = vpow2.f32 %v2198_v14 }
 0xa12   :  { %v2149_v63 = vpop.xlane.xlu0 %2148 }
 0xa13   :  { %v2181_v2 = vsub.f32 %v4682_v51, %v2149_v63 }
 0xa15   :  { %3518 = vrot.lane.b32.xlu2 %v4769_v58, %s3769_s23  ;;  %v4773_v39 = vpop.eup %3649  ;;  %v2204_v3 = vmul.f32 1.442695, %v2181_v2 }
 0xa16   :  { %v2234_v49 = vsel %vm591_vm4, %v4773_v39, 0.0 }
 0xa17   :  { %2235 = vadd.xlane.f32.xlu1 %v2234_v49  ;;  %3651 = vpow2.f32 %v2204_v3 }
 0xa1d   :  { %v4780_v56 = vpop.eup %3651 }
 0xa1e   :  { %v2243_v32 = vsel %vm591_vm4, %v4780_v56, 0.0 }
 0xa30   :  { %3508 = vrot.lane.b32.xlu1 %v4769_v58, %s3768_s22  ;;  %s5226_s22 = smov 24  }
 0xa39   :  { %v2158_v46 = vpop.xlane.xlu2 %2157 }
 0xa3a   :  { %v2184_v52 = vsub.f32 %v4689_v30, %v2158_v46 }
 0xa3c   :  { %v2210_v48 = vmul.f32 1.442695, %v2184_v52 }
 0xa3e   :  { %3653 = vpow2.f32 %v2210_v48  ;;  %2244 = vadd.xlane.f32.xlu2 %v2243_v32 }
 0xa3f   :  { %3655 = vpow2.f32 %v2202_v37 }
 0xa41   :  { %v2161_v6 = vpop.xlane.xlu2 %2160 }
 0xa42   :  { %v2185_v17 = vsub.f32 %v4696_v38, %v2161_v6 }
 0xa44   :  { %v4786_v51 = vpop.eup %3653  ;;  %v2212_v18 = vmul.f32 1.442695, %v2185_v17 }
 0xa45   :  { %v2252_v10 = vsel %vm591_vm4, %v4786_v51, 0.0  ;;  %v4790_v11 = vpop.eup %3655 }
 0xa46   :  { %2253 = vadd.xlane.f32.xlu0 %v2252_v10  ;;  %v2240_v30 = vsel %vm591_vm4, %v4790_v11, 0.0 }
 0xa4e   :  { %2241 = vadd.xlane.f32.xlu0 %v2240_v30 }
 0xa4f   :  { %v4794_v4 = vpop.xlane.xlu1 %2151 }
 0xa57   :  { %v4796_v53 = vpop.xlane.xlu0 %2154  ;;  %v2143_v47 = vpop.xlane.xlu1 %2142 }
 0xa58   :  { %v2179_v12 = vsub.f32 %v4713_v8, %v2143_v47 }
 0xa5a   :  { %v2200_v13 = vmul.f32 1.442695, %v2179_v12 }
 0xa5c   :  { %3657 = vpow2.f32 %v2200_v13 }
 0xa5d   :  { %3659 = vpow2.f32 %v2212_v18 }
 0xa5f   :  { %v2170_v24 = vpop.xlane.xlu0 %2169  ;;  %v2164_v0 = vpop.xlane.xlu1 %2163 }
 0xa60   :  { %v2186_v1 = vsub.f32 %v4729_v40, %v2164_v0  ;;  %v2188_v36 = vsub.f32 %v4727_v41, %v2170_v24  ;;  %v2175_v40 = vsub.f32 %v4654_v34, %v4751_v45 }
 0xa62   :  { %v2214_v62 = vmul.f32 1.442695, %v2186_v1  ;;  %v4801_v28 = vpop.eup %3657  ;;  %v2218_v8 = vmul.f32 1.442695, %v2188_v36 }
 0xa63   :  { %v2237_v31 = vsel %vm591_vm4, %v4801_v28, 0.0  ;;  %v4807_v5 = vpop.eup %3659 }
 0xa64   :  { %3661 = vpow2.f32 %v2214_v62  ;;  %2238 = vadd.xlane.f32.xlu0 %v2237_v31  ;;  %v2255_v16 = vsel %vm591_vm4, %v4807_v5, 0.0 }
 0xa65   :  { %3663 = vpow2.f32 %v2218_v8 }
 0xa67   :  { %v2173_v9 = vpop.xlane.xlu0 %2172  ;;  %v2167_v7 = vpop.xlane.xlu1 %2166 }
 0xa68   :  { %v2189_v38 = vsub.f32 %v4741_v33, %v2173_v9  ;;  %v2187_v41 = vsub.f32 %v4743_v26, %v2167_v7  ;;  %v2192_v33 = vmul.f32 1.442695, %v2175_v40 }
 0xa6a   :  { %v2220_v61 = vmul.f32 1.442695, %v2189_v38  ;;  %v4811_v23 = vpop.eup %3661  ;;  %v2216_v20 = vmul.f32 1.442695, %v2187_v41 }
 0xa6b   :  { %v2258_v54 = vsel %vm591_vm4, %v4811_v23, 0.0  ;;  %v4818_v42 = vpop.eup %3663 }
 0xa6c   :  { %3665 = vpow2.f32 %v2220_v61  ;;  %2256 = vadd.xlane.f32.xlu0 %v2255_v16  ;;  %2259 = vadd.xlane.f32.xlu2 %v2258_v54  ;;  %v2264_v45 = vsel %vm591_vm4, %v4818_v42, 0.0 }
 0xa70   :  { %v2230_v55 = vpop.xlane.xlu2 %2229 }
 0xa71   :  { %3667 = vrcp.f32 %v2230_v55  ;;  %v2309_v46 = vand.u32 2147483648, %v2230_v55  ;;  %v2307_v32 = vand.u32 2147483647, %v2230_v55  ;;  %vm2303_vm8 = vweird.f32 %v2230_v55 }
 0xa72   :  { %v4820_v34 = vpop.eup %3665  ;;  %3669 = vpow2.f32 %v2192_v33  ;;  %v2182_v33 = vsub.f32 %v4703_v25, %v4794_v4  ;;  %v2183_v4 = vsub.f32 %v4715_v59, %v4796_v53 }
 0xa73   :  { %3671 = vpow2.f32 %v2216_v20  ;;  %v2267_v26 = vsel %vm591_vm4, %v4820_v34, 0.0  ;;  %v2310_v30 = vor.u32 1.1754944e-38, %v2309_v46  ;;  %vm2308_vm10 = vcmp.eq.f32.partialorder %v2307_v32, 8.507059e+37 }
 0xa74   :  { %2268 = vadd.xlane.f32.xlu1 %v2267_v26  ;;  %2265 = vadd.xlane.f32.xlu2 %v2264_v45 }
 0xa77   :  { %v3668_v14 = vpop.eup %3667 }
 0xa78   :  { %v4826_v57 = vpop.eup %3669  ;;  %v2299_v49 = vmul.f32 %v3668_v14, %v2230_v55  ;;  %v3519_v60 = vpop.permute.xlu2 %3518  ;;  %vm2304_vm7 = vweird.f32 %v3668_v14 }
 0xa79   :  { %v4828_v63 = vpop.eup %3671  ;;  %v3520_v2 = vunpack.i.l.bf16 %v3519_v60  ;;  %v3521_v52 = vunpack.i.h.bf16 %v3519_v60  ;;  %v2225_v15 = vsel %vm591_vm4, %v4826_v57, 0.0  ;;  %vm2305_vm9 = vmor %vm2303_vm8, %vm2304_vm7 }
 0xa7a   :  { %v2300_v3 = vsub.f32 1.0, %v2299_v49  ;;  %v2261_v37 = vsel %vm591_vm4, %v4828_v63, 0.0 }
 0xa7b   :  { %2790 = vmatpush.msrb.mxu1 %v3520_v2  ;;  %v2208_v2 = vmul.f32 1.442695, %v2183_v4 }
 0xa7c   :  { %v2301_v48 = vmul.f32 %v3668_v14, %v2300_v3  ;;  %2226 = vadd.xlane.f32.xlu1 %v2225_v15  ;;  %2262 = vadd.xlane.f32.xlu2 %v2261_v37  ;;  %v4854_v3 = vpop.xlane.xlu0 %2223 }
 0xa7d   :  { %2791 = vmatpush.msrb.mxu1 %v3521_v52 }
 0xa7e   :  { %v2302_v10 = vadd.f32 %v3668_v14, %v2301_v48 }
 0xa80   :  { %v2306_v47 = vsel %vm2305_vm9, %v3668_v14, %v2302_v10  ;;  %3513 = vrot.lane.b32.xlu0 %v4769_v58, %s3767_s21  ;;  %s5225_s21 = smov 16  }
 0xa81   :  { %v2311_v6 = vsel %vm2308_vm10, %v2310_v30, %v2306_v47 }
 0xa82   :  { %v2233_v12 = vpop.xlane.xlu1 %2232  ;;  %v2496_v13 = vmul.f32 %v4753_v22, %v2311_v6 }
 0xa83   :  { %3673 = vrcp.f32 %v2233_v12  ;;  %v2323_v1 = vand.u32 2147483648, %v2233_v12  ;;  %v2321_v36 = vand.u32 2147483647, %v2233_v12  ;;  %vm2317_vm12 = vweird.f32 %v2233_v12 }
 0xa84   :  { %3369 = vmatmul.msk.f32.vlgmr.msra.gmra.mxu0 %vm591_vm4, %v2496_v13 }
 0xa85   :  { %v2324_v8 = vor.u32 1.1754944e-38, %v2323_v1  ;;  %vm2322_vm14 = vcmp.eq.f32.partialorder %v2321_v36, 8.507059e+37 }
 0xa89   :  { %v3674_v17 = vpop.eup %3673 }
 0xa8a   :  { %v2313_v18 = vmul.f32 %v3674_v17, %v2233_v12  ;;  %v2236_v24 = vpop.xlane.xlu1 %2235  ;;  %vm2318_vm11 = vweird.f32 %v3674_v17 }
 0xa8b   :  { %3675 = vrcp.f32 %v2236_v24  ;;  %vm2319_vm13 = vmor %vm2317_vm12, %vm2318_vm11  ;;  %v2337_v41 = vand.u32 2147483648, %v2236_v24  ;;  %v2335_v54 = vand.u32 2147483647, %v2236_v24  ;;  %vm2331_vm1 = vweird.f32 %v2236_v24 }
 0xa8c   :  { %v2314_v0 = vsub.f32 1.0, %v2313_v18 }
 0xa8d   :  { %vm2336_vm8 = vcmp.eq.f32.partialorder %v2335_v54, 8.507059e+37 }
 0xa8e   :  { %v2315_v62 = vmul.f32 %v3674_v17, %v2314_v0 }
 0xa90   :  { %v2316_v31 = vadd.f32 %v3674_v17, %v2315_v62 }
 0xa91   :  { %v3676_v9 = vpop.eup %3675 }
 0xa92   :  { %v2320_v38 = vsel %vm2319_vm13, %v3674_v17, %v2316_v31  ;;  %v2327_v22 = vmul.f32 %v3676_v9, %v2236_v24  ;;  %vm2332_vm15 = vweird.f32 %v3676_v9 }
 0xa93   :  { %v2325_v7 = vsel %vm2322_vm14, %v2324_v8, %v2320_v38  ;;  %vm2333_vm7 = vmor %vm2331_vm1, %vm2332_vm15 }
 0xa94   :  { %v2497_v40 = vmul.f32 %v4763_v43, %v2325_v7  ;;  %v2328_v61 = vsub.f32 1.0, %v2327_v22  ;;  %3523 = vrot.lane.b32.xlu2 %v4585_v19, %s3770_s15  ;;  %v2338_v43 = vor.u32 1.1754944e-38, %v2337_v41  ;;  %v2206_v19 = vmul.f32 1.442695, %v2182_v33 }
 0xa95   :  { %3528 = vrot.lane.b32.xlu1 %v4769_v58, %s3770_s15 }
 0xa96   :  { %3370 = vmatmul.msk.f32.gmra.mxu0 %vm591_vm4, %v2497_v40  ;;  %v2329_v16 = vmul.f32 %v3676_v9, %v2328_v61  ;;  %3677 = vpow2.f32 %v2206_v19  ;;  %v2281_v19 = vand.u32 2147483648, %v4854_v3 }
 0xa97   :  { %3679 = vpow2.f32 %v2208_v2 }
 0xa98   :  { %v2330_v20 = vadd.f32 %v3676_v9, %v2329_v16  ;;  %v2282_v2 = vor.u32 1.1754944e-38, %v2281_v19 }
 0xa9a   :  { %v2334_v55 = vsel %vm2333_vm7, %v3676_v9, %v2330_v20 }
 0xa9b   :  { %v2339_v26 = vsel %vm2336_vm8, %v2338_v43, %v2334_v55  ;;  %vm2275_vm8 = vweird.f32 %v4854_v3 }
 0xa9c   :  { %v2498_v45 = vmul.f32 %v4773_v39, %v2339_v26  ;;  %v4848_v60 = vpop.eup %3677 }
 0xa9d   :  { %v2246_v25 = vsel %vm591_vm4, %v4848_v60, 0.0  ;;  %v4858_v52 = vpop.eup %3679 }
 0xa9e   :  { %3371 = vmatmul.msk.f32.vlgmr.msra.gmra.mxu1 %vm591_vm4, %v2498_v45  ;;  %v2249_v15 = vsel %vm591_vm4, %v4858_v52, 0.0 }
 0xaa2   :  { %v3509_v58 = vpop.permute.xlu1 %3508 }
 0xaa3   :  { %v3510_v14 = vunpack.i.l.bf16 %v3509_v58  ;;  %v3511_v49 = vunpack.i.h.bf16 %v3509_v58 }
 0xaa5   :  { %2835 = vmatpush.msra.mxu2 %v3510_v14 }
 0xaa7   :  { %2836 = vmatpush.msra.mxu2 %v3511_v49 }
 0xaaa   :  { %2247 = vadd.xlane.f32.xlu0 %v2246_v25  ;;  %v2279_v25 = vand.u32 2147483647, %v4854_v3 }
 0xab1   :  { %v2245_v39 = vpop.xlane.xlu2 %2244 }
 0xab2   :  { %3681 = vrcp.f32 %v2245_v39  ;;  %v2379_v62 = vand.u32 2147483648, %v2245_v39  ;;  %vm2373_vm14 = vweird.f32 %v2245_v39  ;;  %v2377_v8 = vand.u32 2147483647, %v2245_v39 }
 0xab4   :  { %v2380_v22 = vor.u32 1.1754944e-38, %v2379_v62  ;;  %vm2378_vm1 = vcmp.eq.f32.partialorder %v2377_v8, 8.507059e+37 }
 0xab8   :  { %v3682_v32 = vpop.eup %3681 }
 0xab9   :  { %v4856_v46 = vpop.xlane.xlu0 %2253  ;;  %v2369_v37 = vmul.f32 %v3682_v32, %v2245_v39  ;;  %vm2374_vm13 = vweird.f32 %v3682_v32 }
 0xaba   :  { %vm2375_vm15 = vmor %vm2373_vm14, %vm2374_vm13  ;;  %vm2280_vm13 = vcmp.eq.f32.partialorder %v2279_v25, 8.507059e+37 }
 0xabb   :  { %v2370_v59 = vsub.f32 1.0, %v2369_v37 }
 0xabd   :  { %2250 = vadd.xlane.f32.xlu2 %v2249_v15  ;;  %v2371_v6 = vmul.f32 %v3682_v32, %v2370_v59  ;;  %v2421_v59 = vand.u32 2147483648, %v4856_v46 }
 0xabf   :  { %v2372_v0 = vadd.f32 %v3682_v32, %v2371_v6 }
 0xac1   :  { %v2242_v48 = vpop.xlane.xlu0 %2241  ;;  %v2376_v9 = vsel %vm2375_vm15, %v3682_v32, %v2372_v0  ;;  %v2422_v0 = vor.u32 1.1754944e-38, %v2421_v59 }
 0xac2   :  { %3683 = vrcp.f32 %v2242_v48  ;;  %v2365_v47 = vand.u32 2147483648, %v2242_v48  ;;  %v2363_v13 = vand.u32 2147483647, %v2242_v48  ;;  %vm2359_vm10 = vweird.f32 %v2242_v48 }
 0xac3   :  { %3685 = vrcp.f32 %v4854_v3  ;;  %v2381_v61 = vsel %vm2378_vm1, %v2380_v22, %v2376_v9 }
 0xac4   :  { %v2366_v18 = vor.u32 1.1754944e-38, %v2365_v47  ;;  %vm2364_vm12 = vcmp.eq.f32.partialorder %v2363_v13, 8.507059e+37  ;;  %3687 = vrcp.f32 %v4856_v46 }
 0xac8   :  { %v3684_v10 = vpop.eup %3683 }
 0xac9   :  { %v2355_v53 = vmul.f32 %v3684_v10, %v2242_v48  ;;  %vm2360_vm9 = vweird.f32 %v3684_v10  ;;  %v3686_v1 = vpop.eup %3685 }
 0xaca   :  { %vm2361_vm11 = vmor %vm2359_vm10, %vm2360_vm9  ;;  %v2271_v38 = vmul.f32 %v3686_v1, %v4854_v3  ;;  %v4867_v7 = vpop.eup %3687  ;;  %vm2276_vm7 = vweird.f32 %v3686_v1  ;;  %vm2415_vm10 = vweird.f32 %v4856_v46  ;;  %v2419_v3 = vand.u32 2147483647, %v4856_v46 }
 0xacb   :  { %v2356_v30 = vsub.f32 1.0, %v2355_v53  ;;  %v2411_v16 = vmul.f32 %v4867_v7, %v4856_v46  ;;  %vm4882_vm9 = vmor %vm2275_vm8, %vm2276_vm7 }
 0xacc   :  { %v2272_v41 = vsub.f32 1.0, %v2271_v38  ;;  %vm2420_vm7 = vcmp.eq.f32.partialorder %v2419_v3, 8.507059e+37 }
 0xacd   :  { %v2357_v12 = vmul.f32 %v3684_v10, %v2356_v30  ;;  %v2412_v20 = vsub.f32 1.0, %v2411_v16 }
 0xace   :  { %v2273_v54 = vmul.f32 %v3686_v1, %v2272_v41 }
 0xacf   :  { %v2358_v17 = vadd.f32 %v3684_v10, %v2357_v12 }
 0xad0   :  { %v2274_v45 = vadd.f32 %v3686_v1, %v2273_v54 }
 0xad1   :  { %v2362_v24 = vsel %vm2361_vm11, %v3684_v10, %v2358_v17  ;;  %vm2416_vm11 = vweird.f32 %v4867_v7 }
 0xad2   :  { %v2367_v36 = vsel %vm2364_vm12, %v2366_v18, %v2362_v24  ;;  %v2278_v4 = vsel %vm4882_vm9, %v3686_v1, %v2274_v45  ;;  %vm4903_vm14 = vmor %vm2415_vm10, %vm2416_vm11 }
 0xad3   :  { %v2500_v31 = vmul.f32 %v4790_v11, %v2367_v36  ;;  %v2501_v11 = vmul.f32 %v4780_v56, %v2381_v61  ;;  %v2413_v56 = vmul.f32 %v4867_v7, %v2412_v20  ;;  %v2283_v12 = vsel %vm2280_vm13, %v2282_v2, %v2278_v4 }
 0xad5   :  { %3373 = vmatmul.msk.f32.vlgmr.msrb.gmra.mxu2 %vm591_vm4, %v2500_v31  ;;  %v2414_v15 = vadd.f32 %v4867_v7, %v2413_v56 }
 0xad7   :  { %v2239_v40 = vpop.xlane.xlu0 %2238  ;;  %v2418_v17 = vsel %vm4903_vm14, %v4867_v7, %v2414_v15  ;;  %v4920_v7 = vmul.f32 %v4757_v27, %v2283_v12 }
 0xad8   :  { %3689 = vrcp.f32 %v2239_v40  ;;  %v2351_v48 = vand.u32 2147483648, %v2239_v40  ;;  %v2349_v30 = vand.u32 2147483647, %v2239_v40  ;;  %vm2345_vm15 = vweird.f32 %v2239_v40 }
 0xad9   :  { %v2423_v9 = vsel %vm2420_vm7, %v2422_v0, %v2418_v17 }
 0xada   :  { %v2352_v18 = vor.u32 1.1754944e-38, %v2351_v48  ;;  %vm2350_vm8 = vcmp.eq.f32.partialorder %v2349_v30, 8.507059e+37 }
 0xadd   :  { %3374 = vmatmul.msk.f32.gmra.mxu2 %vm591_vm4, %v2501_v11 }
 0xade   :  { %v3690_v33 = vpop.eup %3689 }
 0xadf   :  { %v2341_v43 = vmul.f32 %v3690_v33, %v2239_v40  ;;  %v4873_v55 = vpop.xlane.xlu0 %2256  ;;  %v4875_v26 = vpop.xlane.xlu2 %2259  ;;  %vm2346_vm12 = vweird.f32 %v3690_v33 }
 0xae0   :  { %3691 = vrcp.f32 %v4873_v55  ;;  %vm2347_vm1 = vmor %vm2345_vm15, %vm2346_vm12  ;;  %v2449_v1 = vand.u32 2147483648, %v4875_v26  ;;  %v2447_v36 = vand.u32 2147483647, %v4875_v26  ;;  %v2435_v61 = vand.u32 2147483648, %v4873_v55 }
 0xae1   :  { %v2342_v58 = vsub.f32 1.0, %v2341_v43  ;;  %3693 = vrcp.f32 %v4875_v26  ;;  %vm2443_vm10 = vweird.f32 %v4875_v26  ;;  %v2433_v54 = vand.u32 2147483647, %v4873_v55 }
 0xae2   :  { %vm2448_vm12 = vcmp.eq.f32.partialorder %v2447_v36, 8.507059e+37  ;;  %vm2429_vm13 = vweird.f32 %v4873_v55  ;;  %v2436_v56 = vor.u32 1.1754944e-38, %v2435_v61 }
 0xae3   :  { %v2343_v14 = vmul.f32 %v3690_v33, %v2342_v58  ;;  %v2504_v58 = vmul.f32 %v4786_v51, %v2423_v9  ;;  %vm4941_vm14 = vcmp.eq.f32.partialorder %v2433_v54, 8.507059e+37 }
 0xae5   :  { %v2344_v37 = vadd.f32 %v3690_v33, %v2343_v14 }
 0xae6   :  { %v4891_v39 = vpop.eup %3691 }
 0xae7   :  { %v4894_v32 = vpop.xlane.xlu1 %2268  ;;  %v3694_v10 = vpop.eup %3693  ;;  %v2425_v13 = vmul.f32 %v4891_v39, %v4873_v55  ;;  %v2348_v24 = vsel %vm2347_vm1, %v3690_v33, %v2344_v37  ;;  %v2450_v33 = vor.u32 1.1754944e-38, %v2449_v1  ;;  %vm2430_vm1 = vweird.f32 %v4891_v39 }
 0xae8   :  { %v4898_v53 = vpop.xlane.xlu2 %2265  ;;  %3695 = vrcp.f32 %v4894_v32  ;;  %v2439_v6 = vmul.f32 %v3694_v10, %v4875_v26  ;;  %vm2444_vm9 = vweird.f32 %v3694_v10  ;;  %v2353_v31 = vsel %vm2350_vm8, %v2352_v18, %v2348_v24 }
 0xae9   :  { %3697 = vrcp.f32 %v4898_v53  ;;  %v2426_v38 = vsub.f32 1.0, %v2425_v13  ;;  %v2499_v22 = vmul.f32 %v4801_v28, %v2353_v31  ;;  %vm2445_vm11 = vmor %vm2443_vm10, %vm2444_vm9  ;;  %v2475_v14 = vand.u32 2147483647, %v4898_v53 }
 0xaea   :  { %v2440_v46 = vsub.f32 1.0, %v2439_v6  ;;  %v2477_v49 = vand.u32 2147483648, %v4898_v53  ;;  %vm2471_vm7 = vweird.f32 %v4898_v53  ;;  %vm2485_vm8 = vweird.f32 %v4894_v32 }
 0xaeb   :  { %3372 = vmatmul.msk.f32.gmra.mxu1 %vm591_vm4, %v2499_v22  ;;  %v2427_v26 = vmul.f32 %v4891_v39, %v2426_v38  ;;  %v2491_v59 = vand.u32 2147483648, %v4894_v32  ;;  %v2489_v30 = vand.u32 2147483647, %v4894_v32  ;;  %vm2476_vm10 = vcmp.eq.f32.partialorder %v2475_v14, 8.507059e+37 }
 0xaec   :  { %v2441_v62 = vmul.f32 %v3694_v10, %v2440_v46 }
 0xaee   :  { %v4916_v8 = vpop.eup %3695  ;;  %v2442_v41 = vadd.f32 %v3694_v10, %v2441_v62 }
 0xaef   :  { %v3698_v40 = vpop.eup %3697  ;;  %v2481_v16 = vmul.f32 %v4916_v8, %v4894_v32  ;;  %v4926_v11 = vpop.xlane.xlu1 %2226 }
 0xaf0   :  { %v2467_v28 = vmul.f32 %v3698_v40, %v4898_v53  ;;  %v4932_v27 = vpop.xlane.xlu2 %2262  ;;  %3699 = vrcp.f32 %v4926_v11  ;;  %v2446_v20 = vsel %vm2445_vm11, %v3694_v10, %v2442_v41  ;;  %vm2472_vm15 = vweird.f32 %v3698_v40 }
 0xaf1   :  { %v2482_v43 = vsub.f32 1.0, %v2481_v16  ;;  %3701 = vrcp.f32 %v4932_v27  ;;  %v2451_v19 = vsel %vm2448_vm12, %v2450_v33, %v2446_v20  ;;  %v2428_v10 = vadd.f32 %v4891_v39, %v2427_v26  ;;  %vm2473_vm9 = vmor %vm2471_vm7, %vm2472_vm15 }
 0xaf2   :  { %v2468_v45 = vsub.f32 1.0, %v2467_v28  ;;  %v3514_v25 = vpop.permute.xlu0 %3513  ;;  %v2506_v48 = vmul.f32 %v4811_v23, %v2451_v19  ;;  %v2478_v23 = vor.u32 1.1754944e-38, %v2477_v49  ;;  %vm2486_vm11 = vweird.f32 %v4916_v8  ;;  %vm4965_vm12 = vmor %vm2429_vm13, %vm2430_vm1 }
 0xaf3   :  { %v2483_v15 = vmul.f32 %v4916_v8, %v2482_v43  ;;  %v3515_v51 = vunpack.i.l.bf16 %v3514_v25  ;;  %v3516_v53 = vunpack.i.h.bf16 %v3514_v25  ;;  %v2463_v0 = vand.u32 2147483648, %v4932_v27  ;;  %vm4982_vm13 = vmor %vm2485_vm8, %vm2486_vm11 }
 0xaf4   :  { %v2469_v2 = vmul.f32 %v3698_v40, %v2468_v45  ;;  %3379 = vmatmul.msk.f32.vlgmr.msrb.gmra.mxu1 %vm591_vm4, %v2506_v48  ;;  %v2295_v31 = vand.u32 2147483648, %v4926_v11  ;;  %v2432_v55 = vsel %vm4965_vm12, %v4891_v39, %v2428_v10  ;;  %v2293_v41 = vand.u32 2147483647, %v4926_v11 }
 0xaf5   :  { %2745 = vmatpush.msrb.mxu0 %v3515_v51  ;;  %v2484_v18 = vadd.f32 %v4916_v8, %v2483_v15  ;;  %v2492_v16 = vor.u32 1.1754944e-38, %v2491_v59  ;;  %vm2289_vm7 = vweird.f32 %v4926_v11  ;;  %v2437_v32 = vsel %vm4941_vm14, %v2436_v56, %v2432_v55 }
 0xaf6   :  { %v4950_v37 = vpop.eup %3699  ;;  %v2470_v3 = vadd.f32 %v3698_v40, %v2469_v2  ;;  %vm2457_vm8 = vweird.f32 %v4932_v27  ;;  %v2296_v28 = vor.u32 1.1754944e-38, %v2295_v31  ;;  %v2505_v43 = vmul.f32 %v4807_v5, %v2437_v32  ;;  %v3385_v32 = vld [vmem:[%s5197_s6 + $0x30] sm:$0xff] }
 0xaf7   :  { %v3702_v47 = vpop.eup %3701  ;;  %v2285_v6 = vmul.f32 %v4950_v37, %v4926_v11  ;;  %2746 = vmatpush.msrb.mxu0 %v3516_v53  ;;  %vm2290_vm15 = vweird.f32 %v4950_v37  ;;  %v2488_v39 = vsel %vm4982_vm13, %v4916_v8, %v2484_v18  ;;  %v2464_v8 = vor.u32 1.1754944e-38, %v2463_v0 }
 0xaf8   :  { %v2474_v12 = vsel %vm2473_vm9, %v3698_v40, %v2470_v3  ;;  %v2453_v13 = vmul.f32 %v3702_v47, %v4932_v27  ;;  %v3524_v17 = vpop.permute.xlu2 %3523  ;;  %3377 = vmatmul.msk.f32.vlgmr.msrb.gmra.mxu0 %vm591_vm4, %v2504_v58  ;;  %v2461_v40 = vand.u32 2147483647, %v4932_v27  ;;  %vm2458_vm1 = vweird.f32 %v3702_v47 }
 0xaf9   :  { %v2479_v24 = vsel %vm2476_vm10, %v2478_v23, %v2474_v12  ;;  %v2286_v1 = vsub.f32 1.0, %v2285_v6  ;;  %v3525_v62 = vunpack.i.l.bf16 %v3524_v17  ;;  %v3526_v22 = vunpack.i.h.bf16 %v3524_v17  ;;  %vm2291_vm10 = vmor %vm2289_vm7, %vm2290_vm15 }
 0xafa   :  { %v2454_v36 = vsub.f32 1.0, %v2453_v13  ;;  %v2508_v9 = vmul.f32 %v4818_v42, %v2479_v24  ;;  %vm2490_vm9 = vcmp.eq.f32.partialorder %v2489_v30, 8.507059e+37  ;;  %vm2459_vm11 = vmor %vm2457_vm8, %vm2458_vm1  ;;  %vm2462_vm14 = vcmp.eq.f32.partialorder %v2461_v40, 8.507059e+37 }
 0xafb   :  { %v2287_v38 = vmul.f32 %v4950_v37, %v2286_v1  ;;  %2536 = vmatpush.msrb.mxu3 %v3525_v62  ;;  %v2493_v11 = vsel %vm2490_vm9, %v2492_v16, %v2488_v39  ;;  %vm2294_vm12 = vcmp.eq.f32.partialorder %v2293_v41, 8.507059e+37  ;;  %v3386_v16 = vld [vmem:[%s5197_s6 + $0x38] sm:$0xff] }
 0xafc   :  { %v2455_v42 = vmul.f32 %v3702_v47, %v2454_v36  ;;  %3381 = vmatmul.msk.f32.vlgmr.msra.gmra.mxu2 %vm591_vm4, %v2508_v9  ;;  %v2509_v58 = vmul.f32 %v4820_v34, %v2493_v11 }
 0xafd   :  { %2537 = vmatpush.msrb.mxu3 %v3526_v22  ;;  %v2288_v54 = vadd.f32 %v4950_v37, %v2287_v38 }
 0xafe   :  { %3367 = vmatmul.msk.f32.vlgmr.msrb.gmra.mxu3 %vm591_vm4, %v4920_v7  ;;  %v2456_v33 = vadd.f32 %v3702_v47, %v2455_v42 }
 0xaff   :  { %v2292_v20 = vsel %vm2291_vm10, %v4950_v37, %v2288_v54  ;;  %v3384_v54 = vld [vmem:[%s5197_s6 + $0x28] sm:$0xff] }
 0xb00   :  { %v2460_v26 = vsel %vm2459_vm11, %v3702_v47, %v2456_v33  ;;  %v2297_v7 = vsel %vm2294_vm12, %v2296_v28, %v2292_v20  ;;  %3378 = vmatmul.msk.f32.gmra.mxu0 %vm591_vm4, %v2505_v43  ;;  %v3383_v33 = vld [vmem:[%s5197_s6 + $0x20] sm:$0xff] }
 0xb01   :  { %v2576_v27 = vpop.f32.mrf.mxu0  ;;  %v2465_v19 = vsel %vm2462_vm14, %v2464_v8, %v2460_v26  ;;  %v2495_v5 = vmul.f32 %v4826_v57, %v2297_v7 }
 0xb02   :  { %v2507_v45 = vmul.f32 %v4828_v63, %v2465_v19  ;;  %2584 = vrot.lane.b32.xlu0 %v2576_v27, %s5224_s2 }
 0xb04   :  { %3380 = vmatmul.msk.f32.gmra.mxu1 %vm591_vm4, %v2507_v45  ;;  %3382 = vmatmul.msk.f32.gmra.mxu2 %vm591_vm4, %v2509_v58 }
 0xb06   :  { %3368 = vmatmul.msk.f32.gmra.mxu3 %vm591_vm4, %v2495_v5 }
 0xb07   :  { %v3529_v56 = vpop.permute.xlu1 %3528 }
 0xb08   :  { %v3530_v14 = vunpack.i.l.bf16 %v3529_v56  ;;  %v3531_v49 = vunpack.i.h.bf16 %v3529_v56 }
 0xb0a   :  { %2708 = vmatpush.msra.mxu3 %v3530_v14 }
 0xb0c   :  { %2709 = vmatpush.msra.mxu3 %v3531_v49 }
 0xb0e   :  { %2887 = vmatpush.msrb.mxu3 %v3386_v16 }
 0xb10   :  { %2888 = vmatpush.msrb.mxu3 %v3385_v32 }
 0xb12   :  { %2889 = vmatpush.msrb.mxu3 %v3384_v54 }
 0xb13   :  { %v2579_v25 = vpop.f32.mrf.mxu0 }
 0xb14   :  { %2586 = vrot.lane.b32.xlu0 %v2579_v25, %s5224_s2  ;;  %2890 = vmatpush.msrb.mxu3 %v3383_v33 }
 0xb1b   :  { %v2621_v63 = vpop.f32.mrf.mxu1 }
 0xb1c   :  { %2629 = vrot.lane.b32.xlu2 %v2621_v63, %s5225_s21 }
 0xb1d   :  { %v2248_v34 = vpop.xlane.xlu0 %2247 }
 0xb1e   :  { %3703 = vrcp.f32 %v2248_v34  ;;  %v2393_v48 = vand.u32 2147483648, %v2248_v34  ;;  %v2391_v51 = vand.u32 2147483647, %v2248_v34  ;;  %vm2387_vm15 = vweird.f32 %v2248_v34 }
 0xb20   :  { %v2394_v10 = vor.u32 1.1754944e-38, %v2393_v48  ;;  %vm2392_vm7 = vcmp.eq.f32.partialorder %v2391_v51, 8.507059e+37 }
 0xb24   :  { %v3704_v4 = vpop.eup %3703 }
 0xb25   :  { %v2383_v2 = vmul.f32 %v3704_v4, %v2248_v34  ;;  %vm2388_vm13 = vweird.f32 %v3704_v4 }
 0xb26   :  { %vm2389_vm1 = vmor %vm2387_vm15, %vm2388_vm13 }
 0xb27   :  { %v2384_v15 = vsub.f32 1.0, %v2383_v2 }
 0xb29   :  { %v2385_v57 = vmul.f32 %v3704_v4, %v2384_v15 }
 0xb2b   :  { %v2386_v37 = vadd.f32 %v3704_v4, %v2385_v57 }
 0xb2d   :  { %v2390_v3 = vsel %vm2389_vm1, %v3704_v4, %v2386_v37 }
 0xb2e   :  { %v2395_v59 = vsel %vm2392_vm7, %v2394_v10, %v2390_v3 }
 0xb2f   :  { %v2502_v30 = vmul.f32 %v4848_v60, %v2395_v59 }
 0xb30   :  { %v2251_v47 = vpop.xlane.xlu2 %2250 }
 0xb31   :  { %3705 = vrcp.f32 %v2251_v47  ;;  %3375 = vmatmul.msk.f32.vlgmr.msra.gmra.mxu3 %vm591_vm4, %v2502_v30  ;;  %v2407_v12 = vand.u32 2147483648, %v2251_v47  ;;  %v2405_v17 = vand.u32 2147483647, %v2251_v47  ;;  %vm2401_vm9 = vweird.f32 %v2251_v47 }
 0xb33   :  { %v2408_v46 = vor.u32 1.1754944e-38, %v2407_v12  ;;  %vm2406_vm11 = vcmp.eq.f32.partialorder %v2405_v17, 8.507059e+37  ;;  %v3392_v17 = vld [vmem:[%s5199_s8 + $0x40] sm:$0xff] }
 0xb37   :  { %v3706_v23 = vpop.eup %3705 }
 0xb38   :  { %v2397_v6 = vmul.f32 %v3706_v23, %v2251_v47  ;;  %vm2402_vm8 = vweird.f32 %v3706_v23  ;;  %v3399_v47 = vld [vmem:[%s5199_s8 + $0x78] sm:$0xff] }
 0xb39   :  { %vm2403_vm10 = vmor %vm2401_vm9, %vm2402_vm8  ;;  %3047 = vmatpush.msra.mxu1 %v3399_v47  ;;  %v3421_v47 = vld [vmem:[%s5200_s9 + $0xc8] sm:$0xff] }
 0xb3a   :  { %v2398_v53 = vsub.f32 1.0, %v2397_v6  ;;  %v3394_v6 = vld [vmem:[%s5199_s8 + $0x50] sm:$0xff] }
 0xb3c   :  { %v2399_v13 = vmul.f32 %v3706_v23, %v2398_v53  ;;  %v3395_v53 = vld [vmem:[%s5199_s8 + $0x58] sm:$0xff] }
 0xb3e   :  { %v2400_v18 = vadd.f32 %v3706_v23, %v2399_v13 }
 0xb40   :  { %v2404_v24 = vsel %vm2403_vm10, %v3706_v23, %v2400_v18  ;;  %v3397_v23 = vld [vmem:[%s5199_s8 + $0x68] sm:$0xff] }
 0xb41   :  { %v2409_v0 = vsel %vm2406_vm11, %v2408_v46, %v2404_v24  ;;  %3048 = vmatpush.msra.mxu1 %v3397_v23  ;;  %v3393_v18 = vld [vmem:[%s5199_s8 + $0x48] sm:$0xff]  ;;  %v3419_v23 = vld [vmem:[%s5200_s9 + $0xb8] sm:$0xff] }
 0xb42   :  { %v2503_v60 = vmul.f32 %v4858_v52, %v2409_v0 }
 0xb43   :  { %3049 = vmatpush.msra.mxu1 %v3395_v53  ;;  %v3417_v53 = vld [vmem:[%s5200_s9 + $0xa8] sm:$0xff] }
 0xb44   :  { %3376 = vmatmul.msk.f32.gmra.mxu3 %vm591_vm4, %v2503_v60 }
 0xb45   :  { %3050 = vmatpush.msra.mxu1 %v3393_v18  ;;  %v3415_v18 = vld [vmem:[%s5200_s9 + $0x98] sm:$0xff] }
 0xb58   :  { %v2666_v1 = vpop.f32.mrf.mxu2 }
 0xb59   :  { %2674 = vrot.lane.b32.xlu1 %v2666_v1, %s5226_s22 }
 0xb60   :  { %v2669_v62 = vpop.f32.mrf.mxu2 }
 0xb61   :  { %2676 = vrot.lane.b32.xlu0 %v2669_v62, %s5226_s22 }
 0xb68   :  { %v2624_v36 = vpop.f32.mrf.mxu1 }
 0xb69   :  { %2631 = vrot.lane.b32.xlu1 %v2624_v36, %s5225_s21 }
 0xb71   :  { %v2793_v31 = vpop.f32.mrf.mxu1 }
 0xb72   :  { %2801 = vrot.lane.b32.xlu2 %v2793_v31, %s5225_s21  ;;  %v3535_v31 = vld [vmem:[%s5198_s7 + $0x1] ss:$0 sm:$0xff] }
 0xb74   :  { %v2585_v52 = vpop.permute.xlu0 %2584 }
 0xb75   :  { %v2748_v9 = vpop.f32.mrf.mxu0 }
 0xb76   :  { %2756 = vrot.lane.b32.xlu1 %v2748_v9, %s5224_s2  ;;  %v2630_v61 = vpop.permute.xlu2 %2629 }
 0xb7d   :  { %v2751_v55 = vpop.f32.mrf.mxu0 }
 0xb7e   :  { %2758 = vrot.lane.b32.xlu1 %v2751_v55, %s5224_s2 }
 0xb7f   :  { %v2838_v38 = vpop.f32.mrf.mxu2 }
 0xb80   :  { %2846 = vrot.lane.b32.xlu0 %v2838_v38, %s5226_s22 }
 0xb81   :  { %v2539_v22 = vpop.f32.mrf.mxu3  ;;  %v2796_v40 = vpop.f32.mrf.mxu1 }
 0xb82   :  { %2545 = vst.msk [vmem:[#allocation2] sm:$0xff] %vm256_vm3, %v2539_v22  ;;  %2803 = vrot.lane.b32.xlu2 %v2796_v40, %s5225_s21 }
 0xb83   :  { %2590 = vst.msk [vmem:[#allocation2] sm:$0xff] %vm1056_vm2, %v2585_v52 }
 0xb84   :  { %2635 = vst.msk [vmem:[#allocation2] sm:$0xff] %vm1102_vm5, %v2630_v61 }
 0xb86   :  { %v2587_v39 = vpop.permute.xlu0 %2586 }
 0xb87   :  { %v2841_v42 = vpop.f32.mrf.mxu2 }
 0xb88   :  { %2848 = vrot.lane.b32.xlu0 %v2841_v42, %s5226_s22 }
 0xb89   :  { %v2542_v41 = vpop.f32.mrf.mxu3 }
 0xb8a   :  { %2546 = vst.msk [vmem:[#allocation2 + $0x8] sm:$0xff] %vm256_vm3, %v2542_v41 }
 0xb8b   :  { %2591 = vst.msk [vmem:[#allocation2 + $0x8] sm:$0xff] %vm1056_vm2, %v2587_v39 }
 0xbb4   :  { %v2711_v8 = vpop.f32.mrf.mxu3 }
 0xbb5   :  { %2717 = vst.msk [vmem:[#allocation2 + $0x10] sm:$0xff] %vm256_vm3, %v2711_v8 }
 0xbc7   :  { %v2714_v28 = vpop.f32.mrf.mxu3 }
 0xbc8   :  { %2718 = vst.msk [vmem:[#allocation2 + $0x18] sm:$0xff] %vm256_vm3, %v2714_v28 }
 0xbcb   :  { %v2675_v11 = vpop.permute.xlu1 %2674 }
 0xbcc   :  { %2680 = vst.msk [vmem:[#allocation2] sm:$0xff] %vm1148_vm6, %v2675_v11  ;;  %v2802_v7 = vpop.permute.xlu2 %2801 }
 0xbd3   :  { %v2854_v20 = vld [vmem:[#allocation2] sm:$0xff]  ;;  %v2677_v26 = vpop.permute.xlu0 %2676 }
 0xbd4   :  { %3387 = vmatmul.msk.f32.vlgmr.msrb.gmra.mxu3 %vm80_vm0, %v2854_v20 }
 0xbdb   :  { %v2632_v43 = vpop.permute.xlu1 %2631 }
 0xbdc   :  { %2636 = vst.msk [vmem:[#allocation2 + $0x8] sm:$0xff] %vm1102_vm5, %v2632_v43  ;;  %v2804_v5 = vpop.permute.xlu2 %2803 }
 0xbdd   :  { %2681 = vst.msk [vmem:[#allocation2 + $0x8] sm:$0xff] %vm1148_vm6, %v2677_v26 }
 0xbe4   :  { %v2855_v27 = vld [vmem:[#allocation2 + $0x8] sm:$0xff] }
 0xbe5   :  { %3388 = vmatmul.msk.f32.gmra.mxu3 %vm80_vm0, %v2855_v27 }
 0xbe8   :  { %v2757_v19 = vpop.permute.xlu1 %2756 }
 0xbe9   :  { %2762 = vst.msk [vmem:[#allocation2 + $0x10] sm:$0xff] %vm1056_vm2, %v2757_v19 }
 0xbea   :  { %2807 = vst.msk [vmem:[#allocation2 + $0x10] sm:$0xff] %vm1102_vm5, %v2802_v7 }
 0xbf0   :  { %v2759_v45 = vpop.permute.xlu1 %2758 }
 0xbf1   :  { %2763 = vst.msk [vmem:[#allocation2 + $0x18] sm:$0xff] %vm1056_vm2, %v2759_v45 }
 0xbf2   :  { %v2847_v58 = vpop.permute.xlu0 %2846  ;;  %2808 = vst.msk [vmem:[#allocation2 + $0x18] sm:$0xff] %vm1102_vm5, %v2804_v5 }
 0xbf3   :  { %2852 = vst.msk [vmem:[#allocation2 + $0x10] sm:$0xff] %vm1148_vm6, %v2847_v58 }
 0xbfa   :  { %v2849_v56 = vpop.permute.xlu0 %2848  ;;  %v2856_v14 = vld [vmem:[#allocation2 + $0x10] sm:$0xff] }
 0xbfb   :  { %2853 = vst.msk [vmem:[#allocation2 + $0x18] sm:$0xff] %vm1148_vm6, %v2849_v56  ;;  %3389 = vmatmul.msk.f32.gmra.mxu3 %vm80_vm0, %v2856_v14 }
 0xc02   :  { %v2857_v49 = vld [vmem:[#allocation2 + $0x18] sm:$0xff] }
 0xc03   :  { %3390 = vmatmul.msk.f32.gmra.mxu3 %vm80_vm0, %v2857_v49 }
 0xc57   :  { %v2892_v25 = vpop.f32.mrf.mxu3 }
 0xc58   :  { %v2904_v63 = vadd.f32 %v2892_v25, %v4499_v35 }
 0xc5a   :  { %v2910_v34 = vmul.f32 %v2904_v63, %v2904_v63 }
 0xc5c   :  { %v2914_v4 = vsel %vm80_vm0, %v2910_v34, 0.0 }
 0xc5d   :  { %2915 = vadd.xlane.f32.xlu1 %v2914_v4 }
 0xc68   :  { %v2895_v2 = vpop.f32.mrf.mxu3 }
 0xc69   :  { %v5062_v15 = vadd.f32 %v2895_v2, %v4505_v29 }
 0xc6b   :  { %v2911_v48 = vmul.f32 %v5062_v15, %v5062_v15 }
 0xc6d   :  { %v2917_v57 = vsel %vm80_vm0, %v2911_v48, 0.0 }
 0xc6e   :  { %2918 = vadd.xlane.f32.xlu2 %v2917_v57 }
 0xc7e   :  { %v2898_v51 = vpop.f32.mrf.mxu3 }
 0xc7f   :  { %v5068_v37 = vadd.f32 %v2898_v51, %v4511_v21  ;;  %v3398_v21 = vld [vmem:[%s5199_s8 + $0x70] sm:$0xff] }
 0xc80   :  { %3018 = vmatpush.msra.mxu0 %v3398_v21  ;;  %v3422_v21 = vld [vmem:[%s5200_s9 + $0xd0] sm:$0xff] }
 0xc81   :  { %v2912_v35 = vmul.f32 %v5068_v37, %v5068_v37 }
 0xc83   :  { %v2920_v10 = vsel %vm80_vm0, %v2912_v35, 0.0 }
 0xc84   :  { %2921 = vadd.xlane.f32.xlu0 %v2920_v10  ;;  %v3426_v10 = vld [vmem:[%s5200_s9 + $0xf0] sm:$0xff] }
 0xc86   :  { %v2901_v3 = vpop.f32.mrf.mxu3 }
 0xc87   :  { %v5074_v29 = vadd.f32 %v2901_v3, %v4517_v44  ;;  %v3396_v44 = vld [vmem:[%s5199_s8 + $0x60] sm:$0xff]  ;;  %v3425_v3 = vld [vmem:[%s5200_s9 + $0xe8] sm:$0xff] }
 0xc88   :  { %3019 = vmatpush.msra.mxu0 %v3396_v44  ;;  %v3420_v44 = vld [vmem:[%s5200_s9 + $0xc0] sm:$0xff] }
 0xc89   :  { %v2913_v59 = vmul.f32 %v5074_v29, %v5074_v29 }
 0xc8a   :  { %3020 = vmatpush.msra.mxu0 %v3394_v6  ;;  %v3418_v6 = vld [vmem:[%s5200_s9 + $0xb0] sm:$0xff] }
 0xc8b   :  { %v2923_v30 = vsel %vm80_vm0, %v2913_v59, 0.0  ;;  %v3424_v59 = vld [vmem:[%s5200_s9 + $0xe0] sm:$0xff] }
 0xc8c   :  { %2924 = vadd.xlane.f32.xlu1 %v2923_v30  ;;  %3021 = vmatpush.msra.mxu0 %v3392_v17  ;;  %v3423_v30 = vld [vmem:[%s5200_s9 + $0xd8] sm:$0xff] }
 0xcd0   :  { %v2916_v12 = vpop.xlane.xlu1 %2915 }
 0xcd1   :  { %v2926_v13 = vmul.f32 %v2916_v12, %v3912_v50  ;;  %v3416_v12 = vld [vmem:[%s5200_s9 + $0xa0] sm:$0xff] }
 0xcd3   :  { %v2930_v46 = vadd.f32 1.1920929e-07, %v2926_v13 }
 0xcd5   :  { %3707 = vrsqrt.f32 %v2930_v46  ;;  %vm2940_vm4 = vweird.f32 %v2930_v46 }
 0xcdb   :  { %v3708_v24 = vpop.eup %3707 }
 0xcdc   :  { %v2935_v0 = vmul.f32 %v3708_v24, %v2930_v46  ;;  %vm2941_vm3 = vweird.f32 %v3708_v24  ;;  %v3414_v46 = vld [vmem:[%s5200_s9 + $0x90] sm:$0xff] }
 0xcdd   :  { %vm2942_vm2 = vmor %vm2940_vm4, %vm2941_vm3 }
 0xcde   :  { %v2936_v60 = vmul.f32 %v3708_v24, %v2935_v0  ;;  %v3412_v0 = vld [vmem:[%s5200_s9 + $0x80] sm:$0xff] }
 0xce0   :  { %v2937_v1 = vmul.f32 0.5, %v2936_v60 }
 0xce1   :  { %v2919_v55 = vpop.xlane.xlu2 %2918 }
 0xce2   :  { %v2938_v62 = vsub.f32 1.5, %v2937_v1  ;;  %v2927_v52 = vmul.f32 %v2919_v55, %v3912_v50 }
 0xce4   :  { %v2939_v36 = vmul.f32 %v3708_v24, %v2938_v62  ;;  %v2931_v40 = vadd.f32 1.1920929e-07, %v2927_v52 }
 0xce6   :  { %v2943_v9 = vsel %vm2942_vm2, %v3708_v24, %v2939_v36  ;;  %3709 = vrsqrt.f32 %v2931_v40  ;;  %vm2950_vm6 = vweird.f32 %v2931_v40  ;;  %v3413_v24 = vld [vmem:[%s5200_s9 + $0x88] sm:$0xff] }
 0xce7   :  { %v2974_v38 = vmul.f32 %v2943_v9, %v2904_v63 }
 0xce9   :  { %v2981_v22 = vmul.f32 %v3535_v31, %v2974_v38 }
 0xceb   :  { %3400 = vmatmul.msk.f32.vlgmr.msra.gmra.mxu0 %vm80_vm0, %v2981_v22  ;;  %3404 = vmatmul.msk.f32.vlgmr.msra.gmra.mxu1 %vm80_vm0, %v2981_v22 }
 0xcec   :  { %v3710_v61 = vpop.eup %3709 }
 0xced   :  { %v2945_v42 = vmul.f32 %v3710_v61, %v2931_v40  ;;  %vm2951_vm5 = vweird.f32 %v3710_v61 }
 0xcee   :  { %vm2952_vm14 = vmor %vm2950_vm6, %vm2951_vm5 }
 0xcef   :  { %v2946_v39 = vmul.f32 %v3710_v61, %v2945_v42 }
 0xcf1   :  { %v2947_v41 = vmul.f32 0.5, %v2946_v39 }
 0xcf3   :  { %v2948_v16 = vsub.f32 1.5, %v2947_v41 }
 0xcf5   :  { %v2949_v54 = vmul.f32 %v3710_v61, %v2948_v16 }
 0xcf7   :  { %v2922_v32 = vpop.xlane.xlu0 %2921  ;;  %v2953_v8 = vsel %vm2952_vm14, %v3710_v61, %v2949_v54 }
 0xcf8   :  { %v2928_v33 = vmul.f32 %v2922_v32, %v3912_v50  ;;  %v2975_v11 = vmul.f32 %v2953_v8, %v5062_v15 }
 0xcfa   :  { %v2932_v28 = vadd.f32 1.1920929e-07, %v2928_v33  ;;  %v2982_v20 = vmul.f32 %v3535_v31, %v2975_v11 }
 0xcfc   :  { %3711 = vrsqrt.f32 %v2932_v28  ;;  %3401 = vmatmul.msk.f32.gmra.mxu0 %vm80_vm0, %v2982_v20  ;;  %3405 = vmatmul.msk.f32.gmra.mxu1 %vm80_vm0, %v2982_v20  ;;  %vm2960_vm13 = vweird.f32 %v2932_v28 }
 0xcff   :  { %v2925_v43 = vpop.xlane.xlu1 %2924 }
 0xd00   :  { %v2929_v26 = vmul.f32 %v2925_v43, %v3912_v50 }
 0xd02   :  { %v3712_v27 = vpop.eup %3711  ;;  %v2933_v19 = vadd.f32 1.1920929e-07, %v2929_v26 }
 0xd03   :  { %v2955_v7 = vmul.f32 %v3712_v27, %v2932_v28  ;;  %vm2961_vm12 = vweird.f32 %v3712_v27 }
 0xd04   :  { %3713 = vrsqrt.f32 %v2933_v19  ;;  %vm2962_vm15 = vmor %vm2960_vm13, %vm2961_vm12  ;;  %vm2970_vm7 = vweird.f32 %v2933_v19 }
 0xd05   :  { %v2956_v45 = vmul.f32 %v3712_v27, %v2955_v7 }
 0xd07   :  { %v2957_v58 = vmul.f32 0.5, %v2956_v45 }
 0xd09   :  { %v2958_v5 = vsub.f32 1.5, %v2957_v58 }
 0xd0a   :  { %v3714_v56 = vpop.eup %3713 }
 0xd0b   :  { %v2959_v14 = vmul.f32 %v3712_v27, %v2958_v5  ;;  %v2965_v49 = vmul.f32 %v3714_v56, %v2933_v19  ;;  %vm2971_vm1 = vweird.f32 %v3714_v56 }
 0xd0c   :  { %vm2972_vm8 = vmor %vm2970_vm7, %vm2971_vm1 }
 0xd0d   :  { %v2963_v25 = vsel %vm2962_vm15, %v3712_v27, %v2959_v14  ;;  %v2966_v63 = vmul.f32 %v3714_v56, %v2965_v49 }
 0xd0e   :  { %v2976_v34 = vmul.f32 %v2963_v25, %v5068_v37  ;;  %v3427_v37 = vld [vmem:[%s5200_s9 + $0xf8] sm:$0xff] }
 0xd0f   :  { %v2967_v4 = vmul.f32 0.5, %v2966_v63  ;;  %3165 = vmatpush.msrb.mxu2 %v3427_v37 }
 0xd10   :  { %v2983_v2 = vmul.f32 %v3535_v31, %v2976_v34 }
 0xd11   :  { %v2968_v50 = vsub.f32 1.5, %v2967_v4  ;;  %3166 = vmatpush.msrb.mxu2 %v3426_v10 }
 0xd12   :  { %3402 = vmatmul.msk.f32.gmra.mxu0 %vm80_vm0, %v2983_v2  ;;  %3406 = vmatmul.msk.f32.gmra.mxu1 %vm80_vm0, %v2983_v2 }
 0xd13   :  { %v2969_v48 = vmul.f32 %v3714_v56, %v2968_v50  ;;  %3167 = vmatpush.msrb.mxu2 %v3425_v3 }
 0xd15   :  { %v2973_v57 = vsel %vm2972_vm8, %v3714_v56, %v2969_v48  ;;  %3168 = vmatpush.msrb.mxu2 %v3424_v59 }
 0xd16   :  { %v2977_v51 = vmul.f32 %v2973_v57, %v5074_v29 }
 0xd17   :  { %3169 = vmatpush.msrb.mxu2 %v3423_v30 }
 0xd18   :  { %v2984_v35 = vmul.f32 %v3535_v31, %v2977_v51 }
 0xd19   :  { %3170 = vmatpush.msrb.mxu2 %v3422_v21 }
 0xd1a   :  { %3403 = vmatmul.msk.f32.gmra.mxu0 %vm80_vm0, %v2984_v35  ;;  %3407 = vmatmul.msk.f32.gmra.mxu1 %vm80_vm0, %v2984_v35 }
 0xd1b   :  { %3171 = vmatpush.msrb.mxu2 %v3421_v47 }
 0xd1d   :  { %3172 = vmatpush.msrb.mxu2 %v3420_v44 }
 0xd1f   :  { %3173 = vmatpush.msrb.mxu2 %v3419_v23 }
 0xd21   :  { %3174 = vmatpush.msrb.mxu2 %v3418_v6 }
 0xd23   :  { %3175 = vmatpush.msrb.mxu2 %v3417_v53 }
 0xd25   :  { %3176 = vmatpush.msrb.mxu2 %v3416_v12 }
 0xd27   :  { %3177 = vmatpush.msrb.mxu2 %v3415_v18 }
 0xd29   :  { %3178 = vmatpush.msrb.mxu2 %v3414_v46 }
 0xd2b   :  { %3179 = vmatpush.msrb.mxu2 %v3413_v24 }
 0xd2d   :  { %3180 = vmatpush.msrb.mxu2 %v3412_v0 }
 0xd68   :  { %v3023_v13 = vpop.f32.mrf.mxu0  ;;  %v3052_v16 = vpop.f32.mrf.mxu1 }
 0xd69   :  { %v3408_v17 = vmul.f32 -1.442695, %v3023_v13 }
 0xd6b   :  { %3715 = vpow2.f32 %v3408_v17 }
 0xd71   :  { %v3716_v60 = vpop.eup %3715 }
 0xd72   :  { %v3076_v1 = vadd.f32 1.0, %v3716_v60 }
 0xd74   :  { %3717 = vrcp.f32 %v3076_v1  ;;  %v3091_v9 = vand.u32 2147483648, %v3076_v1  ;;  %v3089_v52 = vand.u32 2147483647, %v3076_v1  ;;  %vm3085_vm10 = vweird.f32 %v3076_v1 }
 0xd76   :  { %v3092_v61 = vor.u32 1.1754944e-38, %v3091_v9  ;;  %vm3090_vm3 = vcmp.eq.f32.partialorder %v3089_v52, 8.507059e+37  ;;  %v3196_v9 = vld [vmem:[%s5201_s10 + $0x10] sm:$0xff] }
 0xd79   :  { %v3026_v55 = vpop.f32.mrf.mxu0  ;;  %v3055_v34 = vpop.f32.mrf.mxu1 }
 0xd7a   :  { %v3718_v62 = vpop.eup %3717  ;;  %v3409_v22 = vmul.f32 -1.442695, %v3026_v55 }
 0xd7b   :  { %v3081_v36 = vmul.f32 %v3718_v62, %v3076_v1  ;;  %vm3086_vm9 = vweird.f32 %v3718_v62 }
 0xd7c   :  { %3719 = vpow2.f32 %v3409_v22  ;;  %vm3087_vm11 = vmor %vm3085_vm10, %vm3086_vm9  ;;  %vm3231_vm10 = vcmask 122880  }
 0xd7d   :  { %v3082_v31 = vsub.f32 1.0, %v3081_v36 }
 0xd7f   :  { %v3083_v38 = vmul.f32 %v3718_v62, %v3082_v31  ;;  %v3197_v31 = vld [vmem:[%s5201_s10 + $0x18] sm:$0xff] }
 0xd80   :  { %3220 = vmatpush.msra.mxu3 %v3197_v31 }
 0xd81   :  { %v3084_v40 = vadd.f32 %v3718_v62, %v3083_v38  ;;  %v3194_v38 = vld [vmem:[%s5201_s10] sm:$0xff] }
 0xd82   :  { %v3720_v32 = vpop.eup %3719  ;;  %3221 = vmatpush.msra.mxu3 %v3196_v9 }
 0xd83   :  { %v3088_v42 = vsel %vm3087_vm11, %v3718_v62, %v3084_v40  ;;  %v3077_v33 = vadd.f32 1.0, %v3720_v32 }
 0xd84   :  { %v3093_v39 = vsel %vm3090_vm3, %v3092_v61, %v3088_v42 }
 0xd85   :  { %v3140_v41 = vmul.f32 %v3093_v39, %v3023_v13  ;;  %3721 = vrcp.f32 %v3077_v33  ;;  %v3106_v26 = vand.u32 2147483648, %v3077_v33  ;;  %v3104_v19 = vand.u32 2147483647, %v3077_v33 }
 0xd86   :  { %vm3100_vm2 = vweird.f32 %v3077_v33 }
 0xd87   :  { %v3144_v54 = vmul.f32 %v3140_v41, %v3052_v16  ;;  %v3107_v45 = vor.u32 1.1754944e-38, %v3106_v26  ;;  %vm3105_vm6 = vcmp.eq.f32.partialorder %v3104_v19, 8.507059e+37  ;;  %v3536_v41 = vld [vmem:[%s5202_s11] ss:$0 sm:$0xff] }
 0xd89   :  { %3181 = vmatmul.f32.vlgmr.msrb.gmra.mxu2 %v3144_v54 }
 0xd8b   :  { %v3722_v8 = vpop.eup %3721 }
 0xd8c   :  { %v3096_v28 = vmul.f32 %v3722_v8, %v3077_v33  ;;  %vm3101_vm4 = vweird.f32 %v3722_v8 }
 0xd8d   :  { %vm3102_vm5 = vmor %vm3100_vm2, %vm3101_vm4 }
 0xd8e   :  { %v3097_v43 = vsub.f32 1.0, %v3096_v28 }
 0xd8f   :  { %v3029_v11 = vpop.f32.mrf.mxu0  ;;  %v3058_v23 = vpop.f32.mrf.mxu1 }
 0xd90   :  { %v3410_v20 = vmul.f32 -1.442695, %v3029_v11  ;;  %v3098_v27 = vmul.f32 %v3722_v8, %v3097_v43 }
 0xd92   :  { %3723 = vpow2.f32 %v3410_v20  ;;  %v3099_v7 = vadd.f32 %v3722_v8, %v3098_v27 }
 0xd94   :  { %v3103_v58 = vsel %vm3102_vm5, %v3722_v8, %v3099_v7 }
 0xd95   :  { %v3108_v14 = vsel %vm3105_vm6, %v3107_v45, %v3103_v58 }
 0xd96   :  { %v3141_v25 = vmul.f32 %v3108_v14, %v3026_v55  ;;  %v3195_v55 = vld [vmem:[%s5201_s10 + $0x8] sm:$0xff]  ;;  %s3774_s10 = smov [#allocation3]  }
 0xd97   :  { %v3032_v5 = vpop.f32.mrf.mxu0  ;;  %v3061_v62 = vpop.f32.mrf.mxu1  ;;  %3222 = vmatpush.msra.mxu3 %v3195_v55  ;;  %s3239_s18 = sshll.u32 %s3774_s10, 4  ;;  %s3240_s18 = int_to_ptr.vmem [resolvable:$true] %s3239_s18 }
 0xd98   :  { %v3724_v56 = vpop.eup %3723  ;;  %v3411_v49 = vmul.f32 -1.442695, %v3032_v5  ;;  %v3145_v4 = vmul.f32 %v3141_v25, %v3055_v34 }
 0xd99   :  { %v3078_v63 = vadd.f32 1.0, %v3724_v56  ;;  %3223 = vmatpush.msra.mxu3 %v3194_v38 }
 0xd9a   :  { %3725 = vpow2.f32 %v3411_v49  ;;  %3183 = vmatmul.f32.gmra.mxu2 %v3145_v4 }
 0xd9b   :  { %3727 = vrcp.f32 %v3078_v63  ;;  %v3121_v35 = vand.u32 2147483648, %v3078_v63  ;;  %v3119_v10 = vand.u32 2147483647, %v3078_v63  ;;  %vm3115_vm12 = vweird.f32 %v3078_v63 }
 0xd9d   :  { %v3122_v30 = vor.u32 1.1754944e-38, %v3121_v35  ;;  %vm3120_vm15 = vcmp.eq.f32.partialorder %v3119_v10, 8.507059e+37 }
 0xda0   :  { %v3726_v2 = vpop.eup %3725 }
 0xda1   :  { %v3728_v50 = vpop.eup %3727  ;;  %v3079_v48 = vadd.f32 1.0, %v3726_v2 }
 0xda2   :  { %v3111_v57 = vmul.f32 %v3728_v50, %v3078_v63  ;;  %vm3116_vm14 = vweird.f32 %v3728_v50 }
 0xda3   :  { %3729 = vrcp.f32 %v3079_v48  ;;  %vm3117_vm13 = vmor %vm3115_vm12, %vm3116_vm14  ;;  %v3136_v12 = vand.u32 2147483648, %v3079_v48  ;;  %v3134_v18 = vand.u32 2147483647, %v3079_v48  ;;  %vm3130_vm7 = vweird.f32 %v3079_v48 }
 0xda4   :  { %v3112_v51 = vsub.f32 1.0, %v3111_v57 }
 0xda5   :  { %v3137_v24 = vor.u32 1.1754944e-38, %v3136_v12  ;;  %vm3135_vm9 = vcmp.eq.f32.partialorder %v3134_v18, 8.507059e+37 }
 0xda6   :  { %v3113_v37 = vmul.f32 %v3728_v50, %v3112_v51 }
 0xda8   :  { %v3114_v3 = vadd.f32 %v3728_v50, %v3113_v37 }
 0xda9   :  { %v3730_v59 = vpop.eup %3729 }
 0xdaa   :  { %v3118_v21 = vsel %vm3117_vm13, %v3728_v50, %v3114_v3  ;;  %v3126_v47 = vmul.f32 %v3730_v59, %v3079_v48  ;;  %vm3131_vm1 = vweird.f32 %v3730_v59 }
 0xdab   :  { %v3123_v44 = vsel %vm3120_vm15, %v3122_v30, %v3118_v21  ;;  %vm3132_vm8 = vmor %vm3130_vm7, %vm3131_vm1 }
 0xdac   :  { %v3142_v6 = vmul.f32 %v3123_v44, %v3029_v11  ;;  %v3127_v53 = vsub.f32 1.0, %v3126_v47 }
 0xdae   :  { %v3146_v13 = vmul.f32 %v3142_v6, %v3058_v23  ;;  %v3128_v17 = vmul.f32 %v3730_v59, %v3127_v53 }
 0xdb0   :  { %v3129_v46 = vadd.f32 %v3730_v59, %v3128_v17  ;;  %3186 = vmatmul.f32.gmra.mxu2 %v3146_v13 }
 0xdb2   :  { %v3133_v0 = vsel %vm3132_vm8, %v3730_v59, %v3129_v46 }
 0xdb3   :  { %v3138_v60 = vsel %vm3135_vm9, %v3137_v24, %v3133_v0 }
 0xdb4   :  { %v3143_v1 = vmul.f32 %v3138_v60, %v3032_v5 }
 0xdb6   :  { %v3147_v36 = vmul.f32 %v3143_v1, %v3061_v62 }
 0xdb8   :  { %3188 = vmatmul.f32.gmra.mxu2 %v3147_v36 }
 0xe0c   :  { %v3182_v52 = vpop.f32.mrf.mxu2 }
 0xe1d   :  { %v3184_v22 = vpop.f32.mrf.mxu2 }
 0xe1e   :  { %v3192_v40 = vadd.f32 %v3184_v22, %v5062_v15 }
 0xe20   :  { %3428 = vmatmul.msk.f32.vlgmr.msra.gmra.mxu3 %vm80_vm0, %v3192_v40 }
 0xe33   :  { %v3187_v61 = vpop.f32.mrf.mxu2 }
 0xe3b   :  { %v3189_v42 = vpop.f32.mrf.mxu2 }
 0xe3c   :  { %v3193_v39 = vadd.f32 %v3189_v42, %v5074_v29 }
 0xe3e   :  { %3429 = vmatmul.msk.f32.gmra.mxu3 %vm80_vm0, %v3193_v39 }
 0xea3   :  { %v3225_v16 = vpop.f32.mrf.mxu3 }
 0xea4   :  { %v3226_v32 = vadd.f32 %v3536_v41, %v3225_v16 }
 0xea6   :  { %3232 = vst.msk [vmem:[#allocation3] sm:$0x1] %vm3231_vm10, %v3226_v32 }
 0xec1   :  { %v3228_v15 = vpop.f32.mrf.mxu3 }
 0xec2   :  { %v3229_v54 = vadd.f32 %v3536_v41, %v3228_v15 }
 0xec4   :  { %3233 = vst.msk [vmem:[#allocation3 + $0x1] sm:$0x1] %vm3231_vm10, %v3229_v54 }
 0xec5   :  { %3244 = dma.vmem_to_hbm [thread:$0]  %s3240_s18, 32, %s3242_s19, [#allocation4]  }
 0xec6   :  { %3755 = dma.done.wait [#allocation4], 32  }
 0xec7   :  { %3756 = vsyncadd [#allocation4], 4294967264 }
 0xec8   :  { %3249 = vsyncpa [#allocation4], 1 }

</bundles_post_ra>
